<compile_context>
chip_gen: v6e
topology: v6e:2x2x1
jax: 0.10.0
libtpu: 0.0.40
codegen_flags: <defaults>
</compile_context>

<pallas_src>
import functools

import jax
import jax.numpy as jnp
from jax import lax
from jax.experimental import pallas as pl
from jax.experimental.pallas import tpu as pltpu


_MIN_TILE = 1024        # row-tile granularity: keeps the (tile/128, 128) output
                        # block's second-minor dim a multiple of 8 (f32 tiling)
_MAX_TILE = 16384
_EPI_BLOCK_ROWS = 512   # (rows, 128) block per epilogue grid step (64K distances)


def _round_up(x, m):
    return ((x + m - 1) // m) * m


def _vmem_capacity_bytes():
    try:
        return int(pltpu.get_tpu_info().vmem_capacity_bytes)
    except Exception:
        return 64 * 1024 * 1024     # conservative fallback (v7x per-TC VMEM)


# ---------------------- Phase 1: cosine distance (lane-dense) -------------------

def _cosine_distance_kernel(a_ref, b_ref, d_ref):
    """d = 1 - cos(a, b), written lane-dense as (tile_rows // 128, 128)."""
    g, lanes = d_ref.shape                      # (tile_rows // 128, 128)
    feat = a_ref.shape[-1]
    # Leading-dim split only (free): minor dim stays `feat`.
    a = a_ref[...].astype(jnp.float32).reshape(g, lanes, feat)
    b = b_ref[...].astype(jnp.float32).reshape(g, lanes, feat)

    dot = jnp.sum(a * b, axis=-1)               # (g, 128)
    na2 = jnp.sum(a * a, axis=-1)
    nb2 = jnp.sum(b * b, axis=-1)

    # 1 / (max(|a|, eps) * max(|b|, eps)) via EUP rsqrt; eps matches torch's 1e-8.
    eps2 = jnp.float32(1e-16)
    inv = lax.rsqrt(jnp.maximum(na2, eps2)) * lax.rsqrt(jnp.maximum(nb2, eps2))
    d_ref[...] = 1.0 - dot * inv


def _distance_pass(a, b, tile_rows, num_tiles, vmem_limit):
    """Distance kernel over the leading `num_tiles * tile_rows` rows of a / b."""
    d_feat = a.shape[1]
    itemsize = jnp.dtype(a.dtype).itemsize
    rows = num_tiles * tile_rows
    cost = pl.CostEstimate(
        flops=int(6 * rows * d_feat + 8 * rows),
        transcendentals=int(2 * rows),
        bytes_accessed=int(2 * rows * d_feat * itemsize + rows * 4),
    )
    return pl.pallas_call(
        _cosine_distance_kernel,
        out_shape=jax.ShapeDtypeStruct((rows // 128, 128), jnp.float32),
        grid=(num_tiles,),
        in_specs=[
            pl.BlockSpec((tile_rows, d_feat), lambda i: (i, 0)),
            pl.BlockSpec((tile_rows, d_feat), lambda i: (i, 0)),
        ],
        out_specs=pl.BlockSpec((tile_rows // 128, 128), lambda i: (i, 0)),
        compiler_params=pltpu.CompilerParams(
            dimension_semantics=("parallel",),     # megacore-shardable on v7x
            vmem_limit_bytes=int(vmem_limit),
        ),
        cost_estimate=cost,
    )(a, b)


# --------------------- Phase 2: blocked class stats -> thresholds ---------------

def _stats_kernel(d_ref, lab_ref, thr_pos_ref, thr_neg_ref,
                  npos, nneg, psum, nsum, pmax, nmin):
    @pl.when(pl.program_id(0) == 0)
    def _():
        npos[...] = jnp.zeros_like(npos)
        nneg[...] = jnp.zeros_like(nneg)
        psum[...] = jnp.zeros_like(psum)
        nsum[...] = jnp.zeros_like(nsum)
        pmax[...] = jnp.full_like(pmax, -jnp.inf)
        nmin[...] = jnp.full_like(nmin, jnp.inf)

    d = d_ref[...]                               # (blk, 128) f32
    lab = lab_ref[...]                           # (blk, 128) int32 (-1 = padding)
    pos = lab == 1
    neg = lab == 0

    npos[...] += jnp.sum(pos.astype(jnp.float32), keepdims=True)
    nneg[...] += jnp.sum(neg.astype(jnp.float32), keepdims=True)
    psum[...] += jnp.sum(jnp.where(pos, d, 0.0), keepdims=True)
    nsum[...] += jnp.sum(jnp.where(neg, d, 0.0), keepdims=True)
    pmax[...] = jnp.maximum(pmax[...],
                            jnp.max(jnp.where(pos, d, -jnp.inf), keepdims=True))
    nmin[...] = jnp.minimum(nmin[...],
                            jnp.min(jnp.where(neg, d, jnp.inf), keepdims=True))

    @pl.when(pl.program_id(0) == pl.num_programs(0) - 1)
    def _():
        poss_mean = psum[...] / jnp.maximum(npos[...], 1.0)
        negs_mean = nsum[...] / jnp.maximum(nneg[...], 1.0)
        # threshold applied to negatives: poss.max() if len(poss) > 1 else negs.mean()
        thr_neg_ref[...] = jnp.where(npos[...] > 1.0, pmax[...], negs_mean)
        # threshold applied to positives: negs.min() if len(negs) > 1 else poss.mean()
        thr_pos_ref[...] = jnp.where(nneg[...] > 1.0, nmin[...], poss_mean)


# ------------------------- Phase 3: blocked masked loss sums --------------------

def _loss_kernel(thr_pos_ref, thr_neg_ref, d_ref, lab_ref, out_ref, acc, *, margin):
    @pl.when(pl.program_id(0) == 0)
    def _():
        acc[...] = jnp.zeros_like(acc)

    d = d_ref[...]
    lab = lab_ref[...]
    pos = lab == 1
    neg = lab == 0

    pp = jnp.logical_and(pos, d > thr_pos_ref[...])      # filtered positive pairs
    nn = jnp.logical_and(neg, d < thr_neg_ref[...])      # filtered negative pairs

    hinge = jnp.maximum(jnp.float32(margin) - d, 0.0)
    acc[...] += (jnp.sum(jnp.where(pp, d * d, 0.0), keepdims=True)
                 + jnp.sum(jnp.where(nn, hinge * hinge, 0.0), keepdims=True))

    @pl.when(pl.program_id(0) == pl.num_programs(0) - 1)
    def _():
        out_ref[...] = acc[...]


# ----------------------------------- Wrapper ------------------------------------

def contrastive_loss(embedding_a, embedding_b, labels, margin=0.5, tile_n=None):
    """Pallas TPU implementation of ContrastiveLoss.forward.

    embedding_a, embedding_b: [N, D] float arrays.
    labels: [N] (or [N, 1]) int array of 0/1.  Returns a float32 scalar.
    """
    a = jnp.asarray(embedding_a)
    b = jnp.asarray(embedding_b)
    assert a.ndim == 2 and a.shape == b.shape
    n, d_feat = a.shape
    itemsize = jnp.dtype(a.dtype).itemsize

    # VMEM-derived row tile: inputs are lane-padded in VMEM, include the f32
    # cast/product temporaries and the (tiny) lane-dense output double buffer.
    vmem_phys = _vmem_capacity_bytes()
    vmem_budget = vmem_phys // 2                          # scoped-VMEM request
    lane_w = _round_up(d_feat, 128)
    bytes_per_row = (2 * 2 * lane_w * itemsize            # a & b, double-buffered
                     + 3 * lane_w * 4                     # f32 casts / products
                     + 2 * 4)                             # lane-dense f32 out x2
    if tile_n is None:
        usable = (vmem_budget * 3) // 4                   # 25% headroom
        tile_n = usable // bytes_per_row
        tile_n = max(_MIN_TILE, min(_MAX_TILE, (tile_n // _MIN_TILE) * _MIN_TILE))
        if n >= 2 * _MIN_TILE:
            # >= 2 grid steps so the "parallel" axis shards across both v7x cores.
            tile_n = min(tile_n, _round_up(pl.cdiv(n, 2), _MIN_TILE))
    assert tile_n % _MIN_TILE == 0
    # If even the minimum tile busts the requested budget (very large D), raise
    # the scoped limit toward physical VMEM.
    # TODO(synk): add a feature-dim reduction grid axis for D too large for one tile.
    need = tile_n * bytes_per_row
    vmem_limit = int(min(max(vmem_budget, need + need // 4), vmem_phys - (4 << 20)))

    # ----- Phase 1: stream the un-padded embeddings; handle the ragged tail with
    #       a tiny zero-padded second call of the same kernel. -----
    n_main = (n // tile_n) * tile_n
    tail = n - n_main

    d_parts = []
    if n_main > 0:
        d_parts.append(_distance_pass(a, b, tile_n, n_main // tile_n, vmem_limit))
    if tail > 0:
        t_rows = _round_up(tail, _MIN_TILE)
        a_t = jnp.pad(a[n_main:], ((0, t_rows - tail), (0, 0)))
        b_t = jnp.pad(b[n_main:], ((0, t_rows - tail), (0, 0)))
        d_parts.append(_distance_pass(a_t, b_t, _MIN_TILE, t_rows // _MIN_TILE,
                                      vmem_limit))

    r_cat = sum(int(p.shape[0]) for p in d_parts)         # multiple of 8
    if r_cat <= _EPI_BLOCK_ROWS:
        blk_rows, r_final = r_cat, r_cat
    else:
        blk_rows = _EPI_BLOCK_ROWS
        r_final = _round_up(r_cat, blk_rows)
        if r_final > r_cat:
            d_parts.append(jnp.zeros((r_final - r_cat, 128), jnp.float32))
    d_lane = d_parts[0] if len(d_parts) == 1 else jnp.concatenate(d_parts, axis=0)

    lab = jnp.asarray(labels, dtype=jnp.int32).reshape(-1)
    lab_lane = jnp.pad(lab, (0, r_final * 128 - n),
                       constant_values=-1).reshape(r_final, 128)

    n_blocks = r_final // blk_rows
    epi_params = pltpu.CompilerParams(
        dimension_semantics=("arbitrary",),
        vmem_limit_bytes=int(min(vmem_budget, 32 << 20)),
    )
    row_spec = pl.BlockSpec((blk_rows, 128), lambda i: (i, 0))
    scalar_spec = pl.BlockSpec((1, 1), lambda i: (0, 0))

    # ----- Phase 2: blocked class statistics -> thresholds. -----
    thr_pos, thr_neg = pl.pallas_call(
        _stats_kernel,
        out_shape=(jax.ShapeDtypeStruct((1, 1), jnp.float32),
                   jax.ShapeDtypeStruct((1, 1), jnp.float32)),
        grid=(n_blocks,),
        in_specs=[row_spec, row_spec],
        out_specs=(scalar_spec, scalar_spec),
        scratch_shapes=[pltpu.VMEM((1, 1), jnp.float32) for _ in range(6)],
        compiler_params=epi_params,
    )(d_lane, lab_lane)

    # ----- Phase 3: blocked masked loss sums. -----
    loss = pl.pallas_call(
        functools.partial(_loss_kernel, margin=float(margin)),
        out_shape=jax.ShapeDtypeStruct((1, 1), jnp.float32),
        grid=(n_blocks,),
        in_specs=[scalar_spec, scalar_spec, row_spec, row_spec],
        out_specs=scalar_spec,
        scratch_shapes=[pltpu.VMEM((1, 1), jnp.float32)],
        compiler_params=epi_params,
    )(thr_pos, thr_neg, d_lane, lab_lane)
    return loss[0, 0]


# ---------------------------------- Reference -----------------------------------

def _reference_loss(a, b, labels, margin=0.5):
    """Pure-JAX reference mirroring the PyTorch semantics."""
    eps = 1e-8
    dot = jnp.sum(a * b, axis=1)
    na = jnp.sqrt(jnp.sum(a * a, axis=1))
    nb = jnp.sqrt(jnp.sum(b * b, axis=1))
    dist = 1.0 - dot / (jnp.maximum(na, eps) * jnp.maximum(nb, eps))
    pos_mask = labels == 1
    neg_mask = labels == 0
    n_pos = jnp.sum(pos_mask)
    n_neg = jnp.sum(neg_mask)
    poss_max = jnp.max(jnp.where(pos_mask, dist, -jnp.inf))
    negs_min = jnp.min(jnp.where(neg_mask, dist, jnp.inf))
    negs_mean = jnp.sum(jnp.where(neg_mask, dist, 0.0)) / jnp.maximum(n_neg, 1)
    poss_mean = jnp.sum(jnp.where(pos_mask, dist, 0.0)) / jnp.maximum(n_pos, 1)
    thr_neg = jnp.where(n_pos > 1, poss_max, negs_mean)
    thr_pos = jnp.where(n_neg > 1, negs_min, poss_mean)
    pp = jnp.logical_and(pos_mask, dist > thr_pos)
    nn = jnp.logical_and(neg_mask, dist < thr_neg)
    pos_loss = jnp.sum(jnp.where(pp, dist * dist, 0.0))
    hinge = jnp.maximum(margin - dist, 0.0)
    neg_loss = jnp.sum(jnp.where(nn, hinge * hinge, 0.0))
    return pos_loss + neg_loss


if __name__ == "__main__":
    key = jax.random.PRNGKey(0)
    k_a, k_b, k_c, k_d, k_e, k_f = jax.random.split(key, 6)

    # 1) Module-scale problem (small batch, small embedding dim).
    N, D = 8, 32
    ea = jax.random.normal(k_a, (N, D), dtype=jnp.float32)
    eb = jax.random.normal(k_b, (N, D), dtype=jnp.float32)
    labels = jnp.array([0, 1, 0, 1, 1, 0, 1, 0], dtype=jnp.int32)
    out = jax.block_until_ready(contrastive_loss(ea, eb, labels, margin=0.5))
    ref = _reference_loss(ea, eb, labels, margin=0.5)
    assert jnp.allclose(out, ref, rtol=1e-5, atol=1e-5), (out, ref)

    # 2) Multi-tile streamed (un-padded) path + ragged tail handled separately.
    N2, D2 = 2500, 64
    a2 = jax.random.normal(k_c, (N2, D2), dtype=jnp.float32)
    b2 = jax.random.normal(k_d, (N2, D2), dtype=jnp.float32)
    labels2 = (jnp.arange(N2) % 3 == 0).astype(jnp.int32)
    out2 = jax.block_until_ready(
        contrastive_loss(a2, b2, labels2, margin=0.5, tile_n=1024))
    ref2 = _reference_loss(a2, b2, labels2, margin=0.5)
    assert jnp.allclose(out2, ref2, rtol=1e-4, atol=1e-4), (out2, ref2)

    # 3) Tail-only path with N not a multiple of 128.
    N3, D3 = 300, 32
    a3 = jax.random.normal(k_e, (N3, D3), dtype=jnp.float32)
    b3 = jax.random.normal(k_f, (N3, D3), dtype=jnp.float32)
    labels3 = (jnp.arange(N3) % 2).astype(jnp.int32)
    out3 = jax.block_until_ready(contrastive_loss(a3, b3, labels3, margin=0.5))
    ref3 = _reference_loss(a3, b3, labels3, margin=0.5)
    assert jnp.allclose(out3, ref3, rtol=1e-4, atol=1e-4), (out3, ref3)

    print("KERNEL_OK")
</pallas_src>

<mosaic_0001>
module attributes {stable_mosaic.version = 11 : i64} {
  func.func @_cosine_distance_kernel(%arg0: i32, %arg1: memref<1024x32xf32, #tpu.memory_space<vmem>>, %arg2: memref<1024x32xf32, #tpu.memory_space<vmem>>, %arg3: memref<8x128xf32, #tpu.memory_space<vmem>>) attributes {dimension_semantics = [#tpu.dimension_semantics<parallel>], iteration_bounds = array<i64: 1>, scalar_prefetch = 0 : i64, scratch_operands = 0 : i64, tpu.core_type = #tpu.core_type<tc>, window_params = [{transform_indices = @transform_0, window_bounds = array<i64: 1024, 32>}, {transform_indices = @transform_1, window_bounds = array<i64: 1024, 32>}, {transform_indices = @transform_2, window_bounds = array<i64: 8, 128>}]} {
    %c0 = arith.constant 0 : index
    %c0_0 = arith.constant 0 : index
    %0 = vector.load %arg1[%c0, %c0_0] : memref<1024x32xf32, #tpu.memory_space<vmem>>, vector<1024x32xf32>
    %1 = vector.shape_cast %0 : vector<1024x32xf32> to vector<8x128x32xf32>
    %c0_1 = arith.constant 0 : index
    %c0_2 = arith.constant 0 : index
    %2 = vector.load %arg2[%c0_1, %c0_2] : memref<1024x32xf32, #tpu.memory_space<vmem>>, vector<1024x32xf32>
    %3 = vector.shape_cast %2 : vector<1024x32xf32> to vector<8x128x32xf32>
    %4 = arith.mulf %1, %3 : vector<8x128x32xf32>
    %cst = arith.constant dense<0.000000e+00> : vector<8x128xf32>
    %5 = vector.multi_reduction <add>, %4, %cst [2] : vector<8x128x32xf32> to vector<8x128xf32>
    %6 = arith.mulf %1, %1 : vector<8x128x32xf32>
    %cst_3 = arith.constant dense<0.000000e+00> : vector<8x128xf32>
    %7 = vector.multi_reduction <add>, %6, %cst_3 [2] : vector<8x128x32xf32> to vector<8x128xf32>
    %8 = arith.mulf %3, %3 : vector<8x128x32xf32>
    %cst_4 = arith.constant dense<0.000000e+00> : vector<8x128xf32>
    %9 = vector.multi_reduction <add>, %8, %cst_4 [2] : vector<8x128x32xf32> to vector<8x128xf32>
    %cst_5 = arith.constant 1.000000e-16 : f32
    %10 = vector.broadcast %cst_5 : f32 to vector<8x128xf32>
    %11 = arith.maximumf %7, %10 : vector<8x128xf32>
    %12 = math.rsqrt %11 : vector<8x128xf32>
    %cst_6 = arith.constant 1.000000e-16 : f32
    %13 = vector.broadcast %cst_6 : f32 to vector<8x128xf32>
    %14 = arith.maximumf %9, %13 : vector<8x128xf32>
    %15 = math.rsqrt %14 : vector<8x128xf32>
    %16 = arith.mulf %12, %15 : vector<8x128xf32>
    %17 = arith.mulf %5, %16 : vector<8x128xf32>
    %cst_7 = arith.constant 1.000000e+00 : f32
    %18 = vector.broadcast %cst_7 : f32 to vector<8x128xf32>
    %19 = arith.subf %18, %17 : vector<8x128xf32>
    %c0_8 = arith.constant 0 : index
    %c0_9 = arith.constant 0 : index
    %20 = vector.load %arg3[%c0_8, %c0_9] : memref<8x128xf32, #tpu.memory_space<vmem>>, vector<8x128xf32>
    tpu.vector_store %arg3[%c0_8, %c0_9], %19 {strides = array<i32>} : memref<8x128xf32, #tpu.memory_space<vmem>>, vector<8x128xf32>,
    return
  }
  func.func @transform_0(%arg0: i32) -> (i32, i32) {
    %c0_i32 = arith.constant 0 : i32
    %c0_i32_0 = arith.constant 0 : i32
    return %arg0, %c0_i32 : i32, i32
  }
  func.func @transform_1(%arg0: i32) -> (i32, i32) {
    %c0_i32 = arith.constant 0 : i32
    %c0_i32_0 = arith.constant 0 : i32
    return %arg0, %c0_i32 : i32, i32
  }
  func.func @transform_2(%arg0: i32) -> (i32, i32) {
    %c0_i32 = arith.constant 0 : i32
    %c0_i32_0 = arith.constant 0 : i32
    return %arg0, %c0_i32 : i32, i32
  }
}

</mosaic_0001>

<bundles_post_ra>
// kernel: tpu_custom_call.1
= control target key start
LH: loop header
LB: loop body
LE: loop exit
PB: predicated region body
PF: predicated region fallthrough
CT: control target
= control target key end

     0   :  { %vm396_vm0 = vcmask 261120   ;;  %s7983_s0 = inlined_call_operand.vmem [shape: f32[1024,32], index: 0, kind: input, shape index: {}]   ;;  %s7984_s1 = inlined_call_operand.vmem [shape: f32[1024,32], index: 1, kind: input, shape index: {}]   ;;  %s7985_s2 = inlined_call_operand.hbm [shape: f32[8,128], index: 2, kind: output, shape index: {}]  }
   0x1   :  { %v14_v0 = vld [vmem:[%s7983_s0 + $0x10] sm:$0xff]  ;;  %v12_v2 = vld [vmem:[%s7983_s0] sm:$0xff]  ;;  %v15_v5 = vld [vmem:[%s7983_s0 + $0x18] sm:$0xff] }
   0x2   :  { %v142_v1 = vld [vmem:[%s7984_s1 + $0x10] sm:$0xff]  ;;  %v140_v4 = vld [vmem:[%s7984_s1] sm:$0xff]  ;;  %v143_v6 = vld [vmem:[%s7984_s1 + $0x18] sm:$0xff] }
   0x3   :  { %v270_v3 = vmul.f32 %v142_v1, %v14_v0  ;;  %v268_v7 = vmul.f32 %v140_v4, %v12_v2  ;;  %v271_v8 = vmul.f32 %v143_v6, %v15_v5  ;;  %v13_v9 = vld [vmem:[%s7983_s0 + $0x8] sm:$0xff]  ;;  %v16_v15 = vld [vmem:[%s7983_s0 + $0x20] sm:$0xff]  ;;  %v19_v22 = vld [vmem:[%s7983_s0 + $0x38] sm:$0xff] }
   0x4   :  { %v141_v10 = vld [vmem:[%s7984_s1 + $0x8] sm:$0xff]  ;;  %v144_v16 = vld [vmem:[%s7984_s1 + $0x20] sm:$0xff]  ;;  %v147_v23 = vld [vmem:[%s7984_s1 + $0x38] sm:$0xff] }
   0x5   :  { %v17_v11 = vld [vmem:[%s7983_s0 + $0x28] sm:$0xff]  ;;  %v403_v12 = vsel %vm396_vm0, %v270_v3, 0.0  ;;  %v269_v13 = vmul.f32 %v141_v10, %v13_v9  ;;  %v397_v17 = vsel %vm396_vm0, %v268_v7, 0.0  ;;  %v406_v18 = vsel %vm396_vm0, %v271_v8, 0.0  ;;  %v18_v24 = vld [vmem:[%s7983_s0 + $0x30] sm:$0xff]  ;;  %v20_v32 = vld [vmem:[%s7983_s0 + $0x40] sm:$0xff] }
   0x6   :  { %v145_v14 = vld [vmem:[%s7984_s1 + $0x28] sm:$0xff]  ;;  %404 = vadd.xlane.f32.xlu1 %v403_v12  ;;  %398 = vadd.xlane.f32.xlu0 %v397_v17  ;;  %v272_v21 = vmul.f32 %v144_v16, %v16_v15  ;;  %v146_v25 = vld [vmem:[%s7984_s1 + $0x30] sm:$0xff]  ;;  %v275_v27 = vmul.f32 %v147_v23, %v19_v22  ;;  %v148_v33 = vld [vmem:[%s7984_s1 + $0x40] sm:$0xff] }
   0x7   :  { %v273_v19 = vmul.f32 %v145_v14, %v17_v11  ;;  %v400_v20 = vsel %vm396_vm0, %v269_v13, 0.0  ;;  %v274_v29 = vmul.f32 %v146_v25, %v18_v24  ;;  %v21_v30 = vld [vmem:[%s7983_s0 + $0x48] sm:$0xff]  ;;  %v276_v37 = vmul.f32 %v148_v33, %v20_v32  ;;  %v23_v38 = vld [vmem:[%s7983_s0 + $0x58] sm:$0xff]  ;;  %v22_v40 = vld [vmem:[%s7983_s0 + $0x50] sm:$0xff] }
   0x8   :  { %v409_v28 = vsel %vm396_vm0, %v272_v21, 0.0  ;;  %v149_v31 = vld [vmem:[%s7984_s1 + $0x48] sm:$0xff]  ;;  %v418_v34 = vsel %vm396_vm0, %v275_v27, 0.0  ;;  %v151_v39 = vld [vmem:[%s7984_s1 + $0x58] sm:$0xff]  ;;  %v150_v41 = vld [vmem:[%s7984_s1 + $0x50] sm:$0xff] }
   0x9   :  { %v412_v26 = vsel %vm396_vm0, %v273_v19, 0.0  ;;  %v277_v35 = vmul.f32 %v149_v31, %v21_v30  ;;  %v415_v36 = vsel %vm396_vm0, %v274_v29, 0.0  ;;  %v279_v43 = vmul.f32 %v151_v39, %v23_v38  ;;  %v25_v46 = vld [vmem:[%s7983_s0 + $0x68] sm:$0xff]  ;;  %v24_v48 = vld [vmem:[%s7983_s0 + $0x60] sm:$0xff]  ;;  %v27_v54 = vld [vmem:[%s7983_s0 + $0x78] sm:$0xff] }
   0xa   :  { %407 = vadd.xlane.f32.xlu1 %v406_v18  ;;  %401 = vadd.xlane.f32.xlu0 %v400_v20  ;;  %v421_v44 = vsel %vm396_vm0, %v276_v37, 0.0  ;;  %v278_v45 = vmul.f32 %v150_v41, %v22_v40  ;;  %v153_v47 = vld [vmem:[%s7984_s1 + $0x68] sm:$0xff]  ;;  %v152_v49 = vld [vmem:[%s7984_s1 + $0x60] sm:$0xff]  ;;  %v155_v55 = vld [vmem:[%s7984_s1 + $0x78] sm:$0xff] }
   0xb   :  { %v424_v42 = vsel %vm396_vm0, %v277_v35, 0.0  ;;  %v430_v50 = vsel %vm396_vm0, %v279_v43, 0.0  ;;  %v281_v51 = vmul.f32 %v153_v47, %v25_v46  ;;  %v280_v53 = vmul.f32 %v152_v49, %v24_v48  ;;  %v26_v56 = vld [vmem:[%s7983_s0 + $0x70] sm:$0xff]  ;;  %v29_v62 = vld [vmem:[%s7983_s0 + $0x88] sm:$0xff]  ;;  %v28_v0 = vld [vmem:[%s7983_s0 + $0x80] sm:$0xff] }
   0xc   :  { %v427_v52 = vsel %vm396_vm0, %v278_v45, 0.0  ;;  %v154_v57 = vld [vmem:[%s7984_s1 + $0x70] sm:$0xff]  ;;  %v283_v59 = vmul.f32 %v155_v55, %v27_v54  ;;  %v157_v63 = vld [vmem:[%s7984_s1 + $0x88] sm:$0xff]  ;;  %v156_v1 = vld [vmem:[%s7984_s1 + $0x80] sm:$0xff] }
   0xd   :  { %v436_v58 = vsel %vm396_vm0, %v281_v51, 0.0  ;;  %v433_v60 = vsel %vm396_vm0, %v280_v53, 0.0  ;;  %v282_v61 = vmul.f32 %v154_v57, %v26_v56  ;;  %v285_v3 = vmul.f32 %v157_v63, %v29_v62  ;;  %v31_v6 = vld [vmem:[%s7983_s0 + $0x98] sm:$0xff]  ;;  %v30_v8 = vld [vmem:[%s7983_s0 + $0x90] sm:$0xff]  ;;  %v33_v14 = vld [vmem:[%s7983_s0 + $0xa8] sm:$0xff] }
   0xe   :  { %413 = vadd.xlane.f32.xlu1 %v412_v26  ;;  %410 = vadd.xlane.f32.xlu0 %v409_v28  ;;  %v442_v2 = vsel %vm396_vm0, %v283_v59, 0.0  ;;  %v284_v5 = vmul.f32 %v156_v1, %v28_v0  ;;  %v159_v7 = vld [vmem:[%s7984_s1 + $0x98] sm:$0xff]  ;;  %v158_v9 = vld [vmem:[%s7984_s1 + $0x90] sm:$0xff]  ;;  %v161_v15 = vld [vmem:[%s7984_s1 + $0xa8] sm:$0xff] }
   0xf   :  { %v439_v4 = vsel %vm396_vm0, %v282_v61, 0.0  ;;  %v448_v10 = vsel %vm396_vm0, %v285_v3, 0.0  ;;  %v287_v11 = vmul.f32 %v159_v7, %v31_v6  ;;  %v286_v13 = vmul.f32 %v158_v9, %v30_v8  ;;  %v32_v16 = vld [vmem:[%s7983_s0 + $0xa0] sm:$0xff]  ;;  %v35_v22 = vld [vmem:[%s7983_s0 + $0xb8] sm:$0xff]  ;;  %v34_v24 = vld [vmem:[%s7983_s0 + $0xb0] sm:$0xff] }
  0x10   :  { %v445_v12 = vsel %vm396_vm0, %v284_v5, 0.0  ;;  %v160_v17 = vld [vmem:[%s7984_s1 + $0xa0] sm:$0xff]  ;;  %v289_v19 = vmul.f32 %v161_v15, %v33_v14  ;;  %v163_v23 = vld [vmem:[%s7984_s1 + $0xb8] sm:$0xff]  ;;  %v162_v25 = vld [vmem:[%s7984_s1 + $0xb0] sm:$0xff] }
  0x11   :  { %v454_v18 = vsel %vm396_vm0, %v287_v11, 0.0  ;;  %v451_v20 = vsel %vm396_vm0, %v286_v13, 0.0  ;;  %v288_v21 = vmul.f32 %v160_v17, %v32_v16  ;;  %v291_v27 = vmul.f32 %v163_v23, %v35_v22  ;;  %v37_v30 = vld [vmem:[%s7983_s0 + $0xc8] sm:$0xff]  ;;  %v36_v32 = vld [vmem:[%s7983_s0 + $0xc0] sm:$0xff]  ;;  %v39_v38 = vld [vmem:[%s7983_s0 + $0xd8] sm:$0xff] }
  0x12   :  { %419 = vadd.xlane.f32.xlu1 %v418_v34  ;;  %416 = vadd.xlane.f32.xlu0 %v415_v36  ;;  %v460_v26 = vsel %vm396_vm0, %v289_v19, 0.0  ;;  %v290_v29 = vmul.f32 %v162_v25, %v34_v24  ;;  %v165_v31 = vld [vmem:[%s7984_s1 + $0xc8] sm:$0xff]  ;;  %v164_v33 = vld [vmem:[%s7984_s1 + $0xc0] sm:$0xff]  ;;  %v167_v39 = vld [vmem:[%s7984_s1 + $0xd8] sm:$0xff] }
  0x13   :  { %v457_v28 = vsel %vm396_vm0, %v288_v21, 0.0  ;;  %v466_v34 = vsel %vm396_vm0, %v291_v27, 0.0  ;;  %v293_v35 = vmul.f32 %v165_v31, %v37_v30  ;;  %v292_v37 = vmul.f32 %v164_v33, %v36_v32  ;;  %v38_v40 = vld [vmem:[%s7983_s0 + $0xd0] sm:$0xff]  ;;  %v41_v46 = vld [vmem:[%s7983_s0 + $0xe8] sm:$0xff]  ;;  %v40_v48 = vld [vmem:[%s7983_s0 + $0xe0] sm:$0xff] }
  0x14   :  { %v463_v36 = vsel %vm396_vm0, %v290_v29, 0.0  ;;  %v166_v41 = vld [vmem:[%s7984_s1 + $0xd0] sm:$0xff]  ;;  %v295_v43 = vmul.f32 %v167_v39, %v39_v38  ;;  %v169_v47 = vld [vmem:[%s7984_s1 + $0xe8] sm:$0xff]  ;;  %v168_v49 = vld [vmem:[%s7984_s1 + $0xe0] sm:$0xff] }
  0x15   :  { %v294_v45 = vmul.f32 %v166_v41, %v38_v40  ;;  %v297_v51 = vmul.f32 %v169_v47, %v41_v46  ;;  %v296_v53 = vmul.f32 %v168_v49, %v40_v48  ;;  %v43_v54 = vld [vmem:[%s7983_s0 + $0xf8] sm:$0xff]  ;;  %v42_v56 = vld [vmem:[%s7983_s0 + $0xf0] sm:$0xff]  ;;  %v45_v62 = vld [vmem:[%s7983_s0 + $0x108] sm:$0xff] }
  0x16   :  { %425 = vadd.xlane.f32.xlu1 %v424_v42  ;;  %422 = vadd.xlane.f32.xlu0 %v421_v44  ;;  %v472_v42 = vsel %vm396_vm0, %v293_v35, 0.0  ;;  %v469_v44 = vsel %vm396_vm0, %v292_v37, 0.0  ;;  %v171_v55 = vld [vmem:[%s7984_s1 + $0xf8] sm:$0xff]  ;;  %v170_v57 = vld [vmem:[%s7984_s1 + $0xf0] sm:$0xff]  ;;  %v173_v63 = vld [vmem:[%s7984_s1 + $0x108] sm:$0xff] }
  0x17   :  { %v299_v59 = vmul.f32 %v171_v55, %v43_v54  ;;  %v298_v61 = vmul.f32 %v170_v57, %v42_v56  ;;  %v44_v0 = vld [vmem:[%s7983_s0 + $0x100] sm:$0xff]  ;;  %v301_v3 = vmul.f32 %v173_v63, %v45_v62  ;;  %v47_v6 = vld [vmem:[%s7983_s0 + $0x118] sm:$0xff]  ;;  %v46_v8 = vld [vmem:[%s7983_s0 + $0x110] sm:$0xff] }
  0x18   :  { %v172_v1 = vld [vmem:[%s7984_s1 + $0x100] sm:$0xff]  ;;  %v175_v7 = vld [vmem:[%s7984_s1 + $0x118] sm:$0xff]  ;;  %v174_v9 = vld [vmem:[%s7984_s1 + $0x110] sm:$0xff] }
  0x19   :  { %v300_v5 = vmul.f32 %v172_v1, %v44_v0 }
  0x1a   :  { %431 = vadd.xlane.f32.xlu1 %v430_v50  ;;  %428 = vadd.xlane.f32.xlu0 %v427_v52  ;;  %v478_v50 = vsel %vm396_vm0, %v295_v43, 0.0  ;;  %v475_v52 = vsel %vm396_vm0, %v294_v45, 0.0 }
  0x1e   :  { %437 = vadd.xlane.f32.xlu1 %v436_v58  ;;  %434 = vadd.xlane.f32.xlu0 %v433_v60  ;;  %v484_v58 = vsel %vm396_vm0, %v297_v51, 0.0  ;;  %v481_v60 = vsel %vm396_vm0, %v296_v53, 0.0 }
  0x22   :  { %443 = vadd.xlane.f32.xlu1 %v442_v2  ;;  %440 = vadd.xlane.f32.xlu0 %v439_v4  ;;  %v490_v2 = vsel %vm396_vm0, %v299_v59, 0.0  ;;  %v487_v4 = vsel %vm396_vm0, %v298_v61, 0.0 }
  0x26   :  { %449 = vadd.xlane.f32.xlu1 %v448_v10  ;;  %446 = vadd.xlane.f32.xlu0 %v445_v12 }
  0x2a   :  { %455 = vadd.xlane.f32.xlu1 %v454_v18  ;;  %452 = vadd.xlane.f32.xlu0 %v451_v20 }
  0x2e   :  { %461 = vadd.xlane.f32.xlu1 %v460_v26  ;;  %458 = vadd.xlane.f32.xlu0 %v457_v28 }
  0x32   :  { %467 = vadd.xlane.f32.xlu1 %v466_v34  ;;  %464 = vadd.xlane.f32.xlu0 %v463_v36 }
  0x36   :  { %473 = vadd.xlane.f32.xlu1 %v472_v42  ;;  %470 = vadd.xlane.f32.xlu0 %v469_v44 }
  0x3a   :  { %479 = vadd.xlane.f32.xlu1 %v478_v50  ;;  %476 = vadd.xlane.f32.xlu0 %v475_v52 }
  0x3e   :  { %485 = vadd.xlane.f32.xlu1 %v484_v58  ;;  %482 = vadd.xlane.f32.xlu0 %v481_v60 }
  0x42   :  { %491 = vadd.xlane.f32.xlu1 %v490_v2 }
  0x43   :  { %7 = vsyncpa [#allocation3], 0  ;;  %488 = vadd.xlane.f32.xlu0 %v487_v4  ;;  %v496_v10 = vsel %vm396_vm0, %v301_v3, 0.0  ;;  %v303_v11 = vmul.f32 %v175_v7, %v47_v6  ;;  %v493_v12 = vsel %vm396_vm0, %v300_v5, 0.0  ;;  %v302_v13 = vmul.f32 %v174_v9, %v46_v8  ;;  %v49_v14 = vld [vmem:[%s7983_s0 + $0x128] sm:$0xff]  ;;  %v48_v16 = vld [vmem:[%s7983_s0 + $0x120] sm:$0xff] }
  0x44   :  { %v177_v15 = vld [vmem:[%s7984_s1 + $0x128] sm:$0xff]  ;;  %v176_v17 = vld [vmem:[%s7984_s1 + $0x120] sm:$0xff]  ;;  %v51_v22 = vld [vmem:[%s7983_s0 + $0x138] sm:$0xff]  ;;  %vm2840_vm1 = vcmask 130112   ;;  %vm2847_vm2 = vcmask 195712   ;;  %vm2854_vm3 = vcmask 261312  }
  0x45   :  { %v502_v18 = vsel %vm396_vm0, %v303_v11, 0.0  ;;  %v305_v19 = vmul.f32 %v177_v15, %v49_v14  ;;  %v499_v20 = vsel %vm396_vm0, %v302_v13, 0.0  ;;  %v304_v21 = vmul.f32 %v176_v17, %v48_v16  ;;  %v179_v23 = vld [vmem:[%s7984_s1 + $0x138] sm:$0xff]  ;;  %v50_v24 = vld [vmem:[%s7983_s0 + $0x130] sm:$0xff]  ;;  %v53_v30 = vld [vmem:[%s7983_s0 + $0x148] sm:$0xff] }
  0x46   :  { %497 = vadd.xlane.f32.xlu1 %v496_v10  ;;  %v178_v25 = vld [vmem:[%s7984_s1 + $0x130] sm:$0xff]  ;;  %v307_v27 = vmul.f32 %v179_v23, %v51_v22  ;;  %v181_v31 = vld [vmem:[%s7984_s1 + $0x148] sm:$0xff]  ;;  %v52_v32 = vld [vmem:[%s7983_s0 + $0x140] sm:$0xff]  ;;  %vm2861_vm4 = vcmask 326912   ;;  %vm2868_vm5 = vcmask 392512   ;;  %vm2875_vm6 = vcmask 458112  }
  0x47   :  { %494 = vadd.xlane.f32.xlu0 %v493_v12  ;;  %v508_v26 = vsel %vm396_vm0, %v305_v19, 0.0  ;;  %v505_v28 = vsel %vm396_vm0, %v304_v21, 0.0  ;;  %v306_v29 = vmul.f32 %v178_v25, %v50_v24  ;;  %v180_v33 = vld [vmem:[%s7984_s1 + $0x140] sm:$0xff]  ;;  %v309_v35 = vmul.f32 %v181_v31, %v53_v30  ;;  %v55_v38 = vld [vmem:[%s7983_s0 + $0x158] sm:$0xff]  ;;  %v54_v40 = vld [vmem:[%s7983_s0 + $0x150] sm:$0xff] }
  0x48   :  { %v514_v34 = vsel %vm396_vm0, %v307_v27, 0.0  ;;  %v308_v37 = vmul.f32 %v180_v33, %v52_v32  ;;  %v183_v39 = vld [vmem:[%s7984_s1 + $0x158] sm:$0xff]  ;;  %v182_v41 = vld [vmem:[%s7984_s1 + $0x150] sm:$0xff]  ;;  %v57_v46 = vld [vmem:[%s7983_s0 + $0x168] sm:$0xff]  ;;  %vm2882_vm7 = vcmask 523712   ;;  %vm2889_vm8 = vcmask 589312  }
  0x49   :  { %v511_v36 = vsel %vm396_vm0, %v306_v29, 0.0  ;;  %v520_v42 = vsel %vm396_vm0, %v309_v35, 0.0  ;;  %v311_v43 = vmul.f32 %v183_v39, %v55_v38  ;;  %v310_v45 = vmul.f32 %v182_v41, %v54_v40  ;;  %v185_v47 = vld [vmem:[%s7984_s1 + $0x168] sm:$0xff]  ;;  %v56_v48 = vld [vmem:[%s7983_s0 + $0x160] sm:$0xff]  ;;  %v59_v54 = vld [vmem:[%s7983_s0 + $0x178] sm:$0xff] }
  0x4a   :  { %503 = vadd.xlane.f32.xlu1 %v502_v18  ;;  %v517_v44 = vsel %vm396_vm0, %v308_v37, 0.0  ;;  %v184_v49 = vld [vmem:[%s7984_s1 + $0x160] sm:$0xff]  ;;  %v313_v51 = vmul.f32 %v185_v47, %v57_v46  ;;  %v187_v55 = vld [vmem:[%s7984_s1 + $0x178] sm:$0xff]  ;;  %v58_v56 = vld [vmem:[%s7983_s0 + $0x170] sm:$0xff]  ;;  %vm7989_vm9 = vcmask 654912   ;;  %vm2903_vm10 = vcmask 720512  }
  0x4b   :  { %500 = vadd.xlane.f32.xlu0 %v499_v20  ;;  %v526_v50 = vsel %vm396_vm0, %v311_v43, 0.0  ;;  %v523_v52 = vsel %vm396_vm0, %v310_v45, 0.0  ;;  %v312_v53 = vmul.f32 %v184_v49, %v56_v48  ;;  %v186_v57 = vld [vmem:[%s7984_s1 + $0x170] sm:$0xff]  ;;  %v315_v59 = vmul.f32 %v187_v55, %v59_v54  ;;  %v61_v62 = vld [vmem:[%s7983_s0 + $0x188] sm:$0xff]  ;;  %v60_v0 = vld [vmem:[%s7983_s0 + $0x180] sm:$0xff] }
  0x4c   :  { %v532_v58 = vsel %vm396_vm0, %v313_v51, 0.0  ;;  %v314_v61 = vmul.f32 %v186_v57, %v58_v56  ;;  %v189_v63 = vld [vmem:[%s7984_s1 + $0x188] sm:$0xff]  ;;  %v188_v1 = vld [vmem:[%s7984_s1 + $0x180] sm:$0xff]  ;;  %v63_v6 = vld [vmem:[%s7983_s0 + $0x198] sm:$0xff]  ;;  %vm2910_vm11 = vcmask 786112   ;;  %vm2917_vm12 = vcmask 851712  }
  0x4d   :  { %v529_v60 = vsel %vm396_vm0, %v312_v53, 0.0  ;;  %v538_v2 = vsel %vm396_vm0, %v315_v59, 0.0  ;;  %v317_v3 = vmul.f32 %v189_v63, %v61_v62  ;;  %v316_v5 = vmul.f32 %v188_v1, %v60_v0  ;;  %v191_v7 = vld [vmem:[%s7984_s1 + $0x198] sm:$0xff]  ;;  %v62_v8 = vld [vmem:[%s7983_s0 + $0x190] sm:$0xff]  ;;  %v65_v14 = vld [vmem:[%s7983_s0 + $0x1a8] sm:$0xff] }
  0x4e   :  { %509 = vadd.xlane.f32.xlu1 %v508_v26  ;;  %v535_v4 = vsel %vm396_vm0, %v314_v61, 0.0  ;;  %v190_v9 = vld [vmem:[%s7984_s1 + $0x190] sm:$0xff]  ;;  %v319_v11 = vmul.f32 %v191_v7, %v63_v6  ;;  %v193_v15 = vld [vmem:[%s7984_s1 + $0x1a8] sm:$0xff]  ;;  %v64_v16 = vld [vmem:[%s7983_s0 + $0x1a0] sm:$0xff]  ;;  %vm2924_vm13 = vcmask 917312   ;;  %vm2931_vm14 = vcmask 982912  }
  0x4f   :  { %506 = vadd.xlane.f32.xlu0 %v505_v28  ;;  %v544_v10 = vsel %vm396_vm0, %v317_v3, 0.0  ;;  %v541_v12 = vsel %vm396_vm0, %v316_v5, 0.0  ;;  %v318_v13 = vmul.f32 %v190_v9, %v62_v8  ;;  %v192_v17 = vld [vmem:[%s7984_s1 + $0x1a0] sm:$0xff]  ;;  %v321_v19 = vmul.f32 %v193_v15, %v65_v14  ;;  %v67_v22 = vld [vmem:[%s7983_s0 + $0x1b8] sm:$0xff]  ;;  %v66_v24 = vld [vmem:[%s7983_s0 + $0x1b0] sm:$0xff] }
  0x50   :  { %v550_v18 = vsel %vm396_vm0, %v319_v11, 0.0  ;;  %v320_v21 = vmul.f32 %v192_v17, %v64_v16  ;;  %v195_v23 = vld [vmem:[%s7984_s1 + $0x1b8] sm:$0xff]  ;;  %v194_v25 = vld [vmem:[%s7984_s1 + $0x1b0] sm:$0xff]  ;;  %v69_v30 = vld [vmem:[%s7983_s0 + $0x1c8] sm:$0xff]  ;;  %vm2938_vm15 = vcmask 1048512  }
  0x51   :  { %v547_v20 = vsel %vm396_vm0, %v318_v13, 0.0  ;;  %v556_v26 = vsel %vm396_vm0, %v321_v19, 0.0  ;;  %v323_v27 = vmul.f32 %v195_v23, %v67_v22  ;;  %v322_v29 = vmul.f32 %v194_v25, %v66_v24  ;;  %v197_v31 = vld [vmem:[%s7984_s1 + $0x1c8] sm:$0xff]  ;;  %v68_v32 = vld [vmem:[%s7983_s0 + $0x1c0] sm:$0xff]  ;;  %v71_v38 = vld [vmem:[%s7983_s0 + $0x1d8] sm:$0xff] }
  0x52   :  { %515 = vadd.xlane.f32.xlu1 %v514_v34  ;;  %v553_v28 = vsel %vm396_vm0, %v320_v21, 0.0  ;;  %v196_v33 = vld [vmem:[%s7984_s1 + $0x1c0] sm:$0xff]  ;;  %v325_v35 = vmul.f32 %v197_v31, %v69_v30  ;;  %v199_v39 = vld [vmem:[%s7984_s1 + $0x1d8] sm:$0xff]  ;;  %v70_v40 = vld [vmem:[%s7983_s0 + $0x1d0] sm:$0xff] }
  0x53   :  { %512 = vadd.xlane.f32.xlu0 %v511_v36  ;;  %v562_v34 = vsel %vm396_vm0, %v323_v27, 0.0  ;;  %v559_v36 = vsel %vm396_vm0, %v322_v29, 0.0  ;;  %v324_v37 = vmul.f32 %v196_v33, %v68_v32  ;;  %v198_v41 = vld [vmem:[%s7984_s1 + $0x1d0] sm:$0xff]  ;;  %v327_v43 = vmul.f32 %v199_v39, %v71_v38  ;;  %v73_v46 = vld [vmem:[%s7983_s0 + $0x1e8] sm:$0xff]  ;;  %v72_v48 = vld [vmem:[%s7983_s0 + $0x1e0] sm:$0xff] }
  0x54   :  { %v326_v45 = vmul.f32 %v198_v41, %v70_v40  ;;  %v201_v47 = vld [vmem:[%s7984_s1 + $0x1e8] sm:$0xff]  ;;  %v200_v49 = vld [vmem:[%s7984_s1 + $0x1e0] sm:$0xff]  ;;  %v75_v54 = vld [vmem:[%s7983_s0 + $0x1f8] sm:$0xff] }
  0x55   :  { %v329_v51 = vmul.f32 %v201_v47, %v73_v46  ;;  %v328_v53 = vmul.f32 %v200_v49, %v72_v48  ;;  %v203_v55 = vld [vmem:[%s7984_s1 + $0x1f8] sm:$0xff]  ;;  %v74_v56 = vld [vmem:[%s7983_s0 + $0x1f0] sm:$0xff]  ;;  %v77_v62 = vld [vmem:[%s7983_s0 + $0x208] sm:$0xff] }
  0x56   :  { %521 = vadd.xlane.f32.xlu1 %v520_v42  ;;  %v568_v42 = vsel %vm396_vm0, %v325_v35, 0.0  ;;  %v202_v57 = vld [vmem:[%s7984_s1 + $0x1f0] sm:$0xff]  ;;  %v331_v59 = vmul.f32 %v203_v55, %v75_v54  ;;  %v205_v63 = vld [vmem:[%s7984_s1 + $0x208] sm:$0xff]  ;;  %v76_v0 = vld [vmem:[%s7983_s0 + $0x200] sm:$0xff] }
  0x57   :  { %518 = vadd.xlane.f32.xlu0 %v517_v44  ;;  %v565_v44 = vsel %vm396_vm0, %v324_v37, 0.0  ;;  %v330_v61 = vmul.f32 %v202_v57, %v74_v56  ;;  %v204_v1 = vld [vmem:[%s7984_s1 + $0x200] sm:$0xff]  ;;  %v333_v3 = vmul.f32 %v205_v63, %v77_v62  ;;  %v79_v6 = vld [vmem:[%s7983_s0 + $0x218] sm:$0xff]  ;;  %v78_v8 = vld [vmem:[%s7983_s0 + $0x210] sm:$0xff] }
  0x58   :  { %v332_v5 = vmul.f32 %v204_v1, %v76_v0  ;;  %v207_v7 = vld [vmem:[%s7984_s1 + $0x218] sm:$0xff]  ;;  %v206_v9 = vld [vmem:[%s7984_s1 + $0x210] sm:$0xff]  ;;  %v81_v14 = vld [vmem:[%s7983_s0 + $0x228] sm:$0xff] }
  0x59   :  { %v335_v11 = vmul.f32 %v207_v7, %v79_v6  ;;  %v334_v13 = vmul.f32 %v206_v9, %v78_v8  ;;  %v209_v15 = vld [vmem:[%s7984_s1 + $0x228] sm:$0xff]  ;;  %v80_v16 = vld [vmem:[%s7983_s0 + $0x220] sm:$0xff]  ;;  %v83_v22 = vld [vmem:[%s7983_s0 + $0x238] sm:$0xff] }
  0x5a   :  { %527 = vadd.xlane.f32.xlu1 %v526_v50  ;;  %v574_v50 = vsel %vm396_vm0, %v327_v43, 0.0  ;;  %v208_v17 = vld [vmem:[%s7984_s1 + $0x220] sm:$0xff]  ;;  %v337_v19 = vmul.f32 %v209_v15, %v81_v14  ;;  %v211_v23 = vld [vmem:[%s7984_s1 + $0x238] sm:$0xff]  ;;  %v82_v24 = vld [vmem:[%s7983_s0 + $0x230] sm:$0xff] }
  0x5b   :  { %524 = vadd.xlane.f32.xlu0 %v523_v52  ;;  %v571_v52 = vsel %vm396_vm0, %v326_v45, 0.0  ;;  %v336_v21 = vmul.f32 %v208_v17, %v80_v16  ;;  %v210_v25 = vld [vmem:[%s7984_s1 + $0x230] sm:$0xff]  ;;  %v339_v27 = vmul.f32 %v211_v23, %v83_v22  ;;  %v85_v30 = vld [vmem:[%s7983_s0 + $0x248] sm:$0xff]  ;;  %v84_v32 = vld [vmem:[%s7983_s0 + $0x240] sm:$0xff] }
  0x5c   :  { %v338_v29 = vmul.f32 %v210_v25, %v82_v24  ;;  %v213_v31 = vld [vmem:[%s7984_s1 + $0x248] sm:$0xff]  ;;  %v212_v33 = vld [vmem:[%s7984_s1 + $0x240] sm:$0xff]  ;;  %v87_v40 = vld [vmem:[%s7983_s0 + $0x258] sm:$0xff] }
  0x5d   :  { %v610_v35 = vsel %vm396_vm0, %v339_v27, 0.0  ;;  %v340_v39 = vmul.f32 %v212_v33, %v84_v32  ;;  %v215_v41 = vld [vmem:[%s7984_s1 + $0x258] sm:$0xff]  ;;  %v214_v43 = vld [vmem:[%s7984_s1 + $0x250] sm:$0xff]  ;;  %v93_v6 = vld [vmem:[%s7983_s0 + $0x288] sm:$0xff] }
  0x5e   :  { %533 = vadd.xlane.f32.xlu1 %v532_v58  ;;  %v580_v58 = vsel %vm396_vm0, %v329_v51, 0.0  ;;  %v607_v38 = vsel %vm396_vm0, %v338_v29, 0.0  ;;  %v343_v46 = vmul.f32 %v215_v41, %v87_v40  ;;  %v217_v51 = vld [vmem:[%s7984_s1 + $0x268] sm:$0xff]  ;;  %v90_v62 = vld [vmem:[%s7983_s0 + $0x270] sm:$0xff]  ;;  %v92_v8 = vld [vmem:[%s7983_s0 + $0x280] sm:$0xff] }
  0x5f   :  { %530 = vadd.xlane.f32.xlu0 %v529_v60  ;;  %v577_v60 = vsel %vm396_vm0, %v328_v53, 0.0  ;;  %v613_v48 = vsel %vm396_vm0, %v340_v39, 0.0  ;;  %v216_v53 = vld [vmem:[%s7984_s1 + $0x260] sm:$0xff]  ;;  %v218_v63 = vld [vmem:[%s7984_s1 + $0x270] sm:$0xff]  ;;  %v221_v7 = vld [vmem:[%s7984_s1 + $0x288] sm:$0xff] }
  0x60   :  { %v622_v55 = vsel %vm396_vm0, %v343_v46, 0.0  ;;  %v220_v9 = vld [vmem:[%s7984_s1 + $0x280] sm:$0xff]  ;;  %v95_v16 = vld [vmem:[%s7983_s0 + $0x298] sm:$0xff]  ;;  %v225_v27 = vld [vmem:[%s7984_s1 + $0x2a8] sm:$0xff] }
  0x61   :  { %v348_v15 = vmul.f32 %v220_v9, %v92_v8  ;;  %v223_v17 = vld [vmem:[%s7984_s1 + $0x298] sm:$0xff]  ;;  %v224_v29 = vld [vmem:[%s7984_s1 + $0x2a0] sm:$0xff]  ;;  %v98_v40 = vld [vmem:[%s7983_s0 + $0x2b0] sm:$0xff] }
  0x62   :  { %539 = vadd.xlane.f32.xlu1 %v538_v2  ;;  %v586_v2 = vsel %vm396_vm0, %v331_v59, 0.0  ;;  %v351_v22 = vmul.f32 %v223_v17, %v95_v16  ;;  %v227_v39 = vld [vmem:[%s7984_s1 + $0x2b8] sm:$0xff]  ;;  %v226_v41 = vld [vmem:[%s7984_s1 + $0x2b0] sm:$0xff] }
  0x63   :  { %536 = vadd.xlane.f32.xlu0 %v535_v4  ;;  %v583_v4 = vsel %vm396_vm0, %v330_v61, 0.0  ;;  %v219_v61 = vld [vmem:[%s7984_s1 + $0x278] sm:$0xff]  ;;  %v637_v24 = vsel %vm396_vm0, %v348_v15, 0.0  ;;  %v232_v15 = vld [vmem:[%s7984_s1 + $0x2e0] sm:$0xff] }
  0x66   :  { %545 = vadd.xlane.f32.xlu1 %v544_v10  ;;  %v592_v10 = vsel %vm396_vm0, %v333_v3, 0.0 }
  0x67   :  { %542 = vadd.xlane.f32.xlu0 %v541_v12  ;;  %v589_v12 = vsel %vm396_vm0, %v332_v5, 0.0  ;;  %v346_v5 = vmul.f32 %v218_v63, %v90_v62  ;;  %v103_v62 = vld [vmem:[%s7983_s0 + $0x2d8] sm:$0xff] }
  0x68   :  { %v231_v63 = vld [vmem:[%s7984_s1 + $0x2d8] sm:$0xff] }
  0x69   :  { %v631_v14 = vsel %vm396_vm0, %v346_v5, 0.0 }
  0x6a   :  { %551 = vadd.xlane.f32.xlu1 %v550_v18  ;;  %v598_v18 = vsel %vm396_vm0, %v335_v11, 0.0 }
  0x6b   :  { %548 = vadd.xlane.f32.xlu0 %v547_v20  ;;  %v595_v20 = vsel %vm396_vm0, %v334_v13, 0.0 }
  0x6e   :  { %557 = vadd.xlane.f32.xlu1 %v556_v26  ;;  %v604_v26 = vsel %vm396_vm0, %v337_v19, 0.0  ;;  %v222_v19 = vld [vmem:[%s7984_s1 + $0x290] sm:$0xff] }
  0x6f   :  { %554 = vadd.xlane.f32.xlu0 %v553_v28  ;;  %v601_v28 = vsel %vm396_vm0, %v336_v21, 0.0 }
  0x72   :  { %563 = vadd.xlane.f32.xlu1 %v562_v34 }
  0x73   :  { %560 = vadd.xlane.f32.xlu0 %v559_v36  ;;  %v341_v36 = vmul.f32 %v213_v31, %v85_v30  ;;  %v646_v31 = vsel %vm396_vm0, %v351_v22, 0.0 }
  0x75   :  { %v616_v45 = vsel %vm396_vm0, %v341_v36, 0.0 }
  0x76   :  { %569 = vadd.xlane.f32.xlu1 %v568_v42  ;;  %v86_v42 = vld [vmem:[%s7983_s0 + $0x250] sm:$0xff] }
  0x77   :  { %566 = vadd.xlane.f32.xlu0 %v565_v44  ;;  %v342_v49 = vmul.f32 %v214_v43, %v86_v42 }
  0x7a   :  { %575 = vadd.xlane.f32.xlu1 %v574_v50  ;;  %v89_v50 = vld [vmem:[%s7983_s0 + $0x268] sm:$0xff] }
  0x7b   :  { %572 = vadd.xlane.f32.xlu0 %v571_v52  ;;  %v88_v52 = vld [vmem:[%s7983_s0 + $0x260] sm:$0xff]  ;;  %v345_v56 = vmul.f32 %v217_v51, %v89_v50  ;;  %v101_v50 = vld [vmem:[%s7983_s0 + $0x2c8] sm:$0xff] }
  0x7c   :  { %v344_v59 = vmul.f32 %v216_v53, %v88_v52  ;;  %v229_v51 = vld [vmem:[%s7984_s1 + $0x2c8] sm:$0xff]  ;;  %v100_v52 = vld [vmem:[%s7983_s0 + $0x2c0] sm:$0xff] }
  0x7d   :  { %v628_v1 = vsel %vm396_vm0, %v345_v56, 0.0  ;;  %v228_v53 = vld [vmem:[%s7984_s1 + $0x2c0] sm:$0xff] }
  0x7e   :  { %581 = vadd.xlane.f32.xlu1 %v580_v58  ;;  %v619_v58 = vsel %vm396_vm0, %v342_v49, 0.0  ;;  %v354_v49 = vmul.f32 %v226_v41, %v98_v40  ;;  %v108_v40 = vld [vmem:[%s7983_s0 + $0x300] sm:$0xff] }
  0x7f   :  { %578 = vadd.xlane.f32.xlu0 %v577_v60  ;;  %v91_v60 = vld [vmem:[%s7983_s0 + $0x278] sm:$0xff]  ;;  %v236_v41 = vld [vmem:[%s7984_s1 + $0x300] sm:$0xff] }
  0x82   :  { %587 = vadd.xlane.f32.xlu1 %v586_v2  ;;  %v347_v2 = vmul.f32 %v219_v61, %v91_v60  ;;  %v655_v60 = vsel %vm396_vm0, %v354_v49, 0.0  ;;  %v356_v61 = vmul.f32 %v228_v53, %v100_v52  ;;  %v111_v52 = vld [vmem:[%s7983_s0 + $0x318] sm:$0xff] }
  0x83   :  { %584 = vadd.xlane.f32.xlu0 %v583_v4  ;;  %v625_v4 = vsel %vm396_vm0, %v344_v59, 0.0  ;;  %v239_v53 = vld [vmem:[%s7984_s1 + $0x318] sm:$0xff] }
  0x84   :  { %v634_v11 = vsel %vm396_vm0, %v347_v2, 0.0  ;;  %v230_v2 = vld [vmem:[%s7984_s1 + $0x2d0] sm:$0xff]  ;;  %v661_v8 = vsel %vm396_vm0, %v356_v61, 0.0 }
  0x86   :  { %593 = vadd.xlane.f32.xlu1 %v592_v10 }
  0x87   :  { %590 = vadd.xlane.f32.xlu0 %v589_v12  ;;  %v349_v12 = vmul.f32 %v221_v7, %v93_v6  ;;  %v359_v6 = vmul.f32 %v231_v63, %v103_v62  ;;  %v367_v62 = vmul.f32 %v239_v53, %v111_v52 }
  0x89   :  { %v640_v21 = vsel %vm396_vm0, %v349_v12, 0.0  ;;  %v233_v12 = vld [vmem:[%s7984_s1 + $0x2e8] sm:$0xff]  ;;  %v670_v17 = vsel %vm396_vm0, %v359_v6, 0.0 }
  0x8a   :  { %599 = vadd.xlane.f32.xlu1 %v598_v18  ;;  %v94_v18 = vld [vmem:[%s7983_s0 + $0x290] sm:$0xff]  ;;  %v241_v6 = vld [vmem:[%s7984_s1 + $0x328] sm:$0xff] }
  0x8b   :  { %596 = vadd.xlane.f32.xlu0 %v595_v20  ;;  %v350_v25 = vmul.f32 %v222_v19, %v94_v18 }
  0x8e   :  { %605 = vadd.xlane.f32.xlu1 %v604_v26  ;;  %v97_v26 = vld [vmem:[%s7983_s0 + $0x2a8] sm:$0xff] }
  0x8f   :  { %602 = vadd.xlane.f32.xlu0 %v601_v28  ;;  %v4844_v34 = vpop.xlane.xlu1 %404  ;;  %v4847_v37 = vpop.xlane.xlu0 %398  ;;  %v96_v28 = vld [vmem:[%s7983_s0 + $0x2a0] sm:$0xff]  ;;  %v353_v32 = vmul.f32 %v225_v27, %v97_v26  ;;  %v106_v26 = vld [vmem:[%s7983_s0 + $0x2f0] sm:$0xff] }
  0x90   :  { %7990 = vst [vmem:[#allocation5_spill] sm:$0xff] %v4844_v34  ;;  %7991 = vst [vmem:[#allocation6_spill] sm:$0xff] %v4847_v37  ;;  %v352_v36 = vmul.f32 %v224_v29, %v96_v28  ;;  %v234_v27 = vld [vmem:[%s7984_s1 + $0x2f0] sm:$0xff] }
  0x91   :  { %v652_v43 = vsel %vm396_vm0, %v353_v32, 0.0 }
  0x92   :  { %611 = vadd.xlane.f32.xlu1 %v610_v35  ;;  %v643_v35 = vsel %vm396_vm0, %v350_v25, 0.0  ;;  %v235_v25 = vld [vmem:[%s7984_s1 + $0x2f8] sm:$0xff] }
  0x93   :  { %608 = vadd.xlane.f32.xlu0 %v607_v38  ;;  %v4862_v44 = vpop.xlane.xlu1 %407  ;;  %v4865_v47 = vpop.xlane.xlu0 %401  ;;  %v99_v38 = vld [vmem:[%s7983_s0 + $0x2b8] sm:$0xff] }
  0x94   :  { %7992 = vst [vmem:[#allocation7_spill] sm:$0xff] %v4862_v44  ;;  %7993 = vst [vmem:[#allocation8_spill] sm:$0xff] %v4865_v47  ;;  %v4159_v44 = vld [vmem:[%s7983_s0 + $0x3d0] sm:$0xff]  ;;  %v4161_v47 = vld [vmem:[%s7983_s0 + $0x3e0] sm:$0xff] }
  0x96   :  { %617 = vadd.xlane.f32.xlu1 %v616_v45  ;;  %v355_v45 = vmul.f32 %v227_v39, %v99_v38  ;;  %v109_v38 = vld [vmem:[%s7983_s0 + $0x308] sm:$0xff] }
  0x97   :  { %614 = vadd.xlane.f32.xlu0 %v613_v48  ;;  %v4880_v54 = vpop.xlane.xlu1 %413  ;;  %v4883_v57 = vpop.xlane.xlu0 %410  ;;  %v649_v48 = vsel %vm396_vm0, %v352_v36, 0.0  ;;  %v362_v36 = vmul.f32 %v234_v27, %v106_v26  ;;  %v237_v39 = vld [vmem:[%s7984_s1 + $0x308] sm:$0xff] }
  0x98   :  { %7994 = vst [vmem:[#allocation9_spill] sm:$0xff] %v4880_v54  ;;  %7995 = vst [vmem:[#allocation10_spill] sm:$0xff] %v4883_v57  ;;  %v658_v56 = vsel %vm396_vm0, %v355_v45, 0.0  ;;  %v4157_v54 = vld [vmem:[%s7983_s0 + $0x3c0] sm:$0xff] }
  0x9a   :  { %623 = vadd.xlane.f32.xlu1 %v622_v55 }
  0x9b   :  { %620 = vadd.xlane.f32.xlu0 %v619_v58  ;;  %v4898_v0 = vpop.xlane.xlu1 %419  ;;  %v4901_v3 = vpop.xlane.xlu0 %416  ;;  %v357_v58 = vmul.f32 %v229_v51, %v101_v50  ;;  %v679_v50 = vsel %vm396_vm0, %v362_v36, 0.0  ;;  %v364_v51 = vmul.f32 %v236_v41, %v108_v40  ;;  %v116_v40 = vld [vmem:[%s7983_s0 + $0x340] sm:$0xff] }
  0x9c   :  { %7996 = vst [vmem:[#allocation11_spill] sm:$0xff] %v4898_v0  ;;  %7997 = vst [vmem:[#allocation12_spill] sm:$0xff] %v4901_v3  ;;  %v244_v41 = vld [vmem:[%s7984_s1 + $0x340] sm:$0xff]  ;;  %v4155_v0 = vld [vmem:[%s7983_s0 + $0x3b0] sm:$0xff] }
  0x9d   :  { %v664_v5 = vsel %vm396_vm0, %v357_v58, 0.0  ;;  %v238_v58 = vld [vmem:[%s7984_s1 + $0x310] sm:$0xff]  ;;  %v372_v53 = vmul.f32 %v244_v41, %v116_v40 }
  0x9e   :  { %629 = vadd.xlane.f32.xlu1 %v628_v1  ;;  %v102_v1 = vld [vmem:[%s7983_s0 + $0x2d0] sm:$0xff] }
  0x9f   :  { %626 = vadd.xlane.f32.xlu0 %v625_v4  ;;  %v4916_v10 = vpop.xlane.xlu1 %425  ;;  %v4919_v13 = vpop.xlane.xlu0 %422  ;;  %v358_v9 = vmul.f32 %v230_v2, %v102_v1  ;;  %v685_v1 = vsel %vm396_vm0, %v364_v51, 0.0 }
  0xa0   :  { %7998 = vst [vmem:[#allocation13_spill] sm:$0xff] %v4916_v10  ;;  %7999 = vst [vmem:[#allocation14_spill] sm:$0xff] %v4919_v13  ;;  %v4153_v10 = vld [vmem:[%s7983_s0 + $0x3a0] sm:$0xff] }
  0xa2   :  { %635 = vadd.xlane.f32.xlu1 %v634_v11  ;;  %v105_v11 = vld [vmem:[%s7983_s0 + $0x2e8] sm:$0xff] }
  0xa3   :  { %632 = vadd.xlane.f32.xlu0 %v631_v14  ;;  %v4934_v20 = vpop.xlane.xlu1 %431  ;;  %v4937_v23 = vpop.xlane.xlu0 %428  ;;  %v104_v14 = vld [vmem:[%s7983_s0 + $0x2e0] sm:$0xff]  ;;  %v361_v18 = vmul.f32 %v233_v12, %v105_v11  ;;  %v694_v12 = vsel %vm396_vm0, %v367_v62, 0.0  ;;  %v246_v62 = vld [vmem:[%s7984_s1 + $0x350] sm:$0xff] }
  0xa4   :  { %8000 = vst [vmem:[#allocation15_spill] sm:$0xff] %v4934_v20  ;;  %8001 = vst [vmem:[#allocation16_spill] sm:$0xff] %v4937_v23  ;;  %v360_v22 = vmul.f32 %v232_v15, %v104_v14  ;;  %v4151_v20 = vld [vmem:[%s7983_s0 + $0x390] sm:$0xff] }
  0xa5   :  { %v676_v29 = vsel %vm396_vm0, %v361_v18, 0.0 }
  0xa6   :  { %641 = vadd.xlane.f32.xlu1 %v640_v21  ;;  %v667_v21 = vsel %vm396_vm0, %v358_v9, 0.0  ;;  %v240_v9 = vld [vmem:[%s7984_s1 + $0x320] sm:$0xff] }
  0xa7   :  { %638 = vadd.xlane.f32.xlu0 %v637_v24  ;;  %v4952_v30 = vpop.xlane.xlu1 %437  ;;  %v4955_v33 = vpop.xlane.xlu0 %434  ;;  %v107_v24 = vld [vmem:[%s7983_s0 + $0x2f8] sm:$0xff] }
  0xa8   :  { %8002 = vst [vmem:[#allocation17_spill] sm:$0xff] %v4952_v30  ;;  %8003 = vst [vmem:[#allocation18_spill] sm:$0xff] %v4955_v33  ;;  %v4149_v30 = vld [vmem:[%s7983_s0 + $0x380] sm:$0xff] }
  0xaa   :  { %647 = vadd.xlane.f32.xlu1 %v646_v31  ;;  %v363_v31 = vmul.f32 %v235_v25, %v107_v24  ;;  %v114_v24 = vld [vmem:[%s7983_s0 + $0x330] sm:$0xff] }
  0xab   :  { %644 = vadd.xlane.f32.xlu0 %v643_v35  ;;  %v4970_v42 = vpop.xlane.xlu1 %443  ;;  %v4973_v46 = vpop.xlane.xlu0 %440  ;;  %v673_v35 = vsel %vm396_vm0, %v360_v22, 0.0  ;;  %v243_v22 = vld [vmem:[%s7984_s1 + $0x338] sm:$0xff]  ;;  %v242_v25 = vld [vmem:[%s7984_s1 + $0x330] sm:$0xff] }
  0xac   :  { %8004 = vst [vmem:[#allocation19_spill] sm:$0xff] %v4970_v42  ;;  %8005 = vst [vmem:[#allocation20_spill] sm:$0xff] %v4973_v46  ;;  %v682_v45 = vsel %vm396_vm0, %v363_v31, 0.0  ;;  %v370_v36 = vmul.f32 %v242_v25, %v114_v24  ;;  %v4147_v42 = vld [vmem:[%s7983_s0 + $0x370] sm:$0xff] }
  0xae   :  { %653 = vadd.xlane.f32.xlu1 %v652_v43  ;;  %v703_v52 = vsel %vm396_vm0, %v370_v36, 0.0  ;;  %v251_v36 = vld [vmem:[%s7984_s1 + $0x378] sm:$0xff] }
  0xaf   :  { %650 = vadd.xlane.f32.xlu0 %v649_v48  ;;  %v4988_v55 = vpop.xlane.xlu1 %449  ;;  %v4991_v59 = vpop.xlane.xlu0 %446  ;;  %v365_v48 = vmul.f32 %v237_v39, %v109_v38  ;;  %v117_v38 = vld [vmem:[%s7983_s0 + $0x348] sm:$0xff] }
  0xb0   :  { %8006 = vst [vmem:[#allocation21_spill] sm:$0xff] %v4988_v55  ;;  %8007 = vst [vmem:[#allocation22_spill] sm:$0xff] %v4991_v59  ;;  %v245_v39 = vld [vmem:[%s7984_s1 + $0x348] sm:$0xff]  ;;  %v4145_v55 = vld [vmem:[%s7983_s0 + $0x360] sm:$0xff] }
  0xb1   :  { %v688_v61 = vsel %vm396_vm0, %v365_v48, 0.0 }
  0xb2   :  { %659 = vadd.xlane.f32.xlu1 %v658_v56  ;;  %v110_v56 = vld [vmem:[%s7983_s0 + $0x310] sm:$0xff] }
  0xb3   :  { %656 = vadd.xlane.f32.xlu0 %v655_v60  ;;  %v5006_v4 = vpop.xlane.xlu1 %455  ;;  %v5009_v7 = vpop.xlane.xlu0 %452  ;;  %v366_v2 = vmul.f32 %v238_v58, %v110_v56  ;;  %v119_v56 = vld [vmem:[%s7983_s0 + $0x358] sm:$0xff] }
  0xb4   :  { %8008 = vst [vmem:[#allocation23_spill] sm:$0xff] %v5006_v4  ;;  %8009 = vst [vmem:[#allocation24_spill] sm:$0xff] %v5009_v7  ;;  %v247_v58 = vld [vmem:[%s7984_s1 + $0x358] sm:$0xff]  ;;  %v4143_v4 = vld [vmem:[%s7983_s0 + $0x350] sm:$0xff] }
  0xb6   :  { %665 = vadd.xlane.f32.xlu1 %v664_v5  ;;  %v113_v5 = vld [vmem:[%s7983_s0 + $0x328] sm:$0xff] }
  0xb7   :  { %662 = vadd.xlane.f32.xlu0 %v661_v8  ;;  %v5024_v16 = vpop.xlane.xlu1 %461  ;;  %v5027_v19 = vpop.xlane.xlu0 %458  ;;  %v112_v8 = vld [vmem:[%s7983_s0 + $0x320] sm:$0xff]  ;;  %v369_v14 = vmul.f32 %v241_v6, %v113_v5  ;;  %v375_v5 = vmul.f32 %v247_v58, %v119_v56  ;;  %v125_v56 = vld [vmem:[%s7983_s0 + $0x388] sm:$0xff] }
  0xb8   :  { %8010 = vst [vmem:[#allocation25_spill] sm:$0xff] %v5024_v16  ;;  %8011 = vst [vmem:[#allocation26_spill] sm:$0xff] %v5027_v19  ;;  %v368_v18 = vmul.f32 %v240_v9, %v112_v8  ;;  %v709_v8 = vsel %vm396_vm0, %v372_v53, 0.0  ;;  %v253_v58 = vld [vmem:[%s7984_s1 + $0x388] sm:$0xff]  ;;  %v4141_v16 = vld [vmem:[%s7983_s0 + $0x340] sm:$0xff] }
  0xb9   :  { %v700_v27 = vsel %vm396_vm0, %v369_v14, 0.0  ;;  %v249_v14 = vld [vmem:[%s7984_s1 + $0x368] sm:$0xff] }
  0xba   :  { %671 = vadd.xlane.f32.xlu1 %v670_v17  ;;  %v691_v17 = vsel %vm396_vm0, %v366_v2, 0.0 }
  0xbb   :  { %668 = vadd.xlane.f32.xlu0 %v667_v21  ;;  %v5042_v28 = vpop.xlane.xlu1 %467  ;;  %v5045_v32 = vpop.xlane.xlu0 %464  ;;  %v115_v21 = vld [vmem:[%s7983_s0 + $0x338] sm:$0xff] }
  0xbc   :  { %8012 = vst [vmem:[#allocation27_spill] sm:$0xff] %v5042_v28  ;;  %8013 = vst [vmem:[#allocation28_spill] sm:$0xff] %v5045_v32  ;;  %v4139_v28 = vld [vmem:[%s7983_s0 + $0x330] sm:$0xff] }
  0xbe   :  { %677 = vadd.xlane.f32.xlu1 %v676_v29  ;;  %v371_v29 = vmul.f32 %v243_v22, %v115_v21  ;;  %v718_v22 = vsel %vm396_vm0, %v375_v5, 0.0 }
  0xbf   :  { %674 = vadd.xlane.f32.xlu0 %v673_v35  ;;  %v5060_v43 = vpop.xlane.xlu1 %473  ;;  %v5063_v49 = vpop.xlane.xlu0 %470  ;;  %v697_v35 = vsel %vm396_vm0, %v368_v18, 0.0  ;;  %v248_v18 = vld [vmem:[%s7984_s1 + $0x360] sm:$0xff] }
  0xc0   :  { %8014 = vst [vmem:[#allocation29_spill] sm:$0xff] %v5060_v43  ;;  %8015 = vst [vmem:[#allocation30_spill] sm:$0xff] %v5063_v49  ;;  %v706_v48 = vsel %vm396_vm0, %v371_v29, 0.0  ;;  %v4137_v43 = vld [vmem:[%s7983_s0 + $0x320] sm:$0xff] }
  0xc2   :  { %683 = vadd.xlane.f32.xlu1 %v682_v45 }
  0xc3   :  { %680 = vadd.xlane.f32.xlu0 %v679_v50  ;;  %v5078_v60 = vpop.xlane.xlu1 %479  ;;  %v5081_v63 = vpop.xlane.xlu0 %476  ;;  %v373_v50 = vmul.f32 %v245_v39, %v117_v38  ;;  %v122_v38 = vld [vmem:[%s7983_s0 + $0x370] sm:$0xff] }
  0xc4   :  { %8016 = vst [vmem:[#allocation31_spill] sm:$0xff] %v5078_v60  ;;  %8017 = vst [vmem:[#allocation32_spill] sm:$0xff] %v5081_v63  ;;  %v250_v39 = vld [vmem:[%s7984_s1 + $0x370] sm:$0xff] }
  0xc5   :  { %v712_v2 = vsel %vm396_vm0, %v373_v50, 0.0  ;;  %v378_v53 = vmul.f32 %v250_v39, %v122_v38  ;;  %v4135_v60 = vld [vmem:[%s7983_s0 + $0x310] sm:$0xff] }
  0xc6   :  { %689 = vadd.xlane.f32.xlu1 %v688_v61  ;;  %v118_v61 = vld [vmem:[%s7983_s0 + $0x350] sm:$0xff] }
  0xc7   :  { %686 = vadd.xlane.f32.xlu0 %v685_v1  ;;  %v5096_v11 = vpop.xlane.xlu1 %485  ;;  %v5099_v15 = vpop.xlane.xlu0 %482  ;;  %v374_v9 = vmul.f32 %v246_v62, %v118_v61  ;;  %v124_v61 = vld [vmem:[%s7983_s0 + $0x380] sm:$0xff] }
  0xc8   :  { %8018 = vst [vmem:[#allocation33_spill] sm:$0xff] %v5096_v11  ;;  %8019 = vst [vmem:[#allocation34_spill] sm:$0xff] %v5099_v15  ;;  %v252_v62 = vld [vmem:[%s7984_s1 + $0x380] sm:$0xff] }
  0xc9   :  { %v4133_v11 = vld [vmem:[%s7983_s0 + $0x300] sm:$0xff] }
  0xca   :  { %695 = vadd.xlane.f32.xlu1 %v694_v12  ;;  %v121_v12 = vld [vmem:[%s7983_s0 + $0x368] sm:$0xff] }
  0xcb   :  { %692 = vadd.xlane.f32.xlu0 %v691_v17  ;;  %v5114_v26 = vpop.xlane.xlu1 %491  ;;  %v120_v17 = vld [vmem:[%s7983_s0 + $0x360] sm:$0xff]  ;;  %v377_v24 = vmul.f32 %v249_v14, %v121_v12  ;;  %v727_v12 = vsel %vm396_vm0, %v378_v53, 0.0  ;;  %v380_v14 = vmul.f32 %v252_v62, %v124_v61 }
  0xcc   :  { %8020 = vst [vmem:[#allocation35_spill] sm:$0xff] %v5114_v26  ;;  %v5117_v31 = vpop.xlane.xlu0 %488  ;;  %v376_v29 = vmul.f32 %v248_v18, %v120_v17  ;;  %v127_v17 = vld [vmem:[%s7983_s0 + $0x398] sm:$0xff]  ;;  %v256_v53 = vld [vmem:[%s7984_s1 + $0x3a0] sm:$0xff]  ;;  %v4131_v26 = vld [vmem:[%s7983_s0 + $0x2f0] sm:$0xff] }
  0xcd   :  { %8021 = vst [vmem:[#allocation36_spill] sm:$0xff] %v5117_v31  ;;  %v724_v41 = vsel %vm396_vm0, %v377_v24, 0.0  ;;  %v255_v18 = vld [vmem:[%s7984_s1 + $0x398] sm:$0xff]  ;;  %v254_v24 = vld [vmem:[%s7984_s1 + $0x390] sm:$0xff]  ;;  %v733_v38 = vsel %vm396_vm0, %v380_v14, 0.0 }
  0xce   :  { %701 = vadd.xlane.f32.xlu1 %v700_v27  ;;  %v715_v27 = vsel %vm396_vm0, %v374_v9, 0.0  ;;  %v259_v14 = vld [vmem:[%s7984_s1 + $0x3b8] sm:$0xff] }
  0xcf   :  { %698 = vadd.xlane.f32.xlu0 %v697_v35  ;;  %v5132_v45 = vpop.xlane.xlu1 %497  ;;  %v123_v35 = vld [vmem:[%s7983_s0 + $0x378] sm:$0xff] }
  0xd0   :  { %8022 = vst [vmem:[#allocation37_spill] sm:$0xff] %v5132_v45  ;;  %v5135_v51 = vpop.xlane.xlu0 %494  ;;  %v4129_v45 = vld [vmem:[%s7983_s0 + $0x2e0] sm:$0xff] }
  0xd1   :  { %8023 = vst [vmem:[#allocation38_spill] sm:$0xff] %v5135_v51 }
  0xd2   :  { %707 = vadd.xlane.f32.xlu1 %v706_v48  ;;  %v379_v48 = vmul.f32 %v251_v36, %v123_v35  ;;  %v383_v35 = vmul.f32 %v255_v18, %v127_v17  ;;  %v130_v17 = vld [vmem:[%s7983_s0 + $0x3b0] sm:$0xff] }
  0xd3   :  { %704 = vadd.xlane.f32.xlu0 %v703_v52  ;;  %v5150_v1 = vpop.xlane.xlu1 %503  ;;  %v721_v52 = vsel %vm396_vm0, %v376_v29, 0.0  ;;  %v258_v18 = vld [vmem:[%s7984_s1 + $0x3b0] sm:$0xff] }
  0xd4   :  { %8024 = vst [vmem:[#allocation39_spill] sm:$0xff] %v5150_v1  ;;  %v5153_v6 = vpop.xlane.xlu0 %500  ;;  %v730_v5 = vsel %vm396_vm0, %v379_v48, 0.0  ;;  %v257_v48 = vld [vmem:[%s7984_s1 + $0x3a8] sm:$0xff]  ;;  %v4127_v1 = vld [vmem:[%s7983_s0 + $0x2d0] sm:$0xff] }
  0xd5   :  { %8025 = vst [vmem:[#allocation40_spill] sm:$0xff] %v5153_v6 }
  0xd6   :  { %713 = vadd.xlane.f32.xlu1 %v712_v2 }
  0xd7   :  { %710 = vadd.xlane.f32.xlu0 %v709_v8  ;;  %v5168_v21 = vpop.xlane.xlu1 %509  ;;  %v381_v8 = vmul.f32 %v253_v58, %v125_v56  ;;  %v742_v58 = vsel %vm396_vm0, %v383_v35, 0.0 }
  0xd8   :  { %8026 = vst [vmem:[#allocation41_spill] sm:$0xff] %v5168_v21  ;;  %v5171_v25 = vpop.xlane.xlu0 %506  ;;  %v4125_v21 = vld [vmem:[%s7983_s0 + $0x2c0] sm:$0xff] }
  0xd9   :  { %8027 = vst [vmem:[#allocation42_spill] sm:$0xff] %v5171_v25  ;;  %v736_v29 = vsel %vm396_vm0, %v381_v8, 0.0 }
  0xda   :  { %719 = vadd.xlane.f32.xlu1 %v718_v22  ;;  %v126_v22 = vld [vmem:[%s7983_s0 + $0x390] sm:$0xff] }
  0xdb   :  { %716 = vadd.xlane.f32.xlu0 %v715_v27  ;;  %v5186_v40 = vpop.xlane.xlu1 %515  ;;  %v382_v39 = vmul.f32 %v254_v24, %v126_v22 }
  0xdc   :  { %8028 = vst [vmem:[#allocation43_spill] sm:$0xff] %v5186_v40  ;;  %v5189_v50 = vpop.xlane.xlu0 %512  ;;  %v4123_v40 = vld [vmem:[%s7983_s0 + $0x2b0] sm:$0xff] }
  0xdd   :  { %8029 = vst [vmem:[#allocation44_spill] sm:$0xff] %v5189_v50 }
  0xde   :  { %725 = vadd.xlane.f32.xlu1 %v724_v41  ;;  %v129_v41 = vld [vmem:[%s7983_s0 + $0x3a8] sm:$0xff] }
  0xdf   :  { %722 = vadd.xlane.f32.xlu0 %v721_v52  ;;  %v5204_v2 = vpop.xlane.xlu1 %521  ;;  %v128_v52 = vld [vmem:[%s7983_s0 + $0x3a0] sm:$0xff]  ;;  %v385_v61 = vmul.f32 %v257_v48, %v129_v41  ;;  %v133_v41 = vld [vmem:[%s7983_s0 + $0x3c8] sm:$0xff] }
  0xe0   :  { %8030 = vst [vmem:[#allocation45_spill] sm:$0xff] %v5204_v2  ;;  %v5207_v9 = vpop.xlane.xlu0 %518  ;;  %v384_v8 = vmul.f32 %v256_v53, %v128_v52  ;;  %v261_v48 = vld [vmem:[%s7984_s1 + $0x3c8] sm:$0xff]  ;;  %v132_v52 = vld [vmem:[%s7983_s0 + $0x3c0] sm:$0xff] }
  0xe1   :  { %8031 = vst [vmem:[#allocation46_spill] sm:$0xff] %v5207_v9  ;;  %v748_v24 = vsel %vm396_vm0, %v385_v61, 0.0  ;;  %v260_v53 = vld [vmem:[%s7984_s1 + $0x3c0] sm:$0xff] }
  0xe2   :  { %731 = vadd.xlane.f32.xlu1 %v730_v5  ;;  %v739_v5 = vsel %vm396_vm0, %v382_v39, 0.0  ;;  %v386_v39 = vmul.f32 %v258_v18, %v130_v17  ;;  %v135_v17 = vld [vmem:[%s7983_s0 + $0x3d8] sm:$0xff]  ;;  %v4121_v2 = vld [vmem:[%s7983_s0 + $0x2a0] sm:$0xff] }
  0xe3   :  { %728 = vadd.xlane.f32.xlu0 %v727_v12  ;;  %v5222_v27 = vpop.xlane.xlu1 %527  ;;  %v131_v12 = vld [vmem:[%s7983_s0 + $0x3b8] sm:$0xff] }
  0xe4   :  { %8032 = vst [vmem:[#allocation47_spill] sm:$0xff] %v5222_v27  ;;  %v5225_v36 = vpop.xlane.xlu0 %524  ;;  %v263_v18 = vld [vmem:[%s7984_s1 + $0x3d8] sm:$0xff]  ;;  %v4119_v27 = vld [vmem:[%s7983_s0 + $0x290] sm:$0xff] }
  0xe5   :  { %8033 = vst [vmem:[#allocation48_spill] sm:$0xff] %v5225_v36 }
  0xe6   :  { %737 = vadd.xlane.f32.xlu1 %v736_v29  ;;  %v387_v29 = vmul.f32 %v259_v14, %v131_v12  ;;  %v751_v12 = vsel %vm396_vm0, %v386_v39, 0.0  ;;  %v388_v14 = vmul.f32 %v260_v53, %v132_v52 }
  0xe7   :  { %734 = vadd.xlane.f32.xlu0 %v733_v38  ;;  %v5240_v56 = vpop.xlane.xlu1 %533  ;;  %v745_v38 = vsel %vm396_vm0, %v384_v8, 0.0 }
  0xe8   :  { %8034 = vst [vmem:[#allocation49_spill] sm:$0xff] %v5240_v56  ;;  %v5243_v62 = vpop.xlane.xlu0 %530  ;;  %v754_v61 = vsel %vm396_vm0, %v387_v29, 0.0  ;;  %v262_v29 = vld [vmem:[%s7984_s1 + $0x3d0] sm:$0xff]  ;;  %v757_v52 = vsel %vm396_vm0, %v388_v14, 0.0  ;;  %v4117_v56 = vld [vmem:[%s7983_s0 + $0x280] sm:$0xff] }
  0xe9   :  { %8035 = vst [vmem:[#allocation50_spill] sm:$0xff] %v5243_v62 }
  0xea   :  { %743 = vadd.xlane.f32.xlu1 %v742_v58 }
  0xeb   :  { %740 = vadd.xlane.f32.xlu0 %v739_v5  ;;  %v5258_v22 = vpop.xlane.xlu1 %539  ;;  %v389_v5 = vmul.f32 %v261_v48, %v133_v41  ;;  %v391_v41 = vmul.f32 %v263_v18, %v135_v17 }
  0xec   :  { %8036 = vst [vmem:[#allocation51_spill] sm:$0xff] %v5258_v22  ;;  %v5261_v35 = vpop.xlane.xlu0 %536  ;;  %v4115_v22 = vld [vmem:[%s7983_s0 + $0x270] sm:$0xff] }
  0xed   :  { %8037 = vst [vmem:[#allocation52_spill] sm:$0xff] %v5261_v35  ;;  %v760_v39 = vsel %vm396_vm0, %v389_v5, 0.0  ;;  %v264_v5 = vld [vmem:[%s7984_s1 + $0x3e0] sm:$0xff]  ;;  %v766_v14 = vsel %vm396_vm0, %v391_v41, 0.0 }
  0xee   :  { %749 = vadd.xlane.f32.xlu1 %v748_v24  ;;  %v134_v24 = vld [vmem:[%s7983_s0 + $0x3d0] sm:$0xff] }
  0xef   :  { %746 = vadd.xlane.f32.xlu0 %v745_v38  ;;  %v5276_v58 = vpop.xlane.xlu1 %545  ;;  %v390_v53 = vmul.f32 %v262_v29, %v134_v24 }
  0xf0   :  { %8038 = vst [vmem:[#allocation53_spill] sm:$0xff] %v5276_v58  ;;  %v5279_v8 = vpop.xlane.xlu0 %542  ;;  %v265_v58 = vld [vmem:[%s7984_s1 + $0x3e8] sm:$0xff] }
  0xf1   :  { %8039 = vst [vmem:[#allocation54_spill] sm:$0xff] %v5279_v8  ;;  %v137_v8 = vld [vmem:[%s7983_s0 + $0x3e8] sm:$0xff]  ;;  %v763_v24 = vsel %vm396_vm0, %v390_v53, 0.0 }
  0xf2   :  { %755 = vadd.xlane.f32.xlu1 %v754_v61  ;;  %v136_v61 = vld [vmem:[%s7983_s0 + $0x3e0] sm:$0xff]  ;;  %v393_v17 = vmul.f32 %v265_v58, %v137_v8  ;;  %v266_v58 = vld [vmem:[%s7984_s1 + $0x3f0] sm:$0xff] }
  0xf3   :  { %752 = vadd.xlane.f32.xlu0 %v751_v12  ;;  %v5294_v38 = vpop.xlane.xlu1 %551  ;;  %v392_v29 = vmul.f32 %v264_v5, %v136_v61 }
  0xf4   :  { %8040 = vst [vmem:[#allocation55_spill] sm:$0xff] %v5294_v38  ;;  %v5297_v48 = vpop.xlane.xlu0 %548  ;;  %v267_v38 = vld [vmem:[%s7984_s1 + $0x3f8] sm:$0xff]  ;;  %v772_v41 = vsel %vm396_vm0, %v393_v17, 0.0 }
  0xf5   :  { %8041 = vst [vmem:[#allocation56_spill] sm:$0xff] %v5297_v48  ;;  %v139_v48 = vld [vmem:[%s7983_s0 + $0x3f8] sm:$0xff]  ;;  %v769_v61 = vsel %vm396_vm0, %v392_v29, 0.0 }
  0xf6   :  { %761 = vadd.xlane.f32.xlu1 %v760_v39  ;;  %v138_v39 = vld [vmem:[%s7983_s0 + $0x3f0] sm:$0xff] }
  0xf7   :  { %758 = vadd.xlane.f32.xlu0 %v757_v52  ;;  %v5312_v12 = vpop.xlane.xlu1 %557  ;;  %v395_v52 = vmul.f32 %v267_v38, %v139_v48  ;;  %v394_v5 = vmul.f32 %v266_v58, %v138_v39  ;;  %v4037_v48 = vld [vmem:[%s7983_s0] sm:$0xff]  ;;  %v4038_v58 = vld [vmem:[%s7983_s0 + $0x18] sm:$0xff] }
  0xf8   :  { %8042 = vst [vmem:[#allocation57_spill] sm:$0xff] %v5312_v12  ;;  %v5315_v18 = vpop.xlane.xlu0 %554  ;;  %v781_v17 = vmul.f32 %v4037_v48, %v4037_v48 }
  0xf9   :  { %8043 = vst [vmem:[#allocation58_spill] sm:$0xff] %v5315_v18  ;;  %v778_v12 = vsel %vm396_vm0, %v395_v52, 0.0  ;;  %v775_v38 = vsel %vm396_vm0, %v394_v5, 0.0  ;;  %v4039_v5 = vld [vmem:[%s7983_s0 + $0x10] sm:$0xff] }
  0xfa   :  { %767 = vadd.xlane.f32.xlu1 %v766_v14  ;;  %v4036_v14 = vld [vmem:[%s7983_s0 + $0x8] sm:$0xff] }
  0xfb   :  { %764 = vadd.xlane.f32.xlu0 %v763_v24  ;;  %v5330_v8 = vpop.xlane.xlu1 %563  ;;  %v782_v24 = vmul.f32 %v4036_v14, %v4036_v14  ;;  %v783_v14 = vmul.f32 %v4039_v5, %v4039_v5 }
  0xfc   :  { %8044 = vst [vmem:[#allocation59_spill] sm:$0xff] %v5330_v8  ;;  %v5333_v53 = vpop.xlane.xlu0 %560 }
  0xfd   :  { %8045 = vst [vmem:[#allocation60_spill] sm:$0xff] %v5333_v53  ;;  %v912_v39 = vsel %vm396_vm0, %v782_v24, 0.0  ;;  %v4113_v53 = vld [vmem:[%s7983_s0 + $0x260] sm:$0xff] }
  0xfe   :  { %773 = vadd.xlane.f32.xlu1 %v772_v41  ;;  %v784_v41 = vmul.f32 %v4038_v58, %v4038_v58 }
  0xff   :  { %770 = vadd.xlane.f32.xlu0 %v769_v61  ;;  %v5336_v18 = vpop.xlane.xlu1 %569  ;;  %v909_v61 = vsel %vm396_vm0, %v781_v17, 0.0  ;;  %v915_v17 = vsel %vm396_vm0, %v783_v14, 0.0 }
 0x100   :  { %8046 = vst [vmem:[#allocation61_spill] sm:$0xff] %v5336_v18  ;;  %v5342_v8 = vpop.xlane.xlu0 %566  ;;  %v918_v24 = vsel %vm396_vm0, %v784_v41, 0.0 }
 0x101   :  { %8047 = vst [vmem:[#allocation62_spill] sm:$0xff] %v5342_v8  ;;  %v4111_v8 = vld [vmem:[%s7983_s0 + $0x250] sm:$0xff] }
 0x102   :  { %779 = vadd.xlane.f32.xlu1 %v778_v12 }
 0x103   :  { %776 = vadd.xlane.f32.xlu0 %v775_v38  ;;  %v5348_v29 = vpop.xlane.xlu1 %575  ;;  %v4040_v38 = vld [vmem:[%s7983_s0 + $0x28] sm:$0xff] }
 0x104   :  { %8048 = vst [vmem:[#allocation63_spill] sm:$0xff] %v5348_v29  ;;  %v5354_v52 = vpop.xlane.xlu0 %572  ;;  %v786_v48 = vmul.f32 %v4040_v38, %v4040_v38 }
 0x105   :  { %8049 = vst [vmem:[#allocation64_spill] sm:$0xff] %v5354_v52  ;;  %v4041_v52 = vld [vmem:[%s7983_s0 + $0x20] sm:$0xff] }
 0x106   :  { %913 = vadd.xlane.f32.xlu1 %v912_v39  ;;  %v785_v5 = vmul.f32 %v4041_v52, %v4041_v52  ;;  %v924_v41 = vsel %vm396_vm0, %v786_v48, 0.0 }
 0x107   :  { %910 = vadd.xlane.f32.xlu0 %v909_v61  ;;  %v5360_v12 = vpop.xlane.xlu1 %581  ;;  %v4042_v61 = vld [vmem:[%s7983_s0 + $0x38] sm:$0xff] }
 0x108   :  { %8050 = vst [vmem:[#allocation65_spill] sm:$0xff] %v5360_v12  ;;  %v5366_v58 = vpop.xlane.xlu0 %578  ;;  %v788_v38 = vmul.f32 %v4042_v61, %v4042_v61  ;;  %v921_v14 = vsel %vm396_vm0, %v785_v5, 0.0 }
 0x109   :  { %8051 = vst [vmem:[#allocation66_spill] sm:$0xff] %v5366_v58  ;;  %v4043_v58 = vld [vmem:[%s7983_s0 + $0x30] sm:$0xff] }
 0x10a   :  { %919 = vadd.xlane.f32.xlu1 %v918_v24  ;;  %v787_v52 = vmul.f32 %v4043_v58, %v4043_v58  ;;  %v930_v48 = vsel %vm396_vm0, %v788_v38, 0.0 }
 0x10b   :  { %916 = vadd.xlane.f32.xlu0 %v915_v17  ;;  %v5372_v39 = vpop.xlane.xlu1 %587  ;;  %v4044_v17 = vld [vmem:[%s7983_s0 + $0x48] sm:$0xff] }
 0x10c   :  { %8052 = vst [vmem:[#allocation67_spill] sm:$0xff] %v5372_v39  ;;  %v5378_v12 = vpop.xlane.xlu0 %584  ;;  %v790_v61 = vmul.f32 %v4044_v17, %v4044_v17  ;;  %v927_v5 = vsel %vm396_vm0, %v787_v52, 0.0 }
 0x10d   :  { %8053 = vst [vmem:[#allocation68_spill] sm:$0xff] %v5378_v12  ;;  %v4045_v12 = vld [vmem:[%s7983_s0 + $0x40] sm:$0xff] }
 0x10e   :  { %925 = vadd.xlane.f32.xlu1 %v924_v41  ;;  %v789_v58 = vmul.f32 %v4045_v12, %v4045_v12  ;;  %v936_v38 = vsel %vm396_vm0, %v790_v61, 0.0 }
 0x10f   :  { %922 = vadd.xlane.f32.xlu0 %v921_v14  ;;  %v5384_v24 = vpop.xlane.xlu1 %593  ;;  %v4046_v14 = vld [vmem:[%s7983_s0 + $0x58] sm:$0xff] }
 0x110   :  { %8054 = vst [vmem:[#allocation69_spill] sm:$0xff] %v5384_v24  ;;  %v5390_v39 = vpop.xlane.xlu0 %590  ;;  %v792_v17 = vmul.f32 %v4046_v14, %v4046_v14  ;;  %v933_v52 = vsel %vm396_vm0, %v789_v58, 0.0 }
 0x111   :  { %8055 = vst [vmem:[#allocation70_spill] sm:$0xff] %v5390_v39  ;;  %v4047_v39 = vld [vmem:[%s7983_s0 + $0x50] sm:$0xff] }
 0x112   :  { %931 = vadd.xlane.f32.xlu1 %v930_v48  ;;  %v791_v12 = vmul.f32 %v4047_v39, %v4047_v39  ;;  %v942_v61 = vsel %vm396_vm0, %v792_v17, 0.0 }
 0x113   :  { %928 = vadd.xlane.f32.xlu0 %v927_v5  ;;  %v5396_v41 = vpop.xlane.xlu1 %599  ;;  %v4048_v5 = vld [vmem:[%s7983_s0 + $0x68] sm:$0xff] }
 0x114   :  { %8056 = vst [vmem:[#allocation71_spill] sm:$0xff] %v5396_v41  ;;  %v5402_v24 = vpop.xlane.xlu0 %596  ;;  %v794_v14 = vmul.f32 %v4048_v5, %v4048_v5  ;;  %v939_v58 = vsel %vm396_vm0, %v791_v12, 0.0 }
 0x115   :  { %8057 = vst [vmem:[#allocation72_spill] sm:$0xff] %v5402_v24  ;;  %v4049_v24 = vld [vmem:[%s7983_s0 + $0x60] sm:$0xff] }
 0x116   :  { %937 = vadd.xlane.f32.xlu1 %v936_v38  ;;  %v793_v39 = vmul.f32 %v4049_v24, %v4049_v24  ;;  %v948_v17 = vsel %vm396_vm0, %v794_v14, 0.0 }
 0x117   :  { %934 = vadd.xlane.f32.xlu0 %v933_v52  ;;  %v5408_v48 = vpop.xlane.xlu1 %605  ;;  %v4050_v52 = vld [vmem:[%s7983_s0 + $0x78] sm:$0xff] }
 0x118   :  { %8058 = vst [vmem:[#allocation73_spill] sm:$0xff] %v5408_v48  ;;  %v5414_v41 = vpop.xlane.xlu0 %602  ;;  %v796_v5 = vmul.f32 %v4050_v52, %v4050_v52  ;;  %v945_v12 = vsel %vm396_vm0, %v793_v39, 0.0 }
 0x119   :  { %8059 = vst [vmem:[#allocation74_spill] sm:$0xff] %v5414_v41  ;;  %v4051_v41 = vld [vmem:[%s7983_s0 + $0x70] sm:$0xff] }
 0x11a   :  { %943 = vadd.xlane.f32.xlu1 %v942_v61  ;;  %v795_v24 = vmul.f32 %v4051_v41, %v4051_v41  ;;  %v954_v14 = vsel %vm396_vm0, %v796_v5, 0.0 }
 0x11b   :  { %940 = vadd.xlane.f32.xlu0 %v939_v58  ;;  %v5420_v38 = vpop.xlane.xlu1 %611  ;;  %v4052_v58 = vld [vmem:[%s7983_s0 + $0x88] sm:$0xff] }
 0x11c   :  { %8060 = vst [vmem:[#allocation75_spill] sm:$0xff] %v5420_v38  ;;  %v5426_v48 = vpop.xlane.xlu0 %608  ;;  %v798_v52 = vmul.f32 %v4052_v58, %v4052_v58  ;;  %v951_v39 = vsel %vm396_vm0, %v795_v24, 0.0 }
 0x11d   :  { %8061 = vst [vmem:[#allocation76_spill] sm:$0xff] %v5426_v48  ;;  %v4053_v48 = vld [vmem:[%s7983_s0 + $0x80] sm:$0xff] }
 0x11e   :  { %949 = vadd.xlane.f32.xlu1 %v948_v17  ;;  %v797_v41 = vmul.f32 %v4053_v48, %v4053_v48  ;;  %v960_v5 = vsel %vm396_vm0, %v798_v52, 0.0 }
 0x11f   :  { %946 = vadd.xlane.f32.xlu0 %v945_v12  ;;  %v5432_v61 = vpop.xlane.xlu1 %617  ;;  %v4054_v12 = vld [vmem:[%s7983_s0 + $0x98] sm:$0xff] }
 0x120   :  { %8062 = vst [vmem:[#allocation77_spill] sm:$0xff] %v5432_v61  ;;  %v5438_v38 = vpop.xlane.xlu0 %614  ;;  %v800_v58 = vmul.f32 %v4054_v12, %v4054_v12  ;;  %v957_v24 = vsel %vm396_vm0, %v797_v41, 0.0 }
 0x121   :  { %8063 = vst [vmem:[#allocation78_spill] sm:$0xff] %v5438_v38  ;;  %v4055_v38 = vld [vmem:[%s7983_s0 + $0x90] sm:$0xff] }
 0x122   :  { %955 = vadd.xlane.f32.xlu1 %v954_v14  ;;  %v799_v48 = vmul.f32 %v4055_v38, %v4055_v38  ;;  %v966_v52 = vsel %vm396_vm0, %v800_v58, 0.0 }
 0x123   :  { %952 = vadd.xlane.f32.xlu0 %v951_v39  ;;  %v5444_v17 = vpop.xlane.xlu1 %623  ;;  %v4056_v39 = vld [vmem:[%s7983_s0 + $0xa8] sm:$0xff] }
 0x124   :  { %8064 = vst [vmem:[#allocation79_spill] sm:$0xff] %v5444_v17  ;;  %v5450_v61 = vpop.xlane.xlu0 %620  ;;  %v802_v12 = vmul.f32 %v4056_v39, %v4056_v39  ;;  %v963_v41 = vsel %vm396_vm0, %v799_v48, 0.0 }
 0x125   :  { %8065 = vst [vmem:[#allocation80_spill] sm:$0xff] %v5450_v61  ;;  %v4057_v61 = vld [vmem:[%s7983_s0 + $0xa0] sm:$0xff] }
 0x126   :  { %961 = vadd.xlane.f32.xlu1 %v960_v5  ;;  %v801_v38 = vmul.f32 %v4057_v61, %v4057_v61  ;;  %v972_v58 = vsel %vm396_vm0, %v802_v12, 0.0 }
 0x127   :  { %958 = vadd.xlane.f32.xlu0 %v957_v24  ;;  %v5456_v14 = vpop.xlane.xlu1 %629  ;;  %v4058_v24 = vld [vmem:[%s7983_s0 + $0xb8] sm:$0xff] }
 0x128   :  { %8066 = vst [vmem:[#allocation81_spill] sm:$0xff] %v5456_v14  ;;  %v5462_v17 = vpop.xlane.xlu0 %626  ;;  %v804_v39 = vmul.f32 %v4058_v24, %v4058_v24  ;;  %v969_v48 = vsel %vm396_vm0, %v801_v38, 0.0 }
 0x129   :  { %8067 = vst [vmem:[#allocation82_spill] sm:$0xff] %v5462_v17  ;;  %v4059_v17 = vld [vmem:[%s7983_s0 + $0xb0] sm:$0xff] }
 0x12a   :  { %967 = vadd.xlane.f32.xlu1 %v966_v52  ;;  %v803_v61 = vmul.f32 %v4059_v17, %v4059_v17  ;;  %v978_v12 = vsel %vm396_vm0, %v804_v39, 0.0 }
 0x12b   :  { %964 = vadd.xlane.f32.xlu0 %v963_v41  ;;  %v5468_v5 = vpop.xlane.xlu1 %635  ;;  %v4060_v41 = vld [vmem:[%s7983_s0 + $0xc8] sm:$0xff] }
 0x12c   :  { %8068 = vst [vmem:[#allocation83_spill] sm:$0xff] %v5468_v5  ;;  %v5474_v14 = vpop.xlane.xlu0 %632  ;;  %v806_v24 = vmul.f32 %v4060_v41, %v4060_v41  ;;  %v975_v38 = vsel %vm396_vm0, %v803_v61, 0.0 }
 0x12d   :  { %8069 = vst [vmem:[#allocation84_spill] sm:$0xff] %v5474_v14  ;;  %v4061_v14 = vld [vmem:[%s7983_s0 + $0xc0] sm:$0xff] }
 0x12e   :  { %973 = vadd.xlane.f32.xlu1 %v972_v58  ;;  %v805_v17 = vmul.f32 %v4061_v14, %v4061_v14  ;;  %v984_v39 = vsel %vm396_vm0, %v806_v24, 0.0 }
 0x12f   :  { %970 = vadd.xlane.f32.xlu0 %v969_v48  ;;  %v5480_v52 = vpop.xlane.xlu1 %641  ;;  %v4062_v48 = vld [vmem:[%s7983_s0 + $0xd8] sm:$0xff] }
 0x130   :  { %8070 = vst [vmem:[#allocation85_spill] sm:$0xff] %v5480_v52  ;;  %v5486_v5 = vpop.xlane.xlu0 %638  ;;  %v808_v41 = vmul.f32 %v4062_v48, %v4062_v48  ;;  %v981_v61 = vsel %vm396_vm0, %v805_v17, 0.0 }
 0x131   :  { %8071 = vst [vmem:[#allocation86_spill] sm:$0xff] %v5486_v5  ;;  %v4063_v5 = vld [vmem:[%s7983_s0 + $0xd0] sm:$0xff] }
 0x132   :  { %979 = vadd.xlane.f32.xlu1 %v978_v12  ;;  %v807_v14 = vmul.f32 %v4063_v5, %v4063_v5  ;;  %v990_v24 = vsel %vm396_vm0, %v808_v41, 0.0 }
 0x133   :  { %976 = vadd.xlane.f32.xlu0 %v975_v38  ;;  %v5492_v58 = vpop.xlane.xlu1 %647  ;;  %v4064_v38 = vld [vmem:[%s7983_s0 + $0xe8] sm:$0xff] }
 0x134   :  { %8072 = vst [vmem:[#allocation87_spill] sm:$0xff] %v5492_v58  ;;  %v5498_v52 = vpop.xlane.xlu0 %644  ;;  %v810_v48 = vmul.f32 %v4064_v38, %v4064_v38  ;;  %v987_v17 = vsel %vm396_vm0, %v807_v14, 0.0 }
 0x135   :  { %8073 = vst [vmem:[#allocation88_spill] sm:$0xff] %v5498_v52  ;;  %v4065_v52 = vld [vmem:[%s7983_s0 + $0xe0] sm:$0xff] }
 0x136   :  { %985 = vadd.xlane.f32.xlu1 %v984_v39  ;;  %v809_v5 = vmul.f32 %v4065_v52, %v4065_v52  ;;  %v996_v41 = vsel %vm396_vm0, %v810_v48, 0.0 }
 0x137   :  { %982 = vadd.xlane.f32.xlu0 %v981_v61  ;;  %v5504_v12 = vpop.xlane.xlu1 %653  ;;  %v4066_v61 = vld [vmem:[%s7983_s0 + $0xf8] sm:$0xff] }
 0x138   :  { %8074 = vst [vmem:[#allocation89_spill] sm:$0xff] %v5504_v12  ;;  %v5510_v58 = vpop.xlane.xlu0 %650  ;;  %v812_v38 = vmul.f32 %v4066_v61, %v4066_v61  ;;  %v993_v14 = vsel %vm396_vm0, %v809_v5, 0.0 }
 0x139   :  { %8075 = vst [vmem:[#allocation90_spill] sm:$0xff] %v5510_v58  ;;  %v4067_v58 = vld [vmem:[%s7983_s0 + $0xf0] sm:$0xff] }
 0x13a   :  { %991 = vadd.xlane.f32.xlu1 %v990_v24  ;;  %v811_v52 = vmul.f32 %v4067_v58, %v4067_v58  ;;  %v1002_v48 = vsel %vm396_vm0, %v812_v38, 0.0 }
 0x13b   :  { %988 = vadd.xlane.f32.xlu0 %v987_v17  ;;  %v5516_v39 = vpop.xlane.xlu1 %659  ;;  %v4068_v17 = vld [vmem:[%s7983_s0 + $0x108] sm:$0xff] }
 0x13c   :  { %8076 = vst [vmem:[#allocation91_spill] sm:$0xff] %v5516_v39  ;;  %v5522_v12 = vpop.xlane.xlu0 %656  ;;  %v814_v61 = vmul.f32 %v4068_v17, %v4068_v17  ;;  %v999_v5 = vsel %vm396_vm0, %v811_v52, 0.0 }
 0x13d   :  { %8077 = vst [vmem:[#allocation92_spill] sm:$0xff] %v5522_v12  ;;  %v4069_v12 = vld [vmem:[%s7983_s0 + $0x100] sm:$0xff] }
 0x13e   :  { %997 = vadd.xlane.f32.xlu1 %v996_v41  ;;  %v813_v58 = vmul.f32 %v4069_v12, %v4069_v12  ;;  %v1008_v38 = vsel %vm396_vm0, %v814_v61, 0.0 }
 0x13f   :  { %994 = vadd.xlane.f32.xlu0 %v993_v14  ;;  %v5528_v24 = vpop.xlane.xlu1 %665  ;;  %v4070_v14 = vld [vmem:[%s7983_s0 + $0x118] sm:$0xff] }
 0x140   :  { %8078 = vst [vmem:[#allocation93_spill] sm:$0xff] %v5528_v24  ;;  %v5534_v39 = vpop.xlane.xlu0 %662  ;;  %v816_v17 = vmul.f32 %v4070_v14, %v4070_v14  ;;  %v1005_v52 = vsel %vm396_vm0, %v813_v58, 0.0 }
 0x141   :  { %8079 = vst [vmem:[#allocation94_spill] sm:$0xff] %v5534_v39  ;;  %v4071_v39 = vld [vmem:[%s7983_s0 + $0x110] sm:$0xff] }
 0x142   :  { %1003 = vadd.xlane.f32.xlu1 %v1002_v48  ;;  %v815_v12 = vmul.f32 %v4071_v39, %v4071_v39  ;;  %v1014_v61 = vsel %vm396_vm0, %v816_v17, 0.0 }
 0x143   :  { %1000 = vadd.xlane.f32.xlu0 %v999_v5  ;;  %v5540_v41 = vpop.xlane.xlu1 %671  ;;  %v4072_v5 = vld [vmem:[%s7983_s0 + $0x128] sm:$0xff] }
 0x144   :  { %8080 = vst [vmem:[#allocation95_spill] sm:$0xff] %v5540_v41  ;;  %v5546_v24 = vpop.xlane.xlu0 %668  ;;  %v818_v14 = vmul.f32 %v4072_v5, %v4072_v5  ;;  %v1011_v58 = vsel %vm396_vm0, %v815_v12, 0.0 }
 0x145   :  { %8081 = vst [vmem:[#allocation96_spill] sm:$0xff] %v5546_v24  ;;  %v4073_v24 = vld [vmem:[%s7983_s0 + $0x120] sm:$0xff] }
 0x146   :  { %1009 = vadd.xlane.f32.xlu1 %v1008_v38  ;;  %v817_v39 = vmul.f32 %v4073_v24, %v4073_v24  ;;  %v1020_v17 = vsel %vm396_vm0, %v818_v14, 0.0 }
 0x147   :  { %1006 = vadd.xlane.f32.xlu0 %v1005_v52  ;;  %v5552_v48 = vpop.xlane.xlu1 %677  ;;  %v4074_v52 = vld [vmem:[%s7983_s0 + $0x138] sm:$0xff] }
 0x148   :  { %8082 = vst [vmem:[#allocation97_spill] sm:$0xff] %v5552_v48  ;;  %v5558_v41 = vpop.xlane.xlu0 %674  ;;  %v820_v5 = vmul.f32 %v4074_v52, %v4074_v52  ;;  %v1017_v12 = vsel %vm396_vm0, %v817_v39, 0.0 }
 0x149   :  { %8083 = vst [vmem:[#allocation98_spill] sm:$0xff] %v5558_v41  ;;  %v4075_v41 = vld [vmem:[%s7983_s0 + $0x130] sm:$0xff] }
 0x14a   :  { %1015 = vadd.xlane.f32.xlu1 %v1014_v61  ;;  %v819_v24 = vmul.f32 %v4075_v41, %v4075_v41  ;;  %v1026_v14 = vsel %vm396_vm0, %v820_v5, 0.0 }
 0x14b   :  { %1012 = vadd.xlane.f32.xlu0 %v1011_v58  ;;  %v5564_v38 = vpop.xlane.xlu1 %683  ;;  %v4076_v58 = vld [vmem:[%s7983_s0 + $0x148] sm:$0xff] }
 0x14c   :  { %8084 = vst [vmem:[#allocation99_spill] sm:$0xff] %v5564_v38  ;;  %v5570_v48 = vpop.xlane.xlu0 %680  ;;  %v822_v52 = vmul.f32 %v4076_v58, %v4076_v58  ;;  %v1023_v39 = vsel %vm396_vm0, %v819_v24, 0.0 }
 0x14d   :  { %8085 = vst [vmem:[#allocation100_spill] sm:$0xff] %v5570_v48  ;;  %v4077_v48 = vld [vmem:[%s7983_s0 + $0x140] sm:$0xff] }
 0x14e   :  { %1021 = vadd.xlane.f32.xlu1 %v1020_v17  ;;  %v821_v41 = vmul.f32 %v4077_v48, %v4077_v48  ;;  %v1032_v5 = vsel %vm396_vm0, %v822_v52, 0.0 }
 0x14f   :  { %1018 = vadd.xlane.f32.xlu0 %v1017_v12  ;;  %v5576_v61 = vpop.xlane.xlu1 %689  ;;  %v4078_v12 = vld [vmem:[%s7983_s0 + $0x158] sm:$0xff] }
 0x150   :  { %8086 = vst [vmem:[#allocation101_spill] sm:$0xff] %v5576_v61  ;;  %v5582_v38 = vpop.xlane.xlu0 %686  ;;  %v824_v58 = vmul.f32 %v4078_v12, %v4078_v12  ;;  %v1029_v24 = vsel %vm396_vm0, %v821_v41, 0.0 }
 0x151   :  { %8087 = vst [vmem:[#allocation102_spill] sm:$0xff] %v5582_v38  ;;  %v4079_v38 = vld [vmem:[%s7983_s0 + $0x150] sm:$0xff] }
 0x152   :  { %1027 = vadd.xlane.f32.xlu1 %v1026_v14  ;;  %v823_v48 = vmul.f32 %v4079_v38, %v4079_v38  ;;  %v1038_v52 = vsel %vm396_vm0, %v824_v58, 0.0 }
 0x153   :  { %1024 = vadd.xlane.f32.xlu0 %v1023_v39  ;;  %v5588_v17 = vpop.xlane.xlu1 %695  ;;  %v4080_v39 = vld [vmem:[%s7983_s0 + $0x168] sm:$0xff] }
 0x154   :  { %8088 = vst [vmem:[#allocation103_spill] sm:$0xff] %v5588_v17  ;;  %v5594_v61 = vpop.xlane.xlu0 %692  ;;  %v826_v12 = vmul.f32 %v4080_v39, %v4080_v39  ;;  %v1035_v41 = vsel %vm396_vm0, %v823_v48, 0.0 }
 0x155   :  { %8089 = vst [vmem:[#allocation104_spill] sm:$0xff] %v5594_v61  ;;  %v4081_v61 = vld [vmem:[%s7983_s0 + $0x160] sm:$0xff] }
 0x156   :  { %1033 = vadd.xlane.f32.xlu1 %v1032_v5  ;;  %v825_v38 = vmul.f32 %v4081_v61, %v4081_v61  ;;  %v1044_v58 = vsel %vm396_vm0, %v826_v12, 0.0 }
 0x157   :  { %1030 = vadd.xlane.f32.xlu0 %v1029_v24  ;;  %v5600_v14 = vpop.xlane.xlu1 %701  ;;  %v4082_v24 = vld [vmem:[%s7983_s0 + $0x178] sm:$0xff] }
 0x158   :  { %8090 = vst [vmem:[#allocation105_spill] sm:$0xff] %v5600_v14  ;;  %v5606_v17 = vpop.xlane.xlu0 %698  ;;  %v828_v39 = vmul.f32 %v4082_v24, %v4082_v24  ;;  %v1041_v48 = vsel %vm396_vm0, %v825_v38, 0.0 }
 0x159   :  { %8091 = vst [vmem:[#allocation106_spill] sm:$0xff] %v5606_v17  ;;  %v4083_v17 = vld [vmem:[%s7983_s0 + $0x170] sm:$0xff] }
 0x15a   :  { %1039 = vadd.xlane.f32.xlu1 %v1038_v52  ;;  %v827_v61 = vmul.f32 %v4083_v17, %v4083_v17  ;;  %v1050_v12 = vsel %vm396_vm0, %v828_v39, 0.0 }
 0x15b   :  { %1036 = vadd.xlane.f32.xlu0 %v1035_v41  ;;  %v5612_v5 = vpop.xlane.xlu1 %707  ;;  %v4084_v41 = vld [vmem:[%s7983_s0 + $0x188] sm:$0xff] }
 0x15c   :  { %8092 = vst [vmem:[#allocation107_spill] sm:$0xff] %v5612_v5  ;;  %v5618_v14 = vpop.xlane.xlu0 %704  ;;  %v830_v24 = vmul.f32 %v4084_v41, %v4084_v41  ;;  %v1047_v38 = vsel %vm396_vm0, %v827_v61, 0.0 }
 0x15d   :  { %8093 = vst [vmem:[#allocation108_spill] sm:$0xff] %v5618_v14  ;;  %v4085_v14 = vld [vmem:[%s7983_s0 + $0x180] sm:$0xff] }
 0x15e   :  { %1045 = vadd.xlane.f32.xlu1 %v1044_v58  ;;  %v829_v17 = vmul.f32 %v4085_v14, %v4085_v14  ;;  %v1056_v39 = vsel %vm396_vm0, %v830_v24, 0.0 }
 0x15f   :  { %1042 = vadd.xlane.f32.xlu0 %v1041_v48  ;;  %v5624_v52 = vpop.xlane.xlu1 %713  ;;  %v4086_v48 = vld [vmem:[%s7983_s0 + $0x198] sm:$0xff] }
 0x160   :  { %8094 = vst [vmem:[#allocation109_spill] sm:$0xff] %v5624_v52  ;;  %v5630_v5 = vpop.xlane.xlu0 %710  ;;  %v832_v41 = vmul.f32 %v4086_v48, %v4086_v48  ;;  %v1053_v61 = vsel %vm396_vm0, %v829_v17, 0.0 }
 0x161   :  { %8095 = vst [vmem:[#allocation110_spill] sm:$0xff] %v5630_v5  ;;  %v4087_v5 = vld [vmem:[%s7983_s0 + $0x190] sm:$0xff] }
 0x162   :  { %1051 = vadd.xlane.f32.xlu1 %v1050_v12  ;;  %v831_v14 = vmul.f32 %v4087_v5, %v4087_v5  ;;  %v1062_v24 = vsel %vm396_vm0, %v832_v41, 0.0 }
 0x163   :  { %1048 = vadd.xlane.f32.xlu0 %v1047_v38  ;;  %v5636_v58 = vpop.xlane.xlu1 %719  ;;  %v4088_v38 = vld [vmem:[%s7983_s0 + $0x1a8] sm:$0xff] }
 0x164   :  { %8096 = vst [vmem:[#allocation111_spill] sm:$0xff] %v5636_v58  ;;  %v5642_v52 = vpop.xlane.xlu0 %716  ;;  %v834_v48 = vmul.f32 %v4088_v38, %v4088_v38  ;;  %v1059_v17 = vsel %vm396_vm0, %v831_v14, 0.0 }
 0x165   :  { %8097 = vst [vmem:[#allocation112_spill] sm:$0xff] %v5642_v52  ;;  %v4089_v52 = vld [vmem:[%s7983_s0 + $0x1a0] sm:$0xff] }
 0x166   :  { %1057 = vadd.xlane.f32.xlu1 %v1056_v39  ;;  %v833_v5 = vmul.f32 %v4089_v52, %v4089_v52  ;;  %v1068_v41 = vsel %vm396_vm0, %v834_v48, 0.0 }
 0x167   :  { %1054 = vadd.xlane.f32.xlu0 %v1053_v61  ;;  %v5648_v12 = vpop.xlane.xlu1 %725  ;;  %v4090_v61 = vld [vmem:[%s7983_s0 + $0x1b8] sm:$0xff] }
 0x168   :  { %8098 = vst [vmem:[#allocation113_spill] sm:$0xff] %v5648_v12  ;;  %v5654_v58 = vpop.xlane.xlu0 %722  ;;  %v836_v38 = vmul.f32 %v4090_v61, %v4090_v61  ;;  %v1065_v14 = vsel %vm396_vm0, %v833_v5, 0.0 }
 0x169   :  { %8099 = vst [vmem:[#allocation114_spill] sm:$0xff] %v5654_v58  ;;  %v4091_v58 = vld [vmem:[%s7983_s0 + $0x1b0] sm:$0xff] }
 0x16a   :  { %1063 = vadd.xlane.f32.xlu1 %v1062_v24  ;;  %v835_v52 = vmul.f32 %v4091_v58, %v4091_v58  ;;  %v1074_v48 = vsel %vm396_vm0, %v836_v38, 0.0 }
 0x16b   :  { %1060 = vadd.xlane.f32.xlu0 %v1059_v17  ;;  %v5660_v39 = vpop.xlane.xlu1 %731  ;;  %v4092_v17 = vld [vmem:[%s7983_s0 + $0x1c8] sm:$0xff] }
 0x16c   :  { %8100 = vst [vmem:[#allocation115_spill] sm:$0xff] %v5660_v39  ;;  %v5666_v12 = vpop.xlane.xlu0 %728  ;;  %v838_v61 = vmul.f32 %v4092_v17, %v4092_v17  ;;  %v1071_v5 = vsel %vm396_vm0, %v835_v52, 0.0 }
 0x16d   :  { %8101 = vst [vmem:[#allocation116_spill] sm:$0xff] %v5666_v12  ;;  %v4093_v12 = vld [vmem:[%s7983_s0 + $0x1c0] sm:$0xff] }
 0x16e   :  { %1069 = vadd.xlane.f32.xlu1 %v1068_v41  ;;  %v837_v58 = vmul.f32 %v4093_v12, %v4093_v12  ;;  %v1080_v38 = vsel %vm396_vm0, %v838_v61, 0.0 }
 0x16f   :  { %1066 = vadd.xlane.f32.xlu0 %v1065_v14  ;;  %v5672_v24 = vpop.xlane.xlu1 %737  ;;  %v4094_v14 = vld [vmem:[%s7983_s0 + $0x1d8] sm:$0xff] }
 0x170   :  { %8102 = vst [vmem:[#allocation117_spill] sm:$0xff] %v5672_v24  ;;  %v5678_v39 = vpop.xlane.xlu0 %734  ;;  %v840_v17 = vmul.f32 %v4094_v14, %v4094_v14  ;;  %v1077_v52 = vsel %vm396_vm0, %v837_v58, 0.0 }
 0x171   :  { %8103 = vst [vmem:[#allocation118_spill] sm:$0xff] %v5678_v39  ;;  %v4095_v39 = vld [vmem:[%s7983_s0 + $0x1d0] sm:$0xff] }
 0x172   :  { %1075 = vadd.xlane.f32.xlu1 %v1074_v48  ;;  %v839_v12 = vmul.f32 %v4095_v39, %v4095_v39  ;;  %v1086_v61 = vsel %vm396_vm0, %v840_v17, 0.0 }
 0x173   :  { %1072 = vadd.xlane.f32.xlu0 %v1071_v5  ;;  %v5684_v41 = vpop.xlane.xlu1 %743  ;;  %v4096_v5 = vld [vmem:[%s7983_s0 + $0x1e8] sm:$0xff] }
 0x174   :  { %8104 = vst [vmem:[#allocation119_spill] sm:$0xff] %v5684_v41  ;;  %v5690_v24 = vpop.xlane.xlu0 %740  ;;  %v842_v14 = vmul.f32 %v4096_v5, %v4096_v5  ;;  %v1083_v58 = vsel %vm396_vm0, %v839_v12, 0.0 }
 0x175   :  { %8105 = vst [vmem:[#allocation120_spill] sm:$0xff] %v5690_v24  ;;  %v4097_v24 = vld [vmem:[%s7983_s0 + $0x1e0] sm:$0xff] }
 0x176   :  { %1081 = vadd.xlane.f32.xlu1 %v1080_v38  ;;  %v841_v39 = vmul.f32 %v4097_v24, %v4097_v24  ;;  %v1092_v17 = vsel %vm396_vm0, %v842_v14, 0.0 }
 0x177   :  { %1078 = vadd.xlane.f32.xlu0 %v1077_v52  ;;  %v5696_v48 = vpop.xlane.xlu1 %749  ;;  %v4098_v52 = vld [vmem:[%s7983_s0 + $0x1f8] sm:$0xff] }
 0x178   :  { %8106 = vst [vmem:[#allocation121_spill] sm:$0xff] %v5696_v48  ;;  %v5702_v41 = vpop.xlane.xlu0 %746  ;;  %v844_v5 = vmul.f32 %v4098_v52, %v4098_v52  ;;  %v1089_v12 = vsel %vm396_vm0, %v841_v39, 0.0 }
 0x179   :  { %8107 = vst [vmem:[#allocation122_spill] sm:$0xff] %v5702_v41  ;;  %v4099_v41 = vld [vmem:[%s7983_s0 + $0x1f0] sm:$0xff] }
 0x17a   :  { %1087 = vadd.xlane.f32.xlu1 %v1086_v61  ;;  %v843_v24 = vmul.f32 %v4099_v41, %v4099_v41  ;;  %v1098_v14 = vsel %vm396_vm0, %v844_v5, 0.0 }
 0x17b   :  { %1084 = vadd.xlane.f32.xlu0 %v1083_v58  ;;  %v5708_v38 = vpop.xlane.xlu1 %755  ;;  %v4100_v58 = vld [vmem:[%s7983_s0 + $0x208] sm:$0xff] }
 0x17c   :  { %8108 = vst [vmem:[#allocation123_spill] sm:$0xff] %v5708_v38  ;;  %v5714_v48 = vpop.xlane.xlu0 %752  ;;  %v846_v52 = vmul.f32 %v4100_v58, %v4100_v58  ;;  %v1095_v39 = vsel %vm396_vm0, %v843_v24, 0.0 }
 0x17d   :  { %8109 = vst [vmem:[#allocation124_spill] sm:$0xff] %v5714_v48  ;;  %v4101_v48 = vld [vmem:[%s7983_s0 + $0x200] sm:$0xff] }
 0x17e   :  { %1093 = vadd.xlane.f32.xlu1 %v1092_v17  ;;  %v845_v41 = vmul.f32 %v4101_v48, %v4101_v48  ;;  %v1104_v5 = vsel %vm396_vm0, %v846_v52, 0.0 }
 0x17f   :  { %1090 = vadd.xlane.f32.xlu0 %v1089_v12  ;;  %v5720_v61 = vpop.xlane.xlu1 %761  ;;  %v4102_v12 = vld [vmem:[%s7983_s0 + $0x218] sm:$0xff] }
 0x180   :  { %8110 = vst [vmem:[#allocation125_spill] sm:$0xff] %v5720_v61  ;;  %v5726_v38 = vpop.xlane.xlu0 %758  ;;  %v848_v58 = vmul.f32 %v4102_v12, %v4102_v12  ;;  %v1101_v24 = vsel %vm396_vm0, %v845_v41, 0.0 }
 0x181   :  { %8111 = vst [vmem:[#allocation126_spill] sm:$0xff] %v5726_v38  ;;  %v4103_v38 = vld [vmem:[%s7983_s0 + $0x210] sm:$0xff] }
 0x182   :  { %1099 = vadd.xlane.f32.xlu1 %v1098_v14  ;;  %v847_v48 = vmul.f32 %v4103_v38, %v4103_v38  ;;  %v1110_v52 = vsel %vm396_vm0, %v848_v58, 0.0 }
 0x183   :  { %1096 = vadd.xlane.f32.xlu0 %v1095_v39  ;;  %v5732_v17 = vpop.xlane.xlu1 %767  ;;  %v4104_v39 = vld [vmem:[%s7983_s0 + $0x228] sm:$0xff] }
 0x184   :  { %8112 = vst [vmem:[#allocation127_spill] sm:$0xff] %v5732_v17  ;;  %v5738_v61 = vpop.xlane.xlu0 %764  ;;  %v850_v12 = vmul.f32 %v4104_v39, %v4104_v39  ;;  %v1107_v41 = vsel %vm396_vm0, %v847_v48, 0.0 }
 0x185   :  { %8113 = vst [vmem:[#allocation128_spill] sm:$0xff] %v5738_v61  ;;  %v4105_v61 = vld [vmem:[%s7983_s0 + $0x220] sm:$0xff] }
 0x186   :  { %1105 = vadd.xlane.f32.xlu1 %v1104_v5  ;;  %v849_v38 = vmul.f32 %v4105_v61, %v4105_v61  ;;  %v1116_v58 = vsel %vm396_vm0, %v850_v12, 0.0 }
 0x187   :  { %1102 = vadd.xlane.f32.xlu0 %v1101_v24  ;;  %v5744_v14 = vpop.xlane.xlu1 %773  ;;  %v4106_v24 = vld [vmem:[%s7983_s0 + $0x238] sm:$0xff] }
 0x188   :  { %8114 = vst [vmem:[#allocation129_spill] sm:$0xff] %v5744_v14  ;;  %v5750_v17 = vpop.xlane.xlu0 %770  ;;  %v852_v39 = vmul.f32 %v4106_v24, %v4106_v24  ;;  %v1113_v48 = vsel %vm396_vm0, %v849_v38, 0.0 }
 0x189   :  { %8115 = vst [vmem:[#allocation130_spill] sm:$0xff] %v5750_v17  ;;  %v4107_v17 = vld [vmem:[%s7983_s0 + $0x230] sm:$0xff] }
 0x18a   :  { %1111 = vadd.xlane.f32.xlu1 %v1110_v52  ;;  %v851_v61 = vmul.f32 %v4107_v17, %v4107_v17  ;;  %v1122_v12 = vsel %vm396_vm0, %v852_v39, 0.0 }
 0x18b   :  { %1108 = vadd.xlane.f32.xlu0 %v1107_v41  ;;  %v5756_v5 = vpop.xlane.xlu1 %779  ;;  %v4108_v41 = vld [vmem:[%s7983_s0 + $0x248] sm:$0xff] }
 0x18c   :  { %8116 = vst [vmem:[#allocation131_spill] sm:$0xff] %v5756_v5  ;;  %v5762_v14 = vpop.xlane.xlu0 %776  ;;  %v854_v24 = vmul.f32 %v4108_v41, %v4108_v41  ;;  %v1119_v38 = vsel %vm396_vm0, %v851_v61, 0.0 }
 0x18d   :  { %8117 = vst [vmem:[#allocation132_spill] sm:$0xff] %v5762_v14  ;;  %v4109_v14 = vld [vmem:[%s7983_s0 + $0x240] sm:$0xff] }
 0x18e   :  { %1117 = vadd.xlane.f32.xlu1 %v1116_v58  ;;  %v853_v17 = vmul.f32 %v4109_v14, %v4109_v14  ;;  %v1128_v39 = vsel %vm396_vm0, %v854_v24, 0.0  ;;  %v855_v14 = vmul.f32 %v4111_v8, %v4111_v8  ;;  %v857_v8 = vmul.f32 %v4113_v53, %v4113_v53 }
 0x18f   :  { %1114 = vadd.xlane.f32.xlu0 %v1113_v48  ;;  %v5768_v52 = vpop.xlane.xlu1 %913  ;;  %v4110_v48 = vld [vmem:[%s7983_s0 + $0x258] sm:$0xff]  ;;  %v859_v53 = vmul.f32 %v4115_v22, %v4115_v22  ;;  %v861_v22 = vmul.f32 %v4117_v56, %v4117_v56  ;;  %v863_v56 = vmul.f32 %v4119_v27, %v4119_v27  ;;  %v865_v27 = vmul.f32 %v4121_v2, %v4121_v2 }
 0x190   :  { %v5774_v5 = vpop.xlane.xlu0 %910  ;;  %v856_v41 = vmul.f32 %v4110_v48, %v4110_v48  ;;  %v1125_v61 = vsel %vm396_vm0, %v853_v17, 0.0  ;;  %v1131_v17 = vsel %vm396_vm0, %v855_v14, 0.0  ;;  %v1137_v14 = vsel %vm396_vm0, %v857_v8, 0.0 }
 0x191   :  { %v1143_v8 = vsel %vm396_vm0, %v859_v53, 0.0  ;;  %v1149_v53 = vsel %vm396_vm0, %v861_v22, 0.0  ;;  %v1155_v22 = vsel %vm396_vm0, %v863_v56, 0.0  ;;  %v1161_v56 = vsel %vm396_vm0, %v865_v27, 0.0 }
 0x192   :  { %1123 = vadd.xlane.f32.xlu1 %v1122_v12  ;;  %v1134_v24 = vsel %vm396_vm0, %v856_v41, 0.0  ;;  %v867_v2 = vmul.f32 %v4123_v40, %v4123_v40  ;;  %v869_v40 = vmul.f32 %v4125_v21, %v4125_v21  ;;  %v871_v21 = vmul.f32 %v4127_v1, %v4127_v1 }
 0x193   :  { %1120 = vadd.xlane.f32.xlu0 %v1119_v38  ;;  %v5780_v58 = vpop.xlane.xlu1 %919  ;;  %v4112_v38 = vld [vmem:[%s7983_s0 + $0x268] sm:$0xff]  ;;  %v873_v1 = vmul.f32 %v4129_v45, %v4129_v45  ;;  %v875_v45 = vmul.f32 %v4131_v26, %v4131_v26  ;;  %v877_v26 = vmul.f32 %v4133_v11, %v4133_v11  ;;  %v879_v11 = vmul.f32 %v4135_v60, %v4135_v60 }
 0x194   :  { %v5786_v29 = vpop.xlane.xlu0 %916  ;;  %v858_v48 = vmul.f32 %v4112_v38, %v4112_v38  ;;  %v1167_v27 = vsel %vm396_vm0, %v867_v2, 0.0  ;;  %v1173_v2 = vsel %vm396_vm0, %v869_v40, 0.0  ;;  %v1179_v40 = vsel %vm396_vm0, %v871_v21, 0.0 }
 0x195   :  { %v1185_v21 = vsel %vm396_vm0, %v873_v1, 0.0  ;;  %v1191_v1 = vsel %vm396_vm0, %v875_v45, 0.0  ;;  %v1197_v45 = vsel %vm396_vm0, %v877_v26, 0.0  ;;  %v1203_v26 = vsel %vm396_vm0, %v879_v11, 0.0 }
 0x196   :  { %1129 = vadd.xlane.f32.xlu1 %v1128_v39  ;;  %v1140_v41 = vsel %vm396_vm0, %v858_v48, 0.0  ;;  %v881_v60 = vmul.f32 %v4137_v43, %v4137_v43  ;;  %v883_v43 = vmul.f32 %v4139_v28, %v4139_v28  ;;  %v885_v28 = vmul.f32 %v4141_v16, %v4141_v16 }
 0x197   :  { %1126 = vadd.xlane.f32.xlu0 %v1125_v61  ;;  %v5792_v12 = vpop.xlane.xlu1 %925  ;;  %v4114_v61 = vld [vmem:[%s7983_s0 + $0x278] sm:$0xff]  ;;  %v887_v16 = vmul.f32 %v4143_v4, %v4143_v4  ;;  %v889_v4 = vmul.f32 %v4145_v55, %v4145_v55  ;;  %v891_v55 = vmul.f32 %v4147_v42, %v4147_v42  ;;  %v893_v42 = vmul.f32 %v4149_v30, %v4149_v30 }
 0x198   :  { %v5798_v18 = vpop.xlane.xlu0 %922  ;;  %v860_v38 = vmul.f32 %v4114_v61, %v4114_v61  ;;  %v1209_v11 = vsel %vm396_vm0, %v881_v60, 0.0  ;;  %v1215_v60 = vsel %vm396_vm0, %v883_v43, 0.0  ;;  %v1221_v43 = vsel %vm396_vm0, %v885_v28, 0.0 }
 0x199   :  { %v1227_v28 = vsel %vm396_vm0, %v887_v16, 0.0  ;;  %v1233_v16 = vsel %vm396_vm0, %v889_v4, 0.0  ;;  %v1239_v4 = vsel %vm396_vm0, %v891_v55, 0.0  ;;  %v1245_v55 = vsel %vm396_vm0, %v893_v42, 0.0 }
 0x19a   :  { %1135 = vadd.xlane.f32.xlu1 %v1134_v24  ;;  %v1146_v48 = vsel %vm396_vm0, %v860_v38, 0.0  ;;  %v895_v30 = vmul.f32 %v4151_v20, %v4151_v20  ;;  %v897_v20 = vmul.f32 %v4153_v10, %v4153_v10  ;;  %v899_v10 = vmul.f32 %v4155_v0, %v4155_v0 }
 0x19b   :  { %1132 = vadd.xlane.f32.xlu0 %v1131_v17  ;;  %v5804_v39 = vpop.xlane.xlu1 %931  ;;  %v4116_v17 = vld [vmem:[%s7983_s0 + $0x288] sm:$0xff]  ;;  %v901_v0 = vmul.f32 %v4157_v54, %v4157_v54  ;;  %v903_v54 = vmul.f32 %v4159_v44, %v4159_v44  ;;  %v905_v44 = vmul.f32 %v4161_v47, %v4161_v47 }
 0x19c   :  { %v5810_v35 = vpop.xlane.xlu0 %928  ;;  %v862_v61 = vmul.f32 %v4116_v17, %v4116_v17  ;;  %v1251_v42 = vsel %vm396_vm0, %v895_v30, 0.0  ;;  %v1257_v30 = vsel %vm396_vm0, %v897_v20, 0.0  ;;  %v1263_v20 = vsel %vm396_vm0, %v899_v10, 0.0 }
 0x19d   :  { %v1269_v10 = vsel %vm396_vm0, %v901_v0, 0.0  ;;  %v1275_v0 = vsel %vm396_vm0, %v903_v54, 0.0  ;;  %v1281_v54 = vsel %vm396_vm0, %v905_v44, 0.0 }
 0x19e   :  { %1141 = vadd.xlane.f32.xlu1 %v1140_v41  ;;  %v1152_v38 = vsel %vm396_vm0, %v862_v61, 0.0 }
 0x19f   :  { %1138 = vadd.xlane.f32.xlu0 %v1137_v14  ;;  %v5816_v24 = vpop.xlane.xlu1 %937  ;;  %v4118_v14 = vld [vmem:[%s7983_s0 + $0x298] sm:$0xff] }
 0x1a0   :  { %v5822_v62 = vpop.xlane.xlu0 %934  ;;  %v864_v17 = vmul.f32 %v4118_v14, %v4118_v14 }
 0x1a2   :  { %1147 = vadd.xlane.f32.xlu1 %v1146_v48  ;;  %v1158_v61 = vsel %vm396_vm0, %v864_v17, 0.0 }
 0x1a3   :  { %1144 = vadd.xlane.f32.xlu0 %v1143_v8  ;;  %v5828_v41 = vpop.xlane.xlu1 %943  ;;  %v4120_v8 = vld [vmem:[%s7983_s0 + $0x2a8] sm:$0xff] }
 0x1a4   :  { %v5834_v36 = vpop.xlane.xlu0 %940  ;;  %v866_v14 = vmul.f32 %v4120_v8, %v4120_v8 }
 0x1a6   :  { %1153 = vadd.xlane.f32.xlu1 %v1152_v38  ;;  %v1164_v17 = vsel %vm396_vm0, %v866_v14, 0.0 }
 0x1a7   :  { %1150 = vadd.xlane.f32.xlu0 %v1149_v53  ;;  %v5840_v48 = vpop.xlane.xlu1 %949  ;;  %v4122_v53 = vld [vmem:[%s7983_s0 + $0x2b8] sm:$0xff] }
 0x1a8   :  { %v5846_v9 = vpop.xlane.xlu0 %946  ;;  %v868_v8 = vmul.f32 %v4122_v53, %v4122_v53 }
 0x1aa   :  { %1159 = vadd.xlane.f32.xlu1 %v1158_v61  ;;  %v1170_v14 = vsel %vm396_vm0, %v868_v8, 0.0 }
 0x1ab   :  { %1156 = vadd.xlane.f32.xlu0 %v1155_v22  ;;  %v5852_v38 = vpop.xlane.xlu1 %955  ;;  %v4124_v22 = vld [vmem:[%s7983_s0 + $0x2c8] sm:$0xff] }
 0x1ac   :  { %v5858_v50 = vpop.xlane.xlu0 %952  ;;  %v870_v53 = vmul.f32 %v4124_v22, %v4124_v22 }
 0x1ae   :  { %1165 = vadd.xlane.f32.xlu1 %v1164_v17  ;;  %v1176_v8 = vsel %vm396_vm0, %v870_v53, 0.0 }
 0x1af   :  { %1162 = vadd.xlane.f32.xlu0 %v1161_v56  ;;  %v5864_v61 = vpop.xlane.xlu1 %961  ;;  %v4126_v56 = vld [vmem:[%s7983_s0 + $0x2d8] sm:$0xff] }
 0x1b0   :  { %v5870_v25 = vpop.xlane.xlu0 %958  ;;  %v872_v22 = vmul.f32 %v4126_v56, %v4126_v56 }
 0x1b2   :  { %1171 = vadd.xlane.f32.xlu1 %v1170_v14  ;;  %v1182_v53 = vsel %vm396_vm0, %v872_v22, 0.0 }
 0x1b3   :  { %1168 = vadd.xlane.f32.xlu0 %v1167_v27  ;;  %v5876_v17 = vpop.xlane.xlu1 %967  ;;  %v4128_v27 = vld [vmem:[%s7983_s0 + $0x2e8] sm:$0xff] }
 0x1b4   :  { %v5882_v6 = vpop.xlane.xlu0 %964  ;;  %v874_v56 = vmul.f32 %v4128_v27, %v4128_v27 }
 0x1b6   :  { %1177 = vadd.xlane.f32.xlu1 %v1176_v8  ;;  %v1188_v22 = vsel %vm396_vm0, %v874_v56, 0.0 }
 0x1b7   :  { %1174 = vadd.xlane.f32.xlu0 %v1173_v2  ;;  %v5888_v14 = vpop.xlane.xlu1 %973  ;;  %v4130_v2 = vld [vmem:[%s7983_s0 + $0x2f8] sm:$0xff] }
 0x1b8   :  { %v5894_v51 = vpop.xlane.xlu0 %970  ;;  %v876_v27 = vmul.f32 %v4130_v2, %v4130_v2 }
 0x1ba   :  { %1183 = vadd.xlane.f32.xlu1 %v1182_v53  ;;  %v1194_v56 = vsel %vm396_vm0, %v876_v27, 0.0 }
 0x1bb   :  { %1180 = vadd.xlane.f32.xlu0 %v1179_v40  ;;  %v5900_v8 = vpop.xlane.xlu1 %979  ;;  %v4132_v40 = vld [vmem:[%s7983_s0 + $0x308] sm:$0xff] }
 0x1bc   :  { %v5906_v31 = vpop.xlane.xlu0 %976  ;;  %v878_v2 = vmul.f32 %v4132_v40, %v4132_v40 }
 0x1be   :  { %1189 = vadd.xlane.f32.xlu1 %v1188_v22  ;;  %v1200_v27 = vsel %vm396_vm0, %v878_v2, 0.0 }
 0x1bf   :  { %1186 = vadd.xlane.f32.xlu0 %v1185_v21  ;;  %v5912_v53 = vpop.xlane.xlu1 %985  ;;  %v4134_v21 = vld [vmem:[%s7983_s0 + $0x318] sm:$0xff] }
 0x1c0   :  { %v5918_v15 = vpop.xlane.xlu0 %982  ;;  %v880_v40 = vmul.f32 %v4134_v21, %v4134_v21 }
 0x1c2   :  { %1195 = vadd.xlane.f32.xlu1 %v1194_v56  ;;  %v1206_v2 = vsel %vm396_vm0, %v880_v40, 0.0 }
 0x1c3   :  { %1192 = vadd.xlane.f32.xlu0 %v1191_v1  ;;  %v5924_v22 = vpop.xlane.xlu1 %991  ;;  %v4136_v1 = vld [vmem:[%s7983_s0 + $0x328] sm:$0xff] }
 0x1c4   :  { %v5930_v63 = vpop.xlane.xlu0 %988  ;;  %v882_v21 = vmul.f32 %v4136_v1, %v4136_v1 }
 0x1c6   :  { %1201 = vadd.xlane.f32.xlu1 %v1200_v27  ;;  %v1212_v40 = vsel %vm396_vm0, %v882_v21, 0.0 }
 0x1c7   :  { %1198 = vadd.xlane.f32.xlu0 %v1197_v45  ;;  %v5936_v56 = vpop.xlane.xlu1 %997  ;;  %v4138_v45 = vld [vmem:[%s7983_s0 + $0x338] sm:$0xff] }
 0x1c8   :  { %v5942_v49 = vpop.xlane.xlu0 %994  ;;  %v884_v1 = vmul.f32 %v4138_v45, %v4138_v45 }
 0x1ca   :  { %1207 = vadd.xlane.f32.xlu1 %v1206_v2  ;;  %v1218_v21 = vsel %vm396_vm0, %v884_v1, 0.0 }
 0x1cb   :  { %1204 = vadd.xlane.f32.xlu0 %v1203_v26  ;;  %v5948_v27 = vpop.xlane.xlu1 %1003  ;;  %v4140_v26 = vld [vmem:[%s7983_s0 + $0x348] sm:$0xff] }
 0x1cc   :  { %v5954_v32 = vpop.xlane.xlu0 %1000  ;;  %v886_v45 = vmul.f32 %v4140_v26, %v4140_v26 }
 0x1ce   :  { %1213 = vadd.xlane.f32.xlu1 %v1212_v40  ;;  %v1224_v1 = vsel %vm396_vm0, %v886_v45, 0.0 }
 0x1cf   :  { %1210 = vadd.xlane.f32.xlu0 %v1209_v11  ;;  %v5960_v2 = vpop.xlane.xlu1 %1009  ;;  %v4142_v11 = vld [vmem:[%s7983_s0 + $0x358] sm:$0xff] }
 0x1d0   :  { %v5966_v19 = vpop.xlane.xlu0 %1006  ;;  %v888_v26 = vmul.f32 %v4142_v11, %v4142_v11 }
 0x1d2   :  { %1219 = vadd.xlane.f32.xlu1 %v1218_v21  ;;  %v1230_v45 = vsel %vm396_vm0, %v888_v26, 0.0 }
 0x1d3   :  { %1216 = vadd.xlane.f32.xlu0 %v1215_v60  ;;  %v5972_v40 = vpop.xlane.xlu1 %1015  ;;  %v4144_v60 = vld [vmem:[%s7983_s0 + $0x368] sm:$0xff] }
 0x1d4   :  { %v5978_v7 = vpop.xlane.xlu0 %1012  ;;  %v890_v11 = vmul.f32 %v4144_v60, %v4144_v60 }
 0x1d6   :  { %1225 = vadd.xlane.f32.xlu1 %v1224_v1  ;;  %v1236_v26 = vsel %vm396_vm0, %v890_v11, 0.0 }
 0x1d7   :  { %1222 = vadd.xlane.f32.xlu0 %v1221_v43  ;;  %v5984_v21 = vpop.xlane.xlu1 %1021  ;;  %v4146_v43 = vld [vmem:[%s7983_s0 + $0x378] sm:$0xff] }
 0x1d8   :  { %v5990_v59 = vpop.xlane.xlu0 %1018  ;;  %v892_v60 = vmul.f32 %v4146_v43, %v4146_v43 }
 0x1da   :  { %1231 = vadd.xlane.f32.xlu1 %v1230_v45  ;;  %v1242_v11 = vsel %vm396_vm0, %v892_v60, 0.0 }
 0x1db   :  { %1228 = vadd.xlane.f32.xlu0 %v1227_v28  ;;  %v5996_v1 = vpop.xlane.xlu1 %1027  ;;  %v4148_v28 = vld [vmem:[%s7983_s0 + $0x388] sm:$0xff] }
 0x1dc   :  { %v6002_v46 = vpop.xlane.xlu0 %1024  ;;  %v894_v43 = vmul.f32 %v4148_v28, %v4148_v28 }
 0x1de   :  { %1237 = vadd.xlane.f32.xlu1 %v1236_v26  ;;  %v1248_v60 = vsel %vm396_vm0, %v894_v43, 0.0 }
 0x1df   :  { %1234 = vadd.xlane.f32.xlu0 %v1233_v16  ;;  %v6008_v45 = vpop.xlane.xlu1 %1033  ;;  %v4150_v16 = vld [vmem:[%s7983_s0 + $0x398] sm:$0xff] }
 0x1e0   :  { %v6014_v33 = vpop.xlane.xlu0 %1030  ;;  %v896_v28 = vmul.f32 %v4150_v16, %v4150_v16 }
 0x1e2   :  { %1243 = vadd.xlane.f32.xlu1 %v1242_v11  ;;  %v1254_v43 = vsel %vm396_vm0, %v896_v28, 0.0 }
 0x1e3   :  { %1240 = vadd.xlane.f32.xlu0 %v1239_v4  ;;  %v6020_v26 = vpop.xlane.xlu1 %1039  ;;  %v4152_v4 = vld [vmem:[%s7983_s0 + $0x3a8] sm:$0xff] }
 0x1e4   :  { %v6026_v23 = vpop.xlane.xlu0 %1036  ;;  %v898_v16 = vmul.f32 %v4152_v4, %v4152_v4 }
 0x1e6   :  { %1249 = vadd.xlane.f32.xlu1 %v1248_v60  ;;  %v1260_v28 = vsel %vm396_vm0, %v898_v16, 0.0 }
 0x1e7   :  { %1246 = vadd.xlane.f32.xlu0 %v1245_v55  ;;  %v6032_v11 = vpop.xlane.xlu1 %1045  ;;  %v4154_v55 = vld [vmem:[%s7983_s0 + $0x3b8] sm:$0xff] }
 0x1e8   :  { %v6038_v13 = vpop.xlane.xlu0 %1042  ;;  %v900_v4 = vmul.f32 %v4154_v55, %v4154_v55 }
 0x1ea   :  { %1255 = vadd.xlane.f32.xlu1 %v1254_v43  ;;  %v1266_v16 = vsel %vm396_vm0, %v900_v4, 0.0 }
 0x1eb   :  { %1252 = vadd.xlane.f32.xlu0 %v1251_v42  ;;  %v6044_v60 = vpop.xlane.xlu1 %1051  ;;  %v4156_v42 = vld [vmem:[%s7983_s0 + $0x3c8] sm:$0xff] }
 0x1ec   :  { %v6050_v3 = vpop.xlane.xlu0 %1048  ;;  %v902_v55 = vmul.f32 %v4156_v42, %v4156_v42 }
 0x1ee   :  { %1261 = vadd.xlane.f32.xlu1 %v1260_v28  ;;  %v1272_v4 = vsel %vm396_vm0, %v902_v55, 0.0 }
 0x1ef   :  { %1258 = vadd.xlane.f32.xlu0 %v1257_v30  ;;  %v6056_v43 = vpop.xlane.xlu1 %1057  ;;  %v4158_v30 = vld [vmem:[%s7983_s0 + $0x3d8] sm:$0xff] }
 0x1f0   :  { %v6062_v57 = vpop.xlane.xlu0 %1054  ;;  %v904_v42 = vmul.f32 %v4158_v30, %v4158_v30 }
 0x1f2   :  { %1267 = vadd.xlane.f32.xlu1 %v1266_v16  ;;  %v1278_v55 = vsel %vm396_vm0, %v904_v42, 0.0 }
 0x1f3   :  { %1264 = vadd.xlane.f32.xlu0 %v1263_v20  ;;  %v6068_v28 = vpop.xlane.xlu1 %1063  ;;  %v4160_v20 = vld [vmem:[%s7983_s0 + $0x3e8] sm:$0xff] }
 0x1f4   :  { %v6074_v34 = vpop.xlane.xlu0 %1060  ;;  %v906_v30 = vmul.f32 %v4160_v20, %v4160_v20 }
 0x1f5   :  { %8118 = vst [vmem:[#allocation133_spill] sm:$0xff] %v6074_v34 }
 0x1f6   :  { %1273 = vadd.xlane.f32.xlu1 %v1272_v4  ;;  %v1284_v42 = vsel %vm396_vm0, %v906_v30, 0.0 }
 0x1f7   :  { %1270 = vadd.xlane.f32.xlu0 %v1269_v10  ;;  %v6080_v16 = vpop.xlane.xlu1 %1069  ;;  %v4162_v10 = vld [vmem:[%s7983_s0 + $0x3f8] sm:$0xff] }
 0x1f8   :  { %8119 = vst [vmem:[#allocation134_spill] sm:$0xff] %v6080_v16  ;;  %v6086_v37 = vpop.xlane.xlu0 %1066  ;;  %v908_v20 = vmul.f32 %v4162_v10, %v4162_v10 }
 0x1f9   :  { %8120 = vst [vmem:[#allocation135_spill] sm:$0xff] %v6086_v37  ;;  %v4163_v37 = vld [vmem:[%s7983_s0 + $0x3f0] sm:$0xff] }
 0x1fa   :  { %1279 = vadd.xlane.f32.xlu1 %v1278_v55  ;;  %v907_v47 = vmul.f32 %v4163_v37, %v4163_v37  ;;  %v1290_v30 = vsel %vm396_vm0, %v908_v20, 0.0 }
 0x1fb   :  { %1276 = vadd.xlane.f32.xlu0 %v1275_v0  ;;  %v6092_v4 = vpop.xlane.xlu1 %1075  ;;  %v4164_v0 = vld [vmem:[%s7984_s1 + $0x8] sm:$0xff] }
 0x1fc   :  { %8121 = vst [vmem:[#allocation136_spill] sm:$0xff] %v6092_v4  ;;  %v6098_v16 = vpop.xlane.xlu0 %1072  ;;  %v1294_v10 = vmul.f32 %v4164_v0, %v4164_v0  ;;  %v1287_v44 = vsel %vm396_vm0, %v907_v47, 0.0 }
 0x1fd   :  { %8122 = vst [vmem:[#allocation137_spill] sm:$0xff] %v6098_v16  ;;  %v4165_v16 = vld [vmem:[%s7984_s1] sm:$0xff] }
 0x1fe   :  { %1285 = vadd.xlane.f32.xlu1 %v1284_v42  ;;  %v1293_v37 = vmul.f32 %v4165_v16, %v4165_v16  ;;  %v1424_v20 = vsel %vm396_vm0, %v1294_v10, 0.0 }
 0x1ff   :  { %1282 = vadd.xlane.f32.xlu0 %v1281_v54  ;;  %v6104_v55 = vpop.xlane.xlu1 %1081  ;;  %v4166_v54 = vld [vmem:[%s7984_s1 + $0x18] sm:$0xff] }
 0x200   :  { %8123 = vst [vmem:[#allocation138_spill] sm:$0xff] %v6104_v55  ;;  %v6110_v4 = vpop.xlane.xlu0 %1078  ;;  %v1296_v0 = vmul.f32 %v4166_v54, %v4166_v54  ;;  %v1421_v47 = vsel %vm396_vm0, %v1293_v37, 0.0 }
 0x201   :  { %8124 = vst [vmem:[#allocation139_spill] sm:$0xff] %v6110_v4  ;;  %v4167_v4 = vld [vmem:[%s7984_s1 + $0x10] sm:$0xff] }
 0x202   :  { %1291 = vadd.xlane.f32.xlu1 %v1290_v30  ;;  %v1295_v16 = vmul.f32 %v4167_v4, %v4167_v4  ;;  %v1430_v10 = vsel %vm396_vm0, %v1296_v0, 0.0 }
 0x203   :  { %1288 = vadd.xlane.f32.xlu0 %v1287_v44  ;;  %v6116_v42 = vpop.xlane.xlu1 %1087  ;;  %v4168_v44 = vld [vmem:[%s7984_s1 + $0x28] sm:$0xff] }
 0x204   :  { %8125 = vst [vmem:[#allocation140_spill] sm:$0xff] %v6116_v42  ;;  %v6122_v55 = vpop.xlane.xlu0 %1084  ;;  %v1298_v54 = vmul.f32 %v4168_v44, %v4168_v44  ;;  %v1427_v37 = vsel %vm396_vm0, %v1295_v16, 0.0 }
 0x205   :  { %8126 = vst [vmem:[#allocation141_spill] sm:$0xff] %v6122_v55  ;;  %v4169_v55 = vld [vmem:[%s7984_s1 + $0x20] sm:$0xff] }
 0x206   :  { %1425 = vadd.xlane.f32.xlu1 %v1424_v20  ;;  %v1297_v4 = vmul.f32 %v4169_v55, %v4169_v55  ;;  %v1436_v0 = vsel %vm396_vm0, %v1298_v54, 0.0 }
 0x207   :  { %1422 = vadd.xlane.f32.xlu0 %v1421_v47  ;;  %v6128_v30 = vpop.xlane.xlu1 %1093  ;;  %v4170_v47 = vld [vmem:[%s7984_s1 + $0x38] sm:$0xff] }
 0x208   :  { %8127 = vst [vmem:[#allocation142_spill] sm:$0xff] %v6128_v30  ;;  %v6134_v42 = vpop.xlane.xlu0 %1090  ;;  %v1300_v44 = vmul.f32 %v4170_v47, %v4170_v47  ;;  %v1433_v16 = vsel %vm396_vm0, %v1297_v4, 0.0 }
 0x209   :  { %8128 = vst [vmem:[#allocation143_spill] sm:$0xff] %v6134_v42  ;;  %v4171_v42 = vld [vmem:[%s7984_s1 + $0x30] sm:$0xff] }
 0x20a   :  { %1431 = vadd.xlane.f32.xlu1 %v1430_v10  ;;  %v1299_v55 = vmul.f32 %v4171_v42, %v4171_v42  ;;  %v1442_v54 = vsel %vm396_vm0, %v1300_v44, 0.0 }
 0x20b   :  { %1428 = vadd.xlane.f32.xlu0 %v1427_v37  ;;  %v6140_v20 = vpop.xlane.xlu1 %1099  ;;  %v4172_v37 = vld [vmem:[%s7984_s1 + $0x48] sm:$0xff] }
 0x20c   :  { %8129 = vst [vmem:[#allocation144_spill] sm:$0xff] %v6140_v20  ;;  %v6146_v30 = vpop.xlane.xlu0 %1096  ;;  %v1302_v47 = vmul.f32 %v4172_v37, %v4172_v37  ;;  %v1439_v4 = vsel %vm396_vm0, %v1299_v55, 0.0 }
 0x20d   :  { %8130 = vst [vmem:[#allocation145_spill] sm:$0xff] %v6146_v30  ;;  %v4173_v30 = vld [vmem:[%s7984_s1 + $0x40] sm:$0xff] }
 0x20e   :  { %1437 = vadd.xlane.f32.xlu1 %v1436_v0  ;;  %v1301_v42 = vmul.f32 %v4173_v30, %v4173_v30  ;;  %v1448_v44 = vsel %vm396_vm0, %v1302_v47, 0.0 }
 0x20f   :  { %1434 = vadd.xlane.f32.xlu0 %v1433_v16  ;;  %v6152_v10 = vpop.xlane.xlu1 %1105  ;;  %v4174_v16 = vld [vmem:[%s7984_s1 + $0x58] sm:$0xff] }
 0x210   :  { %8131 = vst [vmem:[#allocation146_spill] sm:$0xff] %v6152_v10  ;;  %v6158_v20 = vpop.xlane.xlu0 %1102  ;;  %v1304_v37 = vmul.f32 %v4174_v16, %v4174_v16  ;;  %v1445_v55 = vsel %vm396_vm0, %v1301_v42, 0.0 }
 0x211   :  { %8132 = vst [vmem:[#allocation147_spill] sm:$0xff] %v6158_v20  ;;  %v4175_v20 = vld [vmem:[%s7984_s1 + $0x50] sm:$0xff] }
 0x212   :  { %1443 = vadd.xlane.f32.xlu1 %v1442_v54  ;;  %v1303_v30 = vmul.f32 %v4175_v20, %v4175_v20  ;;  %v1454_v47 = vsel %vm396_vm0, %v1304_v37, 0.0 }
 0x213   :  { %1440 = vadd.xlane.f32.xlu0 %v1439_v4  ;;  %v6164_v0 = vpop.xlane.xlu1 %1111  ;;  %v4176_v4 = vld [vmem:[%s7984_s1 + $0x68] sm:$0xff] }
 0x214   :  { %8133 = vst [vmem:[#allocation148_spill] sm:$0xff] %v6164_v0  ;;  %v6170_v10 = vpop.xlane.xlu0 %1108  ;;  %v1306_v16 = vmul.f32 %v4176_v4, %v4176_v4  ;;  %v1451_v42 = vsel %vm396_vm0, %v1303_v30, 0.0 }
 0x215   :  { %8134 = vst [vmem:[#allocation149_spill] sm:$0xff] %v6170_v10  ;;  %v4177_v10 = vld [vmem:[%s7984_s1 + $0x60] sm:$0xff] }
 0x216   :  { %1449 = vadd.xlane.f32.xlu1 %v1448_v44  ;;  %v1305_v20 = vmul.f32 %v4177_v10, %v4177_v10  ;;  %v1460_v37 = vsel %vm396_vm0, %v1306_v16, 0.0 }
 0x217   :  { %1446 = vadd.xlane.f32.xlu0 %v1445_v55  ;;  %v6176_v54 = vpop.xlane.xlu1 %1117  ;;  %v4178_v55 = vld [vmem:[%s7984_s1 + $0x78] sm:$0xff] }
 0x218   :  { %8135 = vst [vmem:[#allocation150_spill] sm:$0xff] %v6176_v54  ;;  %v6182_v0 = vpop.xlane.xlu0 %1114  ;;  %v1308_v4 = vmul.f32 %v4178_v55, %v4178_v55  ;;  %v1457_v30 = vsel %vm396_vm0, %v1305_v20, 0.0 }
 0x219   :  { %8136 = vst [vmem:[#allocation151_spill] sm:$0xff] %v6182_v0  ;;  %v4179_v0 = vld [vmem:[%s7984_s1 + $0x70] sm:$0xff] }
 0x21a   :  { %1455 = vadd.xlane.f32.xlu1 %v1454_v47  ;;  %v1307_v10 = vmul.f32 %v4179_v0, %v4179_v0  ;;  %v1466_v16 = vsel %vm396_vm0, %v1308_v4, 0.0 }
 0x21b   :  { %1452 = vadd.xlane.f32.xlu0 %v1451_v42  ;;  %v6188_v44 = vpop.xlane.xlu1 %1123  ;;  %v4180_v42 = vld [vmem:[%s7984_s1 + $0x88] sm:$0xff] }
 0x21c   :  { %8137 = vst [vmem:[#allocation152_spill] sm:$0xff] %v6188_v44  ;;  %v6194_v54 = vpop.xlane.xlu0 %1120  ;;  %v1310_v55 = vmul.f32 %v4180_v42, %v4180_v42  ;;  %v1463_v20 = vsel %vm396_vm0, %v1307_v10, 0.0 }
 0x21d   :  { %8138 = vst [vmem:[#allocation153_spill] sm:$0xff] %v6194_v54  ;;  %v4181_v54 = vld [vmem:[%s7984_s1 + $0x80] sm:$0xff] }
 0x21e   :  { %1461 = vadd.xlane.f32.xlu1 %v1460_v37  ;;  %v1309_v0 = vmul.f32 %v4181_v54, %v4181_v54  ;;  %v1472_v4 = vsel %vm396_vm0, %v1310_v55, 0.0 }
 0x21f   :  { %1458 = vadd.xlane.f32.xlu0 %v1457_v30  ;;  %v6200_v47 = vpop.xlane.xlu1 %1129  ;;  %v4182_v30 = vld [vmem:[%s7984_s1 + $0x98] sm:$0xff] }
 0x220   :  { %8139 = vst [vmem:[#allocation154_spill] sm:$0xff] %v6200_v47  ;;  %v6206_v44 = vpop.xlane.xlu0 %1126  ;;  %v1312_v42 = vmul.f32 %v4182_v30, %v4182_v30  ;;  %v1469_v10 = vsel %vm396_vm0, %v1309_v0, 0.0 }
 0x221   :  { %8140 = vst [vmem:[#allocation155_spill] sm:$0xff] %v6206_v44  ;;  %v4183_v44 = vld [vmem:[%s7984_s1 + $0x90] sm:$0xff] }
 0x222   :  { %1467 = vadd.xlane.f32.xlu1 %v1466_v16  ;;  %v1311_v54 = vmul.f32 %v4183_v44, %v4183_v44  ;;  %v1478_v55 = vsel %vm396_vm0, %v1312_v42, 0.0  ;;  %v4185_v44 = vld [vmem:[%s7984_s1 + $0xa0] sm:$0xff]  ;;  %v1808_v42 = vmax.f32 %v5780_v58, 1e-16 }
 0x223   :  { %1464 = vadd.xlane.f32.xlu0 %v1463_v20  ;;  %v6212_v37 = vpop.xlane.xlu1 %1135  ;;  %v4184_v20 = vld [vmem:[%s7984_s1 + $0xa8] sm:$0xff] }
 0x224   :  { %8141 = vst [vmem:[#allocation156_spill] sm:$0xff] %v6212_v37  ;;  %v6218_v47 = vpop.xlane.xlu0 %1132  ;;  %v1314_v30 = vmul.f32 %v4184_v20, %v4184_v20  ;;  %v1475_v0 = vsel %vm396_vm0, %v1311_v54, 0.0  ;;  %v4186_v54 = vld [vmem:[%s7984_s1 + $0xb8] sm:$0xff] }
 0x225   :  { %8142 = vst [vmem:[#allocation157_spill] sm:$0xff] %v6218_v47  ;;  %v1806_v47 = vmax.f32 %v5768_v52, 1e-16 }
 0x226   :  { %1473 = vadd.xlane.f32.xlu1 %v1472_v4  ;;  %v1313_v4 = vmul.f32 %v4185_v44, %v4185_v44  ;;  %v1484_v52 = vsel %vm396_vm0, %v1314_v30, 0.0  ;;  %v1810_v44 = vmax.f32 %v5792_v12, 1e-16  ;;  %v1812_v30 = vmax.f32 %v5804_v39, 1e-16 }
 0x227   :  { %1470 = vadd.xlane.f32.xlu0 %v1469_v10  ;;  %v6224_v16 = vpop.xlane.xlu1 %1141  ;;  %v1805_v10 = vmax.f32 %v5774_v5, 1e-16  ;;  %3524 = vrsqrt.f32 %v1806_v47  ;;  %v1811_v47 = vmax.f32 %v5810_v35, 1e-16  ;;  %v4189_v35 = vld [vmem:[%s7984_s1 + $0xc0] sm:$0xff] }
 0x228   :  { %8143 = vst [vmem:[#allocation158_spill] sm:$0xff] %v6224_v16  ;;  %v6231_v37 = vpop.xlane.xlu0 %1138  ;;  %v1807_v16 = vmax.f32 %v5786_v29, 1e-16  ;;  %v1481_v5 = vsel %vm396_vm0, %v1313_v4, 0.0  ;;  %v4187_v29 = vld [vmem:[%s7984_s1 + $0xb0] sm:$0xff]  ;;  %v4188_v4 = vld [vmem:[%s7984_s1 + $0xc8] sm:$0xff] }
 0x229   :  { %8144 = vst [vmem:[#allocation159_spill] sm:$0xff] %v6231_v37  ;;  %v1316_v37 = vmul.f32 %v4186_v54, %v4186_v54  ;;  %v1315_v58 = vmul.f32 %v4187_v29, %v4187_v29  ;;  %3526 = vrsqrt.f32 %v1805_v10  ;;  %v1318_v54 = vmul.f32 %v4188_v4, %v4188_v4 }
 0x22a   :  { %1479 = vadd.xlane.f32.xlu1 %v1478_v55  ;;  %v1809_v55 = vmax.f32 %v5798_v18, 1e-16  ;;  %3528 = vrsqrt.f32 %v1808_v42  ;;  %v1814_v18 = vmax.f32 %v5816_v24, 1e-16  ;;  %v1816_v42 = vmax.f32 %v5828_v41, 1e-16 }
 0x22b   :  { %1476 = vadd.xlane.f32.xlu0 %v1475_v0  ;;  %v6240_v20 = vpop.xlane.xlu1 %1147  ;;  %3530 = vrsqrt.f32 %v1807_v16  ;;  %v1490_v0 = vsel %vm396_vm0, %v1316_v37, 0.0  ;;  %v1487_v39 = vsel %vm396_vm0, %v1315_v58, 0.0  ;;  %v1317_v16 = vmul.f32 %v4189_v35, %v4189_v35 }
 0x22c   :  { %v6247_v34 = vpop.xlane.xlu0 %1144  ;;  %3532 = vrsqrt.f32 %v1810_v44  ;;  %v1813_v37 = vmax.f32 %v5822_v62, 1e-16  ;;  %v1496_v44 = vsel %vm396_vm0, %v1318_v54, 0.0  ;;  %v1818_v62 = vmax.f32 %v5840_v48, 1e-16  ;;  %v4192_v54 = vld [vmem:[%s7984_s1 + $0xe8] sm:$0xff] }
 0x22d   :  { %3534 = vrsqrt.f32 %v1809_v55  ;;  %v1493_v41 = vsel %vm396_vm0, %v1317_v16, 0.0 }
 0x22e   :  { %1485 = vadd.xlane.f32.xlu1 %v1484_v52  ;;  %3536 = vrsqrt.f32 %v1812_v30  ;;  %v1815_v52 = vmax.f32 %v5834_v36, 1e-16  ;;  %v4191_v36 = vld [vmem:[%s7984_s1 + $0xd0] sm:$0xff]  ;;  %v1817_v30 = vmax.f32 %v5846_v9, 1e-16 }
 0x22f   :  { %1482 = vadd.xlane.f32.xlu0 %v1481_v5  ;;  %v6256_v12 = vpop.xlane.xlu1 %1153  ;;  %3538 = vrsqrt.f32 %v1811_v47  ;;  %v4190_v5 = vld [vmem:[%s7984_s1 + $0xd8] sm:$0xff]  ;;  %v1319_v55 = vmul.f32 %v4191_v36, %v4191_v36  ;;  %v1820_v47 = vmax.f32 %v5852_v38, 1e-16  ;;  %v1822_v9 = vmax.f32 %v5864_v61, 1e-16 }
 0x230   :  { %v6263_v10 = vpop.xlane.xlu0 %1150  ;;  %v1320_v29 = vmul.f32 %v4190_v5, %v4190_v5  ;;  %3540 = vrsqrt.f32 %v1814_v18  ;;  %v1322_v18 = vmul.f32 %v4192_v54, %v4192_v54  ;;  %v1828_v54 = vmax.f32 %v5900_v8, 1e-16 }
 0x231   :  { %3542 = vrsqrt.f32 %v1813_v37  ;;  %v1499_v38 = vsel %vm396_vm0, %v1319_v55, 0.0  ;;  %v1821_v37 = vmax.f32 %v5870_v25, 1e-16  ;;  %v4194_v25 = vld [vmem:[%s7984_s1 + $0xf8] sm:$0xff]  ;;  %v1830_v8 = vmax.f32 %v5912_v53, 1e-16 }
 0x232   :  { %1491 = vadd.xlane.f32.xlu1 %v1490_v0  ;;  %3544 = vrsqrt.f32 %v1816_v42  ;;  %v1819_v0 = vmax.f32 %v5858_v50, 1e-16  ;;  %v1502_v4 = vsel %vm396_vm0, %v1320_v29, 0.0  ;;  %v4193_v50 = vld [vmem:[%s7984_s1 + $0xe0] sm:$0xff]  ;;  %v1508_v29 = vsel %vm396_vm0, %v1322_v18, 0.0 }
 0x233   :  { %1488 = vadd.xlane.f32.xlu0 %v1487_v39  ;;  %v6272_v24 = vpop.xlane.xlu1 %1159  ;;  %3546 = vrsqrt.f32 %v1815_v52  ;;  %v1321_v35 = vmul.f32 %v4193_v50, %v4193_v50  ;;  %v1824_v52 = vmax.f32 %v5876_v17, 1e-16  ;;  %v1826_v17 = vmax.f32 %v5888_v14, 1e-16 }
 0x234   :  { %v6279_v58 = vpop.xlane.xlu0 %1156  ;;  %3548 = vrsqrt.f32 %v1818_v62  ;;  %v6301_v16 = vpop.eup %3524  ;;  %v1324_v62 = vmul.f32 %v4194_v25, %v4194_v25  ;;  %v1827_v18 = vmax.f32 %v5906_v31, 1e-16  ;;  %v4197_v31 = vld [vmem:[%s7984_s1 + $0x100] sm:$0xff]  ;;  %v1829_v25 = vmax.f32 %v5918_v15, 1e-16  ;;  %v4198_v15 = vld [vmem:[%s7984_s1 + $0x118] sm:$0xff] }
 0x235   :  { %8145 = vst [vmem:[#allocation160_spill] sm:$0xff] %v6301_v16  ;;  %3550 = vrsqrt.f32 %v1817_v30  ;;  %v1505_v55 = vsel %vm396_vm0, %v1321_v35, 0.0 }
 0x236   :  { %1497 = vadd.xlane.f32.xlu1 %v1496_v44  ;;  %v6304_v42 = vpop.eup %3526  ;;  %3552 = vrsqrt.f32 %v1820_v47  ;;  %v1823_v44 = vmax.f32 %v5882_v6, 1e-16  ;;  %v4195_v6 = vld [vmem:[%s7984_s1 + $0xf0] sm:$0xff] }
 0x237   :  { %1494 = vadd.xlane.f32.xlu0 %v1493_v41  ;;  %v6288_v48 = vpop.xlane.xlu1 %1165  ;;  %8146 = vst [vmem:[#allocation161_spill] sm:$0xff] %v6304_v42  ;;  %v6307_v61 = vpop.eup %3528  ;;  %3554 = vrsqrt.f32 %v1819_v0  ;;  %v1323_v30 = vmul.f32 %v4195_v6, %v4195_v6  ;;  %v1825_v0 = vmax.f32 %v5894_v51, 1e-16  ;;  %v4196_v51 = vld [vmem:[%s7984_s1 + $0x108] sm:$0xff] }
 0x238   :  { %v6295_v39 = vpop.xlane.xlu0 %1162  ;;  %8147 = vst [vmem:[#allocation162_spill] sm:$0xff] %v6307_v61  ;;  %v6316_v41 = vpop.eup %3530  ;;  %3556 = vrsqrt.f32 %v1822_v9  ;;  %v1326_v50 = vmul.f32 %v4196_v51, %v4196_v51 }
 0x239   :  { %8148 = vst [vmem:[#allocation163_spill] sm:$0xff] %v6316_v41  ;;  %v6325_v47 = vpop.eup %3532  ;;  %3558 = vrsqrt.f32 %v1821_v37 }
 0x23a   :  { %1503 = vadd.xlane.f32.xlu1 %v1502_v4  ;;  %8149 = vst [vmem:[#allocation164_spill] sm:$0xff] %v6325_v47  ;;  %v6328_v4 = vpop.eup %3534  ;;  %3560 = vrsqrt.f32 %v1824_v52  ;;  %v1511_v52 = vsel %vm396_vm0, %v1323_v30, 0.0  ;;  %v1520_v30 = vsel %vm396_vm0, %v1326_v50, 0.0 }
 0x23b   :  { %1500 = vadd.xlane.f32.xlu0 %v1499_v38  ;;  %v6310_v5 = vpop.xlane.xlu1 %1171  ;;  %8150 = vst [vmem:[#allocation165_spill] sm:$0xff] %v6328_v4  ;;  %v6331_v14 = vpop.eup %3536  ;;  %3562 = vrsqrt.f32 %v1823_v44  ;;  %v1514_v38 = vsel %vm396_vm0, %v1324_v62, 0.0  ;;  %v1325_v44 = vmul.f32 %v4197_v31, %v4197_v31 }
 0x23c   :  { %v6319_v36 = vpop.xlane.xlu0 %1168  ;;  %8151 = vst [vmem:[#allocation166_spill] sm:$0xff] %v6331_v14  ;;  %v6340_v35 = vpop.eup %3538  ;;  %3564 = vrsqrt.f32 %v1826_v17  ;;  %v1832_v17 = vmax.f32 %v5924_v22, 1e-16  ;;  %v1834_v22 = vmax.f32 %v5936_v56, 1e-16  ;;  %v8197_v14 = vld [vmem:[#allocation140_spill] sm:$0xff] }
 0x23d   :  { %8152 = vst [vmem:[#allocation167_spill] sm:$0xff] %v6340_v35  ;;  %3566 = vrsqrt.f32 %v1825_v0  ;;  %v1328_v0 = vmul.f32 %v4198_v15, %v4198_v15 }
 0x23e   :  { %1509 = vadd.xlane.f32.xlu1 %v1508_v29  ;;  %v6349_v29 = vpop.eup %3540  ;;  %3568 = vrsqrt.f32 %v1828_v54 }
 0x23f   :  { %1506 = vadd.xlane.f32.xlu0 %v1505_v55  ;;  %v6334_v9 = vpop.xlane.xlu1 %1177  ;;  %8153 = vst [vmem:[#allocation168_spill] sm:$0xff] %v6349_v29  ;;  %v6352_v62 = vpop.eup %3542  ;;  %3570 = vrsqrt.f32 %v1827_v18  ;;  %v1831_v55 = vmax.f32 %v5930_v63, 1e-16  ;;  %v1517_v18 = vsel %vm396_vm0, %v1325_v44, 0.0  ;;  %v4199_v63 = vld [vmem:[%s7984_s1 + $0x110] sm:$0xff]  ;;  %v8195_v29 = vld [vmem:[#allocation139_spill] sm:$0xff] }
 0x240   :  { %v6343_v37 = vpop.xlane.xlu0 %1174  ;;  %8154 = vst [vmem:[#allocation169_spill] sm:$0xff] %v6352_v62  ;;  %v6355_v53 = vpop.eup %3544  ;;  %3572 = vrsqrt.f32 %v1830_v8  ;;  %v1836_v8 = vmax.f32 %v5948_v27, 1e-16  ;;  %v1835_v44 = vmax.f32 %v5954_v32, 1e-16  ;;  %v4201_v32 = vld [vmem:[%s7984_s1 + $0x120] sm:$0xff] }
 0x241   :  { %8155 = vst [vmem:[#allocation170_spill] sm:$0xff] %v6355_v53  ;;  %v6364_v51 = vpop.eup %3546  ;;  %3574 = vrsqrt.f32 %v1829_v25  ;;  %v1838_v27 = vmax.f32 %v5960_v2, 1e-16  ;;  %v4203_v2 = vld [vmem:[%s7984_s1 + $0x130] sm:$0xff] }
 0x242   :  { %1515 = vadd.xlane.f32.xlu1 %v1514_v38  ;;  %8156 = vst [vmem:[#allocation171_spill] sm:$0xff] %v6364_v51  ;;  %v1327_v38 = vmul.f32 %v4199_v63, %v4199_v63  ;;  %v6373_v50 = vpop.eup %3548  ;;  %3576 = vrsqrt.f32 %v1832_v17  ;;  %v1526_v63 = vsel %vm396_vm0, %v1328_v0, 0.0 }
 0x243   :  { %1512 = vadd.xlane.f32.xlu0 %v1511_v52  ;;  %v6358_v6 = vpop.xlane.xlu1 %1183  ;;  %8157 = vst [vmem:[#allocation172_spill] sm:$0xff] %v6373_v50  ;;  %v1833_v52 = vmax.f32 %v5942_v49, 1e-16  ;;  %v6376_v31 = vpop.eup %3550  ;;  %3578 = vrsqrt.f32 %v1831_v55  ;;  %v4200_v49 = vld [vmem:[%s7984_s1 + $0x128] sm:$0xff] }
 0x244   :  { %v6367_v54 = vpop.xlane.xlu0 %1180  ;;  %8158 = vst [vmem:[#allocation173_spill] sm:$0xff] %v6376_v31  ;;  %v6379_v56 = vpop.eup %3552  ;;  %v1330_v25 = vmul.f32 %v4200_v49, %v4200_v49  ;;  %3580 = vrsqrt.f32 %v1834_v22  ;;  %v1523_v55 = vsel %vm396_vm0, %v1327_v38, 0.0  ;;  %v4202_v22 = vld [vmem:[%s7984_s1 + $0x138] sm:$0xff]  ;;  %v1331_v38 = vmul.f32 %v4203_v2, %v4203_v2 }
 0x245   :  { %8159 = vst [vmem:[#allocation174_spill] sm:$0xff] %v6379_v56  ;;  %v6388_v31 = vpop.eup %3554  ;;  %3582 = vrsqrt.f32 %v1833_v52  ;;  %v1332_v49 = vmul.f32 %v4202_v22, %v4202_v22  ;;  %v4205_v22 = vld [vmem:[%s7984_s1 + $0x140] sm:$0xff]  ;;  %v1839_v2 = vmax.f32 %v5978_v7, 1e-16 }
 0x246   :  { %1521 = vadd.xlane.f32.xlu1 %v1520_v30  ;;  %8160 = vst [vmem:[#allocation175_spill] sm:$0xff] %v6388_v31  ;;  %v1329_v30 = vmul.f32 %v4201_v32, %v4201_v32  ;;  %v6397_v0 = vpop.eup %3556  ;;  %3584 = vrsqrt.f32 %v1836_v8  ;;  %v1840_v32 = vmax.f32 %v5972_v40, 1e-16  ;;  %v1532_v40 = vsel %vm396_vm0, %v1330_v25, 0.0 }
 0x247   :  { %1518 = vadd.xlane.f32.xlu0 %v1517_v18  ;;  %v6382_v15 = vpop.xlane.xlu1 %1189  ;;  %8161 = vst [vmem:[#allocation176_spill] sm:$0xff] %v6397_v0  ;;  %v1837_v18 = vmax.f32 %v5966_v19, 1e-16  ;;  %v6406_v31 = vpop.eup %3558  ;;  %v4204_v19 = vld [vmem:[%s7984_s1 + $0x148] sm:$0xff]  ;;  %v1333_v0 = vmul.f32 %v4205_v22, %v4205_v22  ;;  %3586 = vrsqrt.f32 %v1835_v44  ;;  %v4206_v44 = vld [vmem:[%s7984_s1 + $0x158] sm:$0xff]  ;;  %v1538_v25 = vsel %vm396_vm0, %v1332_v49, 0.0 }
 0x248   :  { %v6391_v17 = vpop.xlane.xlu0 %1186  ;;  %8162 = vst [vmem:[#allocation177_spill] sm:$0xff] %v6406_v31  ;;  %v1334_v52 = vmul.f32 %v4204_v19, %v4204_v19  ;;  %v6415_v56 = vpop.eup %3560  ;;  %3588 = vrsqrt.f32 %v1838_v27  ;;  %v1842_v19 = vmax.f32 %v5984_v21, 1e-16  ;;  %v1529_v50 = vsel %vm396_vm0, %v1329_v30, 0.0  ;;  %v4207_v49 = vld [vmem:[%s7984_s1 + $0x150] sm:$0xff] }
 0x249   :  { %8163 = vst [vmem:[#allocation178_spill] sm:$0xff] %v6415_v56  ;;  %v1336_v22 = vmul.f32 %v4206_v44, %v4206_v44  ;;  %3590 = vrsqrt.f32 %v1837_v18  ;;  %v1535_v27 = vsel %vm396_vm0, %v1331_v38, 0.0  ;;  %v1844_v21 = vmax.f32 %v5996_v1, 1e-16  ;;  %v4208_v1 = vld [vmem:[%s7984_s1 + $0x168] sm:$0xff] }
 0x24a   :  { %1527 = vadd.xlane.f32.xlu1 %v1526_v63  ;;  %v6421_v63 = vpop.eup %3562  ;;  %3592 = vrsqrt.f32 %v1840_v32  ;;  %v1544_v30 = vsel %vm396_vm0, %v1334_v52, 0.0  ;;  %v1541_v56 = vsel %vm396_vm0, %v1333_v0, 0.0  ;;  %v1843_v18 = vmax.f32 %v6002_v46, 1e-16 }
 0x24b   :  { %1524 = vadd.xlane.f32.xlu0 %v1523_v55  ;;  %v6418_v8 = vpop.xlane.xlu1 %1195  ;;  %8164 = vst [vmem:[#allocation179_spill] sm:$0xff] %v6421_v63  ;;  %v6430_v7 = vpop.eup %3564  ;;  %v1841_v55 = vmax.f32 %v5990_v59, 1e-16  ;;  %3594 = vrsqrt.f32 %v1839_v2  ;;  %v1335_v38 = vmul.f32 %v4207_v49, %v4207_v49  ;;  %v1338_v32 = vmul.f32 %v4208_v1, %v4208_v1 }
 0x24c   :  { %v6424_v31 = vpop.xlane.xlu0 %1192  ;;  %8165 = vst [vmem:[#allocation180_spill] sm:$0xff] %v6430_v7  ;;  %v6435_v63 = vpop.eup %3566  ;;  %3596 = vrsqrt.f32 %v1842_v19  ;;  %v1846_v0 = vmax.f32 %v6008_v45, 1e-16  ;;  %v6457_v46 = vsel %vm396_vm0, %v1336_v22, 0.0  ;;  %v1845_v1 = vmax.f32 %v6014_v33, 1e-16 }
 0x24d   :  { %8166 = vst [vmem:[#allocation181_spill] sm:$0xff] %v6435_v63  ;;  %v6440_v44 = vpop.eup %3568  ;;  %3598 = vrsqrt.f32 %v1841_v55  ;;  %v4210_v19 = vld [vmem:[%s7984_s1 + $0x178] sm:$0xff]  ;;  %v4211_v22 = vld [vmem:[%s7984_s1 + $0x170] sm:$0xff]  ;;  %v4212_v33 = vld [vmem:[%s7984_s1 + $0x188] sm:$0xff] }
 0x24e   :  { %1533 = vadd.xlane.f32.xlu1 %v1532_v40  ;;  %8167 = vst [vmem:[#allocation182_spill] sm:$0xff] %v6440_v44  ;;  %v6451_v52 = vpop.eup %3570  ;;  %v1340_v45 = vmul.f32 %v4210_v19, %v4210_v19  ;;  %3600 = vrsqrt.f32 %v1844_v21  ;;  %v1342_v55 = vmul.f32 %v4212_v33, %v4212_v33  ;;  %v4213_v19 = vld [vmem:[%s7984_s1 + $0x180] sm:$0xff]  ;;  %v1850_v33 = vmax.f32 %v6032_v11, 1e-16 }
 0x24f   :  { %1530 = vadd.xlane.f32.xlu0 %v1529_v50  ;;  %v6443_v59 = vpop.xlane.xlu1 %1201  ;;  %8168 = vst [vmem:[#allocation183_spill] sm:$0xff] %v6451_v52  ;;  %v4209_v50 = vld [vmem:[%s7984_s1 + $0x160] sm:$0xff]  ;;  %v6462_v49 = vpop.eup %3572  ;;  %v1339_v52 = vmul.f32 %v4211_v22, %v4211_v22  ;;  %3602 = vrsqrt.f32 %v1843_v18  ;;  %v1847_v22 = vmax.f32 %v6026_v23, 1e-16  ;;  %v4214_v23 = vld [vmem:[%s7984_s1 + $0x198] sm:$0xff] }
 0x250   :  { %v6454_v2 = vpop.xlane.xlu0 %1198  ;;  %v1337_v40 = vmul.f32 %v4209_v50, %v4209_v50  ;;  %8169 = vst [vmem:[#allocation184_spill] sm:$0xff] %v6462_v49  ;;  %v6471_v44 = vpop.eup %3574  ;;  %v1848_v50 = vmax.f32 %v6020_v26, 1e-16  ;;  %v1341_v49 = vmul.f32 %v4213_v19, %v4213_v19  ;;  %v1547_v26 = vsel %vm396_vm0, %v1335_v38, 0.0 }
 0x251   :  { %8170 = vst [vmem:[#allocation185_spill] sm:$0xff] %v6471_v44  ;;  %v6480_v63 = vpop.eup %3576  ;;  %3604 = vrsqrt.f32 %v1846_v0  ;;  %v1849_v38 = vmax.f32 %v6038_v13, 1e-16  ;;  %v6507_v11 = vsel %vm396_vm0, %v1339_v52, 0.0  ;;  %v1851_v13 = vmax.f32 %v6050_v3, 1e-16 }
 0x252   :  { %1539 = vadd.xlane.f32.xlu1 %v1538_v25  ;;  %8171 = vst [vmem:[#allocation186_spill] sm:$0xff] %v6480_v63  ;;  %v6487_v25 = vsel %vm396_vm0, %v1338_v32, 0.0  ;;  %v6489_v44 = vpop.eup %3578  ;;  %v6495_v19 = vsel %vm396_vm0, %v1337_v40, 0.0  ;;  %3606 = vrsqrt.f32 %v1845_v1  ;;  %v6504_v32 = vsel %vm396_vm0, %v1340_v45, 0.0  ;;  %v4215_v45 = vld [vmem:[%s7984_s1 + $0x190] sm:$0xff] }
 0x253   :  { %1536 = vadd.xlane.f32.xlu0 %v1535_v27  ;;  %v6483_v21 = vpop.xlane.xlu1 %1207  ;;  %8172 = vst [vmem:[#allocation187_spill] sm:$0xff] %v6489_v44  ;;  %v1344_v27 = vmul.f32 %v4214_v23, %v4214_v23  ;;  %v6500_v18 = vpop.eup %3580  ;;  %3608 = vrsqrt.f32 %v1848_v50  ;;  %v1852_v40 = vmax.f32 %v6044_v60, 1e-16  ;;  %v6513_v44 = vsel %vm396_vm0, %v1342_v55, 0.0  ;;  %v8182_v63 = vld [vmem:[#allocation134_spill] sm:$0xff] }
 0x254   :  { %v6492_v7 = vpop.xlane.xlu0 %1204  ;;  %8173 = vst [vmem:[#allocation188_spill] sm:$0xff] %v6500_v18  ;;  %v6509_v0 = vpop.eup %3582  ;;  %v6516_v23 = vsel %vm396_vm0, %v1341_v49, 0.0  ;;  %3610 = vrsqrt.f32 %v1847_v22  ;;  %v1343_v60 = vmul.f32 %v4215_v45, %v4215_v45  ;;  %v1854_v55 = vmax.f32 %v6056_v43, 1e-16 }
 0x255   :  { %8174 = vst [vmem:[#allocation189_spill] sm:$0xff] %v6509_v0  ;;  %v6518_v1 = vpop.eup %3584  ;;  %3612 = vrsqrt.f32 %v1850_v33  ;;  %v6535_v3 = vsel %vm396_vm0, %v1344_v27, 0.0  ;;  %v4218_v33 = vld [vmem:[%s7984_s1 + $0x1b8] sm:$0xff]  ;;  %v4219_v27 = vld [vmem:[%s7984_s1 + $0x1b0] sm:$0xff]  ;;  %v1858_v51 = vmax.f32 %v8182_v63, 1e-16 }
 0x256   :  { %1545 = vadd.xlane.f32.xlu1 %v1544_v30  ;;  %8175 = vst [vmem:[#allocation190_spill] sm:$0xff] %v6518_v1  ;;  %v4216_v30 = vld [vmem:[%s7984_s1 + $0x1a8] sm:$0xff]  ;;  %v6529_v49 = vpop.eup %3586  ;;  %3614 = vrsqrt.f32 %v1849_v38  ;;  %v1348_v43 = vmul.f32 %v4218_v33, %v4218_v33  ;;  %v4221_v33 = vld [vmem:[%s7984_s1 + $0x1c0] sm:$0xff] }
 0x257   :  { %1542 = vadd.xlane.f32.xlu0 %v1541_v56  ;;  %v6521_v52 = vpop.xlane.xlu1 %1213  ;;  %v1346_v50 = vmul.f32 %v4216_v30, %v4216_v30  ;;  %8176 = vst [vmem:[#allocation191_spill] sm:$0xff] %v6529_v49  ;;  %v4217_v56 = vld [vmem:[%s7984_s1 + $0x1a0] sm:$0xff]  ;;  %v6540_v1 = vpop.eup %3588  ;;  %v1853_v30 = vmax.f32 %v6062_v57, 1e-16  ;;  %v1347_v49 = vmul.f32 %v4219_v27, %v4219_v27  ;;  %3616 = vrsqrt.f32 %v1852_v40  ;;  %v4220_v57 = vld [vmem:[%s7984_s1 + $0x1c8] sm:$0xff] }
 0x258   :  { %v6532_v22 = vpop.xlane.xlu0 %1210  ;;  %v1345_v45 = vmul.f32 %v4217_v56, %v4217_v56  ;;  %8177 = vst [vmem:[#allocation192_spill] sm:$0xff] %v6540_v1  ;;  %v6549_v0 = vpop.eup %3590  ;;  %v1856_v56 = vmax.f32 %v6068_v28, 1e-16  ;;  %v1350_v38 = vmul.f32 %v4220_v57, %v4220_v57  ;;  %v1349_v1 = vmul.f32 %v4221_v33, %v4221_v33  ;;  %v8180_v27 = vld [vmem:[#allocation133_spill] sm:$0xff] }
 0x259   :  { %8178 = vst [vmem:[#allocation193_spill] sm:$0xff] %v6549_v0  ;;  %v6559_v18 = vpop.eup %3592  ;;  %3618 = vrsqrt.f32 %v1851_v13  ;;  %v1855_v0 = vmax.f32 %v8180_v27, 1e-16  ;;  %v6565_v28 = vsel %vm396_vm0, %v1343_v60, 0.0  ;;  %v6588_v63 = vsel %vm396_vm0, %v1347_v49, 0.0 }
 0x25a   :  { %1551 = vadd.xlane.f32.xlu1 %v6457_v46  ;;  %8179 = vst [vmem:[#allocation194_spill] sm:$0xff] %v6559_v18  ;;  %v6568_v46 = vsel %vm396_vm0, %v1346_v50, 0.0  ;;  %v6570_v57 = vpop.eup %3594  ;;  %3620 = vrsqrt.f32 %v1854_v55  ;;  %v6576_v13 = vsel %vm396_vm0, %v1345_v45, 0.0  ;;  %v8185_v50 = vld [vmem:[#allocation135_spill] sm:$0xff]  ;;  %v8187_v45 = vld [vmem:[#allocation136_spill] sm:$0xff] }
 0x25b   :  { %1548 = vadd.xlane.f32.xlu0 %v1547_v26  ;;  %v6562_v40 = vpop.xlane.xlu1 %1219  ;;  %8181 = vst [vmem:[#allocation133_spill] sm:$0xff] %v6570_v57  ;;  %v4222_v26 = vld [vmem:[%s7984_s1 + $0x1d8] sm:$0xff]  ;;  %v6581_v60 = vpop.eup %3596  ;;  %3622 = vrsqrt.f32 %v1853_v30  ;;  %v1857_v18 = vmax.f32 %v8185_v50, 1e-16  ;;  %v6585_v57 = vsel %vm396_vm0, %v1348_v43, 0.0  ;;  %v6598_v30 = vsel %vm396_vm0, %v1349_v1, 0.0 }
 0x25c   :  { %v6573_v33 = vpop.xlane.xlu0 %1216  ;;  %v1352_v27 = vmul.f32 %v4222_v26, %v4222_v26  ;;  %8184 = vst [vmem:[#allocation195_spill] sm:$0xff] %v6581_v60  ;;  %v6590_v55 = vpop.eup %3598  ;;  %3624 = vrsqrt.f32 %v1856_v56  ;;  %v1860_v53 = vmax.f32 %v8187_v45, 1e-16  ;;  %v6595_v26 = vsel %vm396_vm0, %v1350_v38, 0.0  ;;  %v8189_v43 = vld [vmem:[#allocation137_spill] sm:$0xff]  ;;  %v4223_v56 = vld [vmem:[%s7984_s1 + $0x1d0] sm:$0xff] }
 0x25d   :  { %8183 = vst [vmem:[#allocation134_spill] sm:$0xff] %v6573_v33  ;;  %8186 = vst [vmem:[#allocation135_spill] sm:$0xff] %v6590_v55  ;;  %v6600_v50 = vpop.eup %3600  ;;  %3626 = vrsqrt.f32 %v1855_v0  ;;  %v1859_v60 = vmax.f32 %v8189_v43, 1e-16  ;;  %v4224_v38 = vld [vmem:[%s7984_s1 + $0x1e8] sm:$0xff]  ;;  %v8192_v0 = vld [vmem:[#allocation138_spill] sm:$0xff] }
 0x25e   :  { %1557 = vadd.xlane.f32.xlu1 %v6487_v25  ;;  %8188 = vst [vmem:[#allocation136_spill] sm:$0xff] %v6600_v50  ;;  %v1351_v25 = vmul.f32 %v4223_v56, %v4223_v56  ;;  %v1354_v1 = vmul.f32 %v4224_v38, %v4224_v38  ;;  %v6612_v45 = vpop.eup %3602  ;;  %3628 = vrsqrt.f32 %v1858_v51  ;;  %v1862_v50 = vmax.f32 %v8192_v0, 1e-16  ;;  %v4225_v55 = vld [vmem:[%s7984_s1 + $0x1e0] sm:$0xff]  ;;  %v4226_v51 = vld [vmem:[%s7984_s1 + $0x1f8] sm:$0xff] }
 0x25f   :  { %1554 = vadd.xlane.f32.xlu0 %v6495_v19  ;;  %v6604_v49 = vpop.xlane.xlu1 %1225  ;;  %8191 = vst [vmem:[#allocation196_spill] sm:$0xff] %v6612_v45  ;;  %v6618_v19 = vsel %vm396_vm0, %v1352_v27, 0.0  ;;  %v1353_v56 = vmul.f32 %v4225_v55, %v4225_v55  ;;  %v6623_v62 = vpop.eup %3604  ;;  %3630 = vrsqrt.f32 %v1857_v18  ;;  %v1861_v38 = vmax.f32 %v8195_v29, 1e-16  ;;  %v4227_v27 = vld [vmem:[%s7984_s1 + $0x1f0] sm:$0xff]  ;;  %v4228_v29 = vld [vmem:[%s7984_s1 + $0x208] sm:$0xff] }
 0x260   :  { %8190 = vst [vmem:[#allocation137_spill] sm:$0xff] %v6604_v49  ;;  %v6615_v43 = vpop.xlane.xlu0 %1222  ;;  %8194 = vst [vmem:[#allocation197_spill] sm:$0xff] %v6623_v62  ;;  %v1356_v0 = vmul.f32 %v4226_v51, %v4226_v51  ;;  %v1355_v45 = vmul.f32 %v4227_v27, %v4227_v27  ;;  %v6632_v35 = vpop.eup %3606  ;;  %3632 = vrsqrt.f32 %v1860_v53  ;;  %v1864_v55 = vmax.f32 %v8197_v14, 1e-16  ;;  %v8199_v51 = vld [vmem:[#allocation141_spill] sm:$0xff]  ;;  %v8238_v33 = vld [vmem:[#allocation155_spill] sm:$0xff] }
 0x261   :  { %8193 = vst [vmem:[#allocation138_spill] sm:$0xff] %v6615_v43  ;;  %8196 = vst [vmem:[#allocation139_spill] sm:$0xff] %v6632_v35  ;;  %v1358_v18 = vmul.f32 %v4228_v29, %v4228_v29  ;;  %v2829_v62 = vlaneseq  ;;  %v6639_v4 = vpop.eup %3608  ;;  %3634 = vrsqrt.f32 %v1859_v60  ;;  %v1863_v47 = vmax.f32 %v8199_v51, 1e-16  ;;  %v8202_v29 = vld [vmem:[#allocation142_spill] sm:$0xff] }
 0x262   :  { %1563 = vadd.xlane.f32.xlu1 %v6504_v32  ;;  %8198 = vst [vmem:[#allocation140_spill] sm:$0xff] %v6639_v4  ;;  %v6646_v53 = vsel %vm396_vm0, %v1351_v25, 0.0  ;;  %v6649_v14 = vsel %vm396_vm0, %v1354_v1, 0.0  ;;  %v6651_v32 = vpop.eup %3610  ;;  %3636 = vrsqrt.f32 %v1862_v50  ;;  %v1866_v35 = vmax.f32 %v8202_v29, 1e-16  ;;  %v4230_v29 = vld [vmem:[%s7984_s1 + $0x218] sm:$0xff] }
 0x263   :  { %1560 = vadd.xlane.f32.xlu0 %v6507_v11  ;;  %v6643_v27 = vpop.xlane.xlu1 %1231  ;;  %8201 = vst [vmem:[#allocation198_spill] sm:$0xff] %v6651_v32  ;;  %v6657_v60 = vsel %vm396_vm0, %v1353_v56, 0.0  ;;  %v4229_v11 = vld [vmem:[%s7984_s1 + $0x200] sm:$0xff]  ;;  %v6662_v25 = vpop.eup %3612  ;;  %3638 = vrsqrt.f32 %v1861_v38  ;;  %v6665_v1 = vsel %vm396_vm0, %v1356_v0, 0.0  ;;  %v6668_v50 = vsel %vm396_vm0, %v1355_v45, 0.0  ;;  %v8206_v4 = vld [vmem:[#allocation143_spill] sm:$0xff] }
 0x264   :  { %8200 = vst [vmem:[#allocation141_spill] sm:$0xff] %v6643_v27  ;;  %v6654_v41 = vpop.xlane.xlu0 %1228  ;;  %v1357_v51 = vmul.f32 %v4229_v11, %v4229_v11  ;;  %8204 = vst [vmem:[#allocation199_spill] sm:$0xff] %v6662_v25  ;;  %v1360_v56 = vmul.f32 %v4230_v29, %v4230_v29  ;;  %v6673_v32 = vpop.eup %3614  ;;  %3640 = vrsqrt.f32 %v1864_v55  ;;  %v1865_v61 = vmax.f32 %v8206_v4, 1e-16  ;;  %v8208_v45 = vld [vmem:[#allocation144_spill] sm:$0xff]  ;;  %v4231_v4 = vld [vmem:[%s7984_s1 + $0x210] sm:$0xff] }
 0x265   :  { %8203 = vst [vmem:[#allocation142_spill] sm:$0xff] %v6654_v41  ;;  %8205 = vst [vmem:[#allocation200_spill] sm:$0xff] %v6673_v32  ;;  %v6678_v38 = vsel %vm396_vm0, %v1358_v18, 0.0  ;;  %v6680_v0 = vand.u32 127, %v2829_v62  ;;  %v6682_v11 = vpop.eup %3616  ;;  %3642 = vrsqrt.f32 %v1863_v47  ;;  %v1868_v25 = vmax.f32 %v8208_v45, 1e-16 }
 0x266   :  { %1569 = vadd.xlane.f32.xlu1 %v6513_v44  ;;  %8207 = vst [vmem:[#allocation143_spill] sm:$0xff] %v6682_v11  ;;  %v1359_v55 = vmul.f32 %v4231_v4, %v4231_v4  ;;  %v4232_v44 = vld [vmem:[%s7984_s1 + $0x228] sm:$0xff]  ;;  %v6694_v32 = vpop.eup %3618  ;;  %3644 = vrsqrt.f32 %v1866_v35  ;;  %v8214_v41 = vld [vmem:[#allocation146_spill] sm:$0xff]  ;;  %v4234_v35 = vld [vmem:[%s7984_s1 + $0x238] sm:$0xff] }
 0x267   :  { %1566 = vadd.xlane.f32.xlu0 %v6516_v23  ;;  %v6686_v29 = vpop.xlane.xlu1 %1237  ;;  %v1362_v18 = vmul.f32 %v4232_v44, %v4232_v44  ;;  %8210 = vst [vmem:[#allocation201_spill] sm:$0xff] %v6694_v32  ;;  %v8211_v47 = vld [vmem:[#allocation145_spill] sm:$0xff]  ;;  %v6700_v23 = vsel %vm396_vm0, %v1357_v51, 0.0  ;;  %v6705_v42 = vpop.eup %3620  ;;  %v1870_v16 = vmax.f32 %v8214_v41, 1e-16  ;;  %v6709_v44 = vsel %vm396_vm0, %v1360_v56, 0.0 }
 0x268   :  { %8209 = vst [vmem:[#allocation144_spill] sm:$0xff] %v6686_v29  ;;  %v1867_v11 = vmax.f32 %v8211_v47, 1e-16  ;;  %v6697_v45 = vpop.xlane.xlu0 %1234  ;;  %v4233_v29 = vld [vmem:[%s7984_s1 + $0x220] sm:$0xff]  ;;  %8213 = vst [vmem:[#allocation202_spill] sm:$0xff] %v6705_v42  ;;  %v1364_v47 = vmul.f32 %v4234_v35, %v4234_v35  ;;  %v4235_v51 = vld [vmem:[%s7984_s1 + $0x230] sm:$0xff]  ;;  %3646 = vrsqrt.f32 %v1865_v61 }
 0x269   :  { %8212 = vst [vmem:[#allocation145_spill] sm:$0xff] %v6697_v45  ;;  %v1361_v4 = vmul.f32 %v4233_v29, %v4233_v29  ;;  %v1363_v32 = vmul.f32 %v4235_v51, %v4235_v51  ;;  %v6717_v45 = vpop.eup %3622  ;;  %v8216_v29 = vld [vmem:[#allocation147_spill] sm:$0xff]  ;;  %v6721_v41 = vshrl.u32 %v2829_v62, 7  ;;  %v2835_v56 = vadd.s32 4294967288, %v6680_v0  ;;  %v8218_v35 = vld [vmem:[#allocation148_spill] sm:$0xff]  ;;  %v8221_v62 = vld [vmem:[#allocation149_spill] sm:$0xff] }
 0x26a   :  { %8215 = vst [vmem:[#allocation146_spill] sm:$0xff] %v6717_v45  ;;  %v1869_v42 = vmax.f32 %v8216_v29, 1e-16  ;;  %1575 = vadd.xlane.f32.xlu1 %v6535_v3  ;;  %v6724_v27 = vpop.eup %3624  ;;  %3648 = vrsqrt.f32 %v1868_v25  ;;  %v1872_v43 = vmax.f32 %v8218_v35, 1e-16  ;;  %v6731_v51 = vsel %vm396_vm0, %v1359_v55, 0.0 }
 0x26b   :  { %8217 = vst [vmem:[#allocation147_spill] sm:$0xff] %v6724_v27  ;;  %1572 = vadd.xlane.f32.xlu0 %v6565_v28  ;;  %v6728_v49 = vpop.xlane.xlu1 %1243  ;;  %v6734_v61 = vsel %vm396_vm0, %v1362_v18, 0.0  ;;  %v6736_v3 = vpop.eup %3626  ;;  %3650 = vrsqrt.f32 %v1867_v11  ;;  %v1871_v29 = vmax.f32 %v8221_v62, 1e-16  ;;  %v6742_v25 = vsel %vm396_vm0, %v1361_v4, 0.0  ;;  %v4236_v28 = vld [vmem:[%s7984_s1 + $0x288] sm:$0xff] }
 0x26c   :  { %8219 = vst [vmem:[#allocation148_spill] sm:$0xff] %v6728_v49  ;;  %8220 = vst [vmem:[#allocation203_spill] sm:$0xff] %v6736_v3  ;;  %v6739_v45 = vpop.xlane.xlu0 %1240  ;;  %v1374_v35 = vmul.f32 %v4236_v28, %v4236_v28  ;;  %v6747_v55 = vpop.eup %3628  ;;  %3652 = vrsqrt.f32 %v1870_v16  ;;  %v8224_v18 = vld [vmem:[#allocation150_spill] sm:$0xff]  ;;  %v6751_v3 = vsel %vm396_vm0, %v1364_v47, 0.0  ;;  %v6754_v11 = vsel %vm396_vm0, %v1363_v32, 0.0  ;;  %v8226_v4 = vld [vmem:[#allocation151_spill] sm:$0xff] }
 0x26d   :  { %8222 = vst [vmem:[#allocation149_spill] sm:$0xff] %v6739_v45  ;;  %8223 = vst [vmem:[#allocation204_spill] sm:$0xff] %v6747_v55  ;;  %v1874_v27 = vmax.f32 %v8224_v18, 1e-16  ;;  %v6756_v62 = vpop.eup %3630  ;;  %3654 = vrsqrt.f32 %v1869_v42  ;;  %v1873_v45 = vmax.f32 %v8226_v4, 1e-16  ;;  %v6761_v28 = vsub.s32 %v2835_v56, %v6721_v41 }
 0x26e   :  { %8225 = vst [vmem:[#allocation150_spill] sm:$0xff] %v6756_v62  ;;  %1581 = vadd.xlane.f32.xlu1 %v6568_v46  ;;  %v4237_v16 = vld [vmem:[%s7984_s1 + $0x280] sm:$0xff]  ;;  %v6766_v47 = vpop.eup %3632  ;;  %3656 = vrsqrt.f32 %v1872_v43  ;;  %v4239_v4 = vld [vmem:[%s7984_s1 + $0x290] sm:$0xff]  ;;  %v8232_v43 = vld [vmem:[#allocation153_spill] sm:$0xff] }
 0x26f   :  { %8227 = vst [vmem:[#allocation151_spill] sm:$0xff] %v6761_v28  ;;  %v1373_v18 = vmul.f32 %v4237_v16, %v4237_v16  ;;  %8228 = vst [vmem:[#allocation205_spill] sm:$0xff] %v6766_v47  ;;  %v8229_v32 = vld [vmem:[#allocation152_spill] sm:$0xff]  ;;  %1578 = vadd.xlane.f32.xlu0 %v6576_v13  ;;  %v6770_v42 = vpop.xlane.xlu1 %1249  ;;  %v1375_v62 = vmul.f32 %v4239_v4, %v4239_v4  ;;  %v6778_v16 = vpop.eup %3634  ;;  %3658 = vrsqrt.f32 %v1871_v29  ;;  %v1875_v47 = vmax.f32 %v8232_v43, 1e-16  ;;  %v8236_v28 = vld [vmem:[#allocation154_spill] sm:$0xff] }
 0x270   :  { %v1876_v55 = vmax.f32 %v8229_v32, 1e-16  ;;  %8230 = vst [vmem:[#allocation152_spill] sm:$0xff] %v6770_v42  ;;  %v4238_v46 = vld [vmem:[%s7984_s1 + $0x300] sm:$0xff]  ;;  %8231 = vst [vmem:[#allocation206_spill] sm:$0xff] %v6778_v16  ;;  %v6781_v32 = vpop.xlane.xlu0 %1246  ;;  %v6784_v13 = vsel %vm396_vm0, %v1374_v35, 0.0  ;;  %v6789_v49 = vpop.eup %3636  ;;  %3660 = vrsqrt.f32 %v1874_v27 }
 0x271   :  { %v1389_v56 = vmul.f32 %v4238_v46, %v4238_v46  ;;  %8233 = vst [vmem:[#allocation153_spill] sm:$0xff] %v6781_v32  ;;  %8234 = vst [vmem:[#allocation207_spill] sm:$0xff] %v6784_v13  ;;  %v4240_v42 = vld [vmem:[%s7984_s1 + $0x298] sm:$0xff]  ;;  %v1878_v4 = vmax.f32 %v8236_v28, 1e-16  ;;  %v4241_v29 = vld [vmem:[%s7984_s1 + $0x308] sm:$0xff]  ;;  %v6798_v32 = vpop.eup %3638  ;;  %3662 = vrsqrt.f32 %v1873_v45 }
 0x272   :  { %v1376_v46 = vmul.f32 %v4240_v42, %v4240_v42  ;;  %8235 = vst [vmem:[#allocation208_spill] sm:$0xff] %v6789_v49  ;;  %v1390_v43 = vmul.f32 %v4241_v29, %v4241_v29  ;;  %v4242_v35 = vld [vmem:[%s7984_s1 + $0x380] sm:$0xff]  ;;  %8237 = vst [vmem:[#allocation154_spill] sm:$0xff] %v6798_v32  ;;  %v1877_v42 = vmax.f32 %v8238_v33, 1e-16  ;;  %1587 = vadd.xlane.f32.xlu1 %v6585_v57  ;;  %v6803_v27 = vsel %vm396_vm0, %v1373_v18, 0.0  ;;  %v6808_v49 = vpop.eup %3640 }
 0x273   :  { %v1405_v16 = vmul.f32 %v4242_v35, %v4242_v35  ;;  %v4243_v28 = vld [vmem:[%s7984_s1 + $0x310] sm:$0xff]  ;;  %8239 = vst [vmem:[#allocation155_spill] sm:$0xff] %v6808_v49  ;;  %3664 = vrsqrt.f32 %v1876_v55  ;;  %v8240_v13 = vld [vmem:[#allocation156_spill] sm:$0xff]  ;;  %1584 = vadd.xlane.f32.xlu0 %v6588_v63  ;;  %v6812_v45 = vpop.xlane.xlu1 %1255  ;;  %v6815_v33 = vsel %vm396_vm0, %v1389_v56, 0.0  ;;  %v6818_v57 = vsel %vm396_vm0, %v1375_v62, 0.0  ;;  %v6820_v18 = vpop.eup %3642  ;;  %v4245_v56 = vld [vmem:[%s7984_s1 + $0x388] sm:$0xff] }
 0x274   :  { %v1391_v29 = vmul.f32 %v4243_v28, %v4243_v28  ;;  %v1880_v35 = vmax.f32 %v8240_v13, 1e-16  ;;  %8241 = vst [vmem:[#allocation156_spill] sm:$0xff] %v6812_v45  ;;  %8242 = vst [vmem:[#allocation209_spill] sm:$0xff] %v6820_v18  ;;  %3666 = vrsqrt.f32 %v1875_v47  ;;  %v6822_v32 = vpop.xlane.xlu0 %1252  ;;  %v6825_v28 = vsel %vm396_vm0, %v1376_v46, 0.0  ;;  %v4244_v63 = vld [vmem:[%s7984_s1 + $0x2a0] sm:$0xff]  ;;  %v6833_v62 = vpop.eup %3644 }
 0x275   :  { %8243 = vst [vmem:[#allocation210_spill] sm:$0xff] %v6822_v32  ;;  %v1377_v55 = vmul.f32 %v4244_v63, %v4244_v63  ;;  %v1406_v13 = vmul.f32 %v4245_v56, %v4245_v56  ;;  %8244 = vst [vmem:[#allocation211_spill] sm:$0xff] %v6833_v62  ;;  %3668 = vrsqrt.f32 %v1878_v4  ;;  %v8245_v18 = vld [vmem:[#allocation157_spill] sm:$0xff]  ;;  %v6837_v49 = vsel %vm396_vm0, %v1390_v43, 0.0  ;;  %v6851_v4 = vpop.eup %3646  ;;  %v8249_v43 = vld [vmem:[#allocation158_spill] sm:$0xff] }
 0x276   :  { %v1879_v47 = vmax.f32 %v8245_v18, 1e-16  ;;  %v6840_v46 = vsel %vm396_vm0, %v1405_v16, 0.0  ;;  %3670 = vrsqrt.f32 %v1877_v42  ;;  %1593 = vadd.xlane.f32.xlu1 %v6595_v26  ;;  %v6845_v63 = vsub.s32 %v6680_v0, %v6721_v41  ;;  %8248 = vst [vmem:[#allocation213_spill] sm:$0xff] %v6851_v4  ;;  %v4246_v42 = vld [vmem:[%s7984_s1 + $0x390] sm:$0xff] }
 0x277   :  { %v2849_v56 = vadd.s32 4294967272, %v6680_v0  ;;  %v6849_v62 = vsel %vm396_vm0, %v1391_v29, 0.0  ;;  %3672 = vrsqrt.f32 %v1880_v35  ;;  %v1882_v18 = vmax.f32 %v8249_v43, 1e-16  ;;  %1590 = vadd.xlane.f32.xlu0 %v6598_v30  ;;  %v6855_v16 = vpop.xlane.xlu1 %1261  ;;  %v6861_v45 = vpop.eup %3648  ;;  %v8252_v29 = vld [vmem:[#allocation159_spill] sm:$0xff] }
 0x278   :  { %8246 = vst [vmem:[#allocation157_spill] sm:$0xff] %v6845_v63  ;;  %8247 = vst [vmem:[#allocation212_spill] sm:$0xff] %v6849_v62  ;;  %v2842_v26 = vadd.s32 4294967280, %v6680_v0  ;;  %v1407_v32 = vmul.f32 %v4246_v42, %v4246_v42  ;;  %v1881_v63 = vmax.f32 %v8252_v29, 1e-16  ;;  %v6864_v62 = vpop.xlane.xlu0 %1258  ;;  %v6867_v35 = vsel %vm396_vm0, %v1377_v55, 0.0 }
 0x279   :  { %8250 = vst [vmem:[#allocation158_spill] sm:$0xff] %v6855_v16  ;;  %8251 = vst [vmem:[#allocation214_spill] sm:$0xff] %v6861_v45  ;;  %v6870_v30 = vsel %vm396_vm0, %v1406_v13, 0.0  ;;  %v4247_v43 = vld [vmem:[%s7984_s1 + $0x318] sm:$0xff]  ;;  %v6875_v16 = vpop.eup %3650  ;;  %3674 = vrsqrt.f32 %v1879_v47  ;;  %v1884_v42 = vmax.f32 %v6240_v20, 1e-16  ;;  %v6885_v13 = vsub.s32 %v2849_v56, %v6721_v41 }
 0x27a   :  { %8253 = vst [vmem:[#allocation159_spill] sm:$0xff] %v6864_v62  ;;  %8254 = vst [vmem:[#allocation215_spill] sm:$0xff] %v6870_v30  ;;  %v1392_v4 = vmul.f32 %v4247_v43, %v4247_v43  ;;  %v2863_v29 = vadd.s32 4294967256, %v6680_v0  ;;  %v2856_v45 = vadd.s32 4294967264, %v6680_v0  ;;  %v6880_v62 = vpop.eup %3652  ;;  %v1883_v55 = vmax.f32 %v6247_v34, 1e-16  ;;  %1599 = vadd.xlane.f32.xlu1 %v6618_v19 }
 0x27b   :  { %8255 = vst [vmem:[#allocation216_spill] sm:$0xff] %v6875_v16  ;;  %8256 = vst [vmem:[#allocation217_spill] sm:$0xff] %v6880_v62  ;;  %v4248_v43 = vld [vmem:[%s7984_s1 + $0x320] sm:$0xff]  ;;  %v4249_v20 = vld [vmem:[%s7984_s1 + $0x2a8] sm:$0xff]  ;;  %v6893_v30 = vpop.eup %3654  ;;  %3676 = vrsqrt.f32 %v1882_v18  ;;  %v1886_v34 = vmax.f32 %v6256_v12, 1e-16  ;;  %1596 = vadd.xlane.f32.xlu0 %v6646_v53  ;;  %v6897_v19 = vpop.xlane.xlu1 %1267  ;;  %v6900_v56 = vsub.s32 %v2842_v26, %v6721_v41 }
 0x27c   :  { %8257 = vst [vmem:[#allocation218_spill] sm:$0xff] %v6885_v13  ;;  %v1393_v47 = vmul.f32 %v4248_v43, %v4248_v43  ;;  %v1378_v16 = vmul.f32 %v4249_v20, %v4249_v20  ;;  %8258 = vst [vmem:[#allocation219_spill] sm:$0xff] %v6893_v30  ;;  %v6903_v62 = vsel %vm396_vm0, %v1407_v32, 0.0  ;;  %v6905_v43 = vpop.eup %3656  ;;  %3678 = vrsqrt.f32 %v1881_v63  ;;  %v6908_v13 = vpop.xlane.xlu0 %1264 }
 0x27d   :  { %8259 = vst [vmem:[#allocation220_spill] sm:$0xff] %v6897_v19  ;;  %8260 = vst [vmem:[#allocation221_spill] sm:$0xff] %v6905_v43  ;;  %v1885_v20 = vmax.f32 %v6263_v10, 1e-16  ;;  %v2877_v18 = vadd.s32 4294967240, %v6680_v0  ;;  %v6912_v12 = vsel %vm396_vm0, %v1392_v4, 0.0  ;;  %v6914_v53 = vpop.eup %3658  ;;  %3680 = vrsqrt.f32 %v1884_v42 }
 0x27e   :  { %8261 = vst [vmem:[#allocation222_spill] sm:$0xff] %v6908_v13  ;;  %8262 = vst [vmem:[#allocation223_spill] sm:$0xff] %v6914_v53  ;;  %v1888_v26 = vmax.f32 %v6272_v24, 1e-16  ;;  %v6918_v32 = vsub.s32 %v2863_v29, %v6721_v41  ;;  %v6921_v43 = vsub.s32 %v2856_v45, %v6721_v41  ;;  %v6923_v63 = vpop.eup %3660  ;;  %3682 = vrsqrt.f32 %v1883_v55  ;;  %1605 = vadd.xlane.f32.xlu1 %v6649_v14 }
 0x27f   :  { %8263 = vst [vmem:[#allocation224_spill] sm:$0xff] %v6923_v63  ;;  %v1887_v10 = vmax.f32 %v6279_v58, 1e-16  ;;  %v6928_v4 = vsel %vm396_vm0, %v1393_v47, 0.0  ;;  %v6931_v42 = vsel %vm396_vm0, %v1378_v16, 0.0  ;;  %v6933_v24 = vpop.eup %3662  ;;  %3684 = vrsqrt.f32 %v1886_v34  ;;  %1602 = vadd.xlane.f32.xlu0 %v6657_v60  ;;  %v6937_v45 = vpop.xlane.xlu1 %1273  ;;  %v4250_v58 = vld [vmem:[%s7984_s1 + $0x2b0] sm:$0xff] }
 0x280   :  { %8264 = vst [vmem:[#allocation225_spill] sm:$0xff] %v6933_v24  ;;  %v1890_v29 = vmax.f32 %v6288_v48, 1e-16  ;;  %8265 = vst [vmem:[#allocation226_spill] sm:$0xff] %v6937_v45  ;;  %v2870_v55 = vadd.s32 4294967248, %v6680_v0  ;;  %v1379_v14 = vmul.f32 %v4250_v58, %v4250_v58  ;;  %v6943_v47 = vpop.eup %3664  ;;  %3686 = vrsqrt.f32 %v1885_v20  ;;  %v6946_v24 = vpop.xlane.xlu0 %1270  ;;  %v4251_v60 = vld [vmem:[%s7984_s1 + $0x398] sm:$0xff] }
 0x281   :  { %8266 = vst [vmem:[#allocation227_spill] sm:$0xff] %v6943_v47  ;;  %v1889_v16 = vmax.f32 %v6295_v39, 1e-16  ;;  %8267 = vst [vmem:[#allocation228_spill] sm:$0xff] %v6946_v24  ;;  %v6949_v48 = vsub.s32 %v2877_v18, %v6721_v41  ;;  %v1408_v34 = vmul.f32 %v4251_v60, %v4251_v60  ;;  %v6954_v63 = vpop.eup %3666  ;;  %3688 = vrsqrt.f32 %v1888_v26  ;;  %v4252_v60 = vld [vmem:[%s7984_s1 + $0x3a0] sm:$0xff]  ;;  %v8313_v24 = vld [vmem:[#allocation161_spill] sm:$0xff] }
 0x282   :  { %8268 = vst [vmem:[#allocation229_spill] sm:$0xff] %v6954_v63  ;;  %v1892_v58 = vmax.f32 %v6310_v5, 1e-16  ;;  %v2891_v47 = vadd.s32 4294967224, %v6680_v0  ;;  %v2884_v20 = vadd.s32 4294967232, %v6680_v0  ;;  %v6959_v39 = vpop.eup %3668  ;;  %3690 = vrsqrt.f32 %v1887_v10  ;;  %1611 = vadd.xlane.f32.xlu1 %v6665_v1  ;;  %v4253_v5 = vld [vmem:[%s7984_s1 + $0x328] sm:$0xff] }
 0x283   :  { %8269 = vst [vmem:[#allocation230_spill] sm:$0xff] %v6959_v39  ;;  %v1891_v18 = vmax.f32 %v6319_v36, 1e-16  ;;  %v1409_v53 = vmul.f32 %v4252_v60, %v4252_v60  ;;  %v1394_v26 = vmul.f32 %v4253_v5, %v4253_v5  ;;  %v6969_v63 = vpop.eup %3670  ;;  %3692 = vrsqrt.f32 %v1890_v29  ;;  %1608 = vadd.xlane.f32.xlu0 %v6668_v50  ;;  %v6973_v36 = vpop.xlane.xlu1 %1279 }
 0x284   :  { %8270 = vst [vmem:[#allocation231_spill] sm:$0xff] %v6969_v63  ;;  %v1894_v39 = vmax.f32 %v6334_v9, 1e-16  ;;  %8271 = vst [vmem:[#allocation232_spill] sm:$0xff] %v6973_v36  ;;  %v6976_v1 = vsub.s32 %v2870_v55, %v6721_v41  ;;  %v6979_v10 = vsel %vm396_vm0, %v1379_v14, 0.0  ;;  %v6981_v60 = vpop.eup %3672  ;;  %3694 = vrsqrt.f32 %v1889_v16  ;;  %v6984_v30 = vpop.xlane.xlu0 %1276 }
 0x285   :  { %8272 = vst [vmem:[#allocation233_spill] sm:$0xff] %v6981_v60  ;;  %v1893_v5 = vmax.f32 %v6343_v37, 1e-16  ;;  %8273 = vst [vmem:[#allocation234_spill] sm:$0xff] %v6984_v30  ;;  %v2905_v29 = vadd.s32 4294967208, %v6680_v0  ;;  %v6988_v9 = vsel %vm396_vm0, %v1408_v34, 0.0  ;;  %3696 = vrsqrt.f32 %v1892_v58 }
 0x286   :  { %v1896_v50 = vmax.f32 %v6358_v6, 1e-16  ;;  %v6992_v55 = vsub.s32 %v2891_v47, %v6721_v41  ;;  %v6995_v14 = vsub.s32 %v2884_v20, %v6721_v41  ;;  %v6997_v60 = vpop.eup %3674  ;;  %3698 = vrsqrt.f32 %v1891_v18  ;;  %1617 = vadd.xlane.f32.xlu1 %v6678_v38 }
 0x287   :  { %8274 = vst [vmem:[#allocation235_spill] sm:$0xff] %v6997_v60  ;;  %v1895_v37 = vmax.f32 %v6367_v54, 1e-16  ;;  %v7002_v16 = vsel %vm396_vm0, %v1409_v53, 0.0  ;;  %v7005_v34 = vsel %vm396_vm0, %v1394_v26, 0.0  ;;  %3700 = vrsqrt.f32 %v1894_v39  ;;  %1614 = vadd.xlane.f32.xlu0 %v6700_v23  ;;  %v7009_v47 = vpop.xlane.xlu1 %1285  ;;  %v4254_v54 = vld [vmem:[%s7984_s1 + $0x2b8] sm:$0xff] }
 0x288   :  { %v1898_v6 = vmax.f32 %v6382_v15, 1e-16  ;;  %8275 = vst [vmem:[#allocation236_spill] sm:$0xff] %v7009_v47  ;;  %v2898_v58 = vadd.s32 4294967216, %v6680_v0  ;;  %v1380_v38 = vmul.f32 %v4254_v54, %v4254_v54  ;;  %v7015_v20 = vpop.eup %3676  ;;  %3702 = vrsqrt.f32 %v1893_v5  ;;  %v7018_v18 = vpop.xlane.xlu0 %1282  ;;  %v4255_v23 = vld [vmem:[%s7984_s1 + $0x240] sm:$0xff] }
 0x289   :  { %8276 = vst [vmem:[#allocation237_spill] sm:$0xff] %v7015_v20  ;;  %v1897_v53 = vmax.f32 %v6391_v17, 1e-16  ;;  %8277 = vst [vmem:[#allocation238_spill] sm:$0xff] %v7018_v18  ;;  %v7021_v15 = vsub.s32 %v2905_v29, %v6721_v41  ;;  %v1365_v39 = vmul.f32 %v4255_v23, %v4255_v23  ;;  %v7026_v26 = vpop.eup %3678  ;;  %3704 = vrsqrt.f32 %v1896_v50  ;;  %v4256_v23 = vld [vmem:[%s7984_s1 + $0x3a8] sm:$0xff] }
 0x28a   :  { %8278 = vst [vmem:[#allocation239_spill] sm:$0xff] %v7026_v26  ;;  %v1900_v54 = vmax.f32 %v6418_v8, 1e-16  ;;  %v2919_v20 = vadd.s32 4294967192, %v6680_v0  ;;  %v2912_v5 = vadd.s32 4294967200, %v6680_v0  ;;  %v7031_v17 = vpop.eup %3680  ;;  %3706 = vrsqrt.f32 %v1895_v37  ;;  %1623 = vadd.xlane.f32.xlu1 %v6709_v44  ;;  %v4257_v8 = vld [vmem:[%s7984_s1 + $0x330] sm:$0xff] }
 0x28b   :  { %8279 = vst [vmem:[#allocation240_spill] sm:$0xff] %v7031_v17  ;;  %v1899_v29 = vmax.f32 %v6424_v31, 1e-16  ;;  %v1410_v60 = vmul.f32 %v4256_v23, %v4256_v23  ;;  %v1395_v50 = vmul.f32 %v4257_v8, %v4257_v8  ;;  %v7041_v26 = vpop.eup %3682  ;;  %3708 = vrsqrt.f32 %v1898_v6  ;;  %1620 = vadd.xlane.f32.xlu0 %v6731_v51  ;;  %v7045_v31 = vpop.xlane.xlu1 %1291 }
 0x28c   :  { %8280 = vst [vmem:[#allocation241_spill] sm:$0xff] %v7041_v26  ;;  %v1902_v17 = vmax.f32 %v6443_v59, 1e-16  ;;  %8281 = vst [vmem:[#allocation242_spill] sm:$0xff] %v7045_v31  ;;  %v7048_v44 = vsub.s32 %v2898_v58, %v6721_v41  ;;  %v2933_v37 = vadd.s32 4294967176, %v6680_v0  ;;  %v7051_v23 = vpop.eup %3684  ;;  %3710 = vrsqrt.f32 %v1897_v53  ;;  %v7054_v8 = vpop.xlane.xlu0 %1288 }
 0x28d   :  { %8282 = vst [vmem:[#allocation243_spill] sm:$0xff] %v7051_v23  ;;  %v1901_v63 = vmax.f32 %v6454_v2, 1e-16  ;;  %8283 = vst [vmem:[#allocation244_spill] sm:$0xff] %v7054_v8  ;;  %v7057_v6 = vsel %vm396_vm0, %v1380_v38, 0.0  ;;  %v7060_v59 = vsel %vm396_vm0, %v1365_v39, 0.0  ;;  %v7062_v51 = vpop.eup %3686  ;;  %3712 = vrsqrt.f32 %v1900_v54 }
 0x28e   :  { %8284 = vst [vmem:[#allocation245_spill] sm:$0xff] %v7062_v51  ;;  %v1904_v58 = vmax.f32 %v6483_v21, 1e-16  ;;  %v7066_v26 = vsub.s32 %v2919_v20, %v6721_v41  ;;  %v7069_v53 = vsub.s32 %v2912_v5, %v6721_v41  ;;  %v7071_v2 = vpop.eup %3688  ;;  %3714 = vrsqrt.f32 %v1899_v29  ;;  %1629 = vadd.xlane.f32.xlu1 %v6734_v61  ;;  %v4258_v61 = vld [vmem:[%s7984_s1 + $0x2c0] sm:$0xff] }
 0x28f   :  { %8285 = vst [vmem:[#allocation246_spill] sm:$0xff] %v7071_v2  ;;  %v2926_v38 = vadd.s32 4294967184, %v6680_v0  ;;  %v7076_v39 = vsel %vm396_vm0, %v1410_v60, 0.0  ;;  %v7079_v54 = vsel %vm396_vm0, %v1395_v50, 0.0  ;;  %v7081_v21 = vpop.eup %3690  ;;  %3716 = vrsqrt.f32 %v1902_v17  ;;  %1626 = vadd.xlane.f32.xlu0 %v6742_v25  ;;  %v1426_v20 = vpop.xlane.xlu1 %1425  ;;  %v4259_v60 = vld [vmem:[%s7984_s1 + $0x248] sm:$0xff] }
 0x290   :  { %8286 = vst [vmem:[#allocation247_spill] sm:$0xff] %v7081_v21  ;;  %v7085_v5 = vsub.s32 %v2933_v37, %v6721_v41  ;;  %v1381_v0 = vmul.f32 %v4258_v61, %v4258_v61  ;;  %v1366_v29 = vmul.f32 %v4259_v60, %v4259_v60  ;;  %v7093_v50 = vpop.eup %3692  ;;  %3718 = vrsqrt.f32 %v1901_v63  ;;  %v1423_v8 = vpop.xlane.xlu0 %1422  ;;  %v4260_v37 = vld [vmem:[%s7984_s1 + $0x3b0] sm:$0xff]  ;;  %v4261_v60 = vld [vmem:[%s7984_s1 + $0x338] sm:$0xff] }
 0x291   :  { %8287 = vst [vmem:[#allocation248_spill] sm:$0xff] %v7093_v50  ;;  %v1903_v17 = vmax.f32 %v6492_v7, 1e-16  ;;  %v2062_v25 = vmax.f32 %v1426_v20, 1e-16  ;;  %v1411_v31 = vmul.f32 %v4260_v37, %v4260_v37  ;;  %v7099_v2 = vpop.eup %3694  ;;  %3720 = vrsqrt.f32 %v1904_v58  ;;  %v4262_v58 = vld [vmem:[%s7984_s1 + $0x2c8] sm:$0xff] }
 0x292   :  { %8288 = vst [vmem:[#allocation249_spill] sm:$0xff] %v7099_v2  ;;  %v1906_v61 = vmax.f32 %v6521_v52, 1e-16  ;;  %v2061_v21 = vmax.f32 %v1423_v8, 1e-16  ;;  %v1396_v63 = vmul.f32 %v4261_v60, %v4261_v60  ;;  %v7105_v50 = vpop.eup %3696  ;;  %1635 = vadd.xlane.f32.xlu1 %v6751_v3  ;;  %v7109_v7 = vsub.s32 %v2926_v38, %v6721_v41  ;;  %v4263_v52 = vld [vmem:[%s7984_s1 + $0x250] sm:$0xff] }
 0x293   :  { %8289 = vst [vmem:[#allocation250_spill] sm:$0xff] %v7105_v50  ;;  %3722 = vrsqrt.f32 %v2062_v25  ;;  %v1382_v20 = vmul.f32 %v4262_v58, %v4262_v58  ;;  %v1367_v8 = vmul.f32 %v4263_v52, %v4263_v52  ;;  %v7117_v37 = vpop.eup %3698  ;;  %1632 = vadd.xlane.f32.xlu0 %v6754_v11  ;;  %v1432_v25 = vpop.xlane.xlu1 %1431  ;;  %v7121_v3 = vsel %vm396_vm0, %v1381_v0, 0.0  ;;  %v4264_v38 = vld [vmem:[%s7984_s1 + $0x3b8] sm:$0xff] }
 0x294   :  { %8290 = vst [vmem:[#allocation251_spill] sm:$0xff] %v7117_v37  ;;  %3724 = vrsqrt.f32 %v2061_v21  ;;  %v7124_v41 = vsel %vm396_vm0, %v1366_v29, 0.0  ;;  %v1412_v60 = vmul.f32 %v4264_v38, %v4264_v38  ;;  %v7129_v58 = vpop.eup %3700  ;;  %v1905_v52 = vmax.f32 %v6532_v22, 1e-16  ;;  %v1429_v50 = vpop.xlane.xlu0 %1428 }
 0x295   :  { %8291 = vst [vmem:[#allocation252_spill] sm:$0xff] %v7129_v58  ;;  %3726 = vrsqrt.f32 %v1903_v17  ;;  %v2064_v21 = vmax.f32 %v1432_v25, 1e-16  ;;  %v7133_v11 = vsel %vm396_vm0, %v1411_v31, 0.0  ;;  %v7135_v0 = vpop.eup %3702  ;;  %v1908_v29 = vmax.f32 %v6562_v40, 1e-16 }
 0x296   :  { %8292 = vst [vmem:[#allocation253_spill] sm:$0xff] %v7135_v0  ;;  %3728 = vrsqrt.f32 %v1906_v61  ;;  %v2063_v37 = vmax.f32 %v1429_v50, 1e-16  ;;  %v7139_v2 = vsel %vm396_vm0, %v1396_v63, 0.0  ;;  %v7141_v38 = vpop.eup %3704  ;;  %v8294_v17 = vld [vmem:[#allocation207_spill] sm:$0xff]  ;;  %v7145_v22 = vsel %vm396_vm0, %v1382_v20, 0.0 }
 0x297   :  { %8293 = vst [vmem:[#allocation254_spill] sm:$0xff] %v7141_v38  ;;  %3730 = vrsqrt.f32 %v2064_v21  ;;  %1665 = vadd.xlane.f32.xlu1 %v8294_v17  ;;  %v7148_v31 = vsel %vm396_vm0, %v1367_v8, 0.0  ;;  %v4265_v61 = vld [vmem:[%s7984_s1 + $0x340] sm:$0xff]  ;;  %v7153_v50 = vpop.eup %3706  ;;  %1662 = vadd.xlane.f32.xlu0 %v6803_v27  ;;  %v1438_v63 = vpop.xlane.xlu1 %1437  ;;  %v7157_v25 = vsel %vm396_vm0, %v1412_v60, 0.0  ;;  %v4266_v20 = vld [vmem:[%s7984_s1 + $0x2d0] sm:$0xff]  ;;  %v4267_v21 = vld [vmem:[%s7984_s1 + $0x258] sm:$0xff] }
 0x298   :  { %v1397_v40 = vmul.f32 %v4265_v61, %v4265_v61  ;;  %8295 = vst [vmem:[#allocation207_spill] sm:$0xff] %v7153_v50  ;;  %3732 = vrsqrt.f32 %v2063_v37  ;;  %v1383_v8 = vmul.f32 %v4266_v20, %v4266_v20  ;;  %v1368_v17 = vmul.f32 %v4267_v21, %v4267_v21  ;;  %v7165_v61 = vpop.eup %3708  ;;  %v8297_v37 = vld [vmem:[#allocation134_spill] sm:$0xff]  ;;  %v1435_v50 = vpop.xlane.xlu0 %1434  ;;  %v4268_v60 = vld [vmem:[%s7984_s1 + $0x3c0] sm:$0xff]  ;;  %v8299_v20 = vld [vmem:[#allocation137_spill] sm:$0xff] }
 0x299   :  { %8296 = vst [vmem:[#allocation255_spill] sm:$0xff] %v7165_v61  ;;  %3734 = vrsqrt.f32 %v1905_v52  ;;  %v1907_v38 = vmax.f32 %v8297_v37, 1e-16  ;;  %v2066_v27 = vmax.f32 %v1438_v63, 1e-16  ;;  %v1413_v58 = vmul.f32 %v4268_v60, %v4268_v60  ;;  %v7171_v0 = vpop.eup %3710  ;;  %v4269_v21 = vld [vmem:[%s7984_s1 + $0x348] sm:$0xff] }
 0x29a   :  { %8298 = vst [vmem:[#allocation134_spill] sm:$0xff] %v7171_v0  ;;  %3736 = vrsqrt.f32 %v1908_v29  ;;  %v1910_v18 = vmax.f32 %v8299_v20, 1e-16  ;;  %v2065_v51 = vmax.f32 %v1435_v50, 1e-16  ;;  %v1398_v52 = vmul.f32 %v4269_v21, %v4269_v21  ;;  %v7177_v61 = vpop.eup %3712  ;;  %v4270_v29 = vld [vmem:[%s7984_s1 + $0x2d8] sm:$0xff] }
 0x29b   :  { %8300 = vst [vmem:[#allocation137_spill] sm:$0xff] %v7177_v61  ;;  %3738 = vrsqrt.f32 %v2066_v27  ;;  %1710 = vadd.xlane.f32.xlu1 %v6815_v33  ;;  %v7181_v63 = vsel %vm396_vm0, %v1397_v40, 0.0  ;;  %v1384_v37 = vmul.f32 %v4270_v29, %v4270_v29  ;;  %v4271_v50 = vld [vmem:[%s7984_s1 + $0x260] sm:$0xff]  ;;  %v7189_v20 = vpop.eup %3714  ;;  %1668 = vadd.xlane.f32.xlu0 %v6818_v57  ;;  %v1444_v27 = vpop.xlane.xlu1 %1443  ;;  %v7193_v33 = vsel %vm396_vm0, %v1383_v8, 0.0  ;;  %v4272_v21 = vld [vmem:[%s7984_s1 + $0x3c8] sm:$0xff] }
 0x29c   :  { %v1369_v60 = vmul.f32 %v4271_v50, %v4271_v50  ;;  %8301 = vst [vmem:[#allocation256_spill] sm:$0xff] %v7189_v20  ;;  %3740 = vrsqrt.f32 %v2065_v51  ;;  %v7196_v40 = vsel %vm396_vm0, %v1368_v17, 0.0  ;;  %v1414_v29 = vmul.f32 %v4272_v21, %v4272_v21  ;;  %v7201_v61 = vpop.eup %3716  ;;  %v8303_v50 = vld [vmem:[#allocation138_spill] sm:$0xff]  ;;  %v1441_v0 = vpop.xlane.xlu0 %1440  ;;  %v8305_v17 = vld [vmem:[#allocation141_spill] sm:$0xff] }
 0x29d   :  { %8302 = vst [vmem:[#allocation257_spill] sm:$0xff] %v7201_v61  ;;  %3742 = vrsqrt.f32 %v1907_v38  ;;  %v1909_v20 = vmax.f32 %v8303_v50, 1e-16  ;;  %v2068_v51 = vmax.f32 %v1444_v27, 1e-16  ;;  %v7205_v57 = vsel %vm396_vm0, %v1413_v58, 0.0  ;;  %v7207_v8 = vpop.eup %3718 }
 0x29e   :  { %8304 = vst [vmem:[#allocation138_spill] sm:$0xff] %v7207_v8  ;;  %3744 = vrsqrt.f32 %v1910_v18  ;;  %v1912_v23 = vmax.f32 %v8305_v17, 1e-16  ;;  %v2067_v47 = vmax.f32 %v1441_v0, 1e-16  ;;  %v7211_v30 = vsel %vm396_vm0, %v1398_v52, 0.0  ;;  %v7213_v21 = vpop.eup %3720 }
 0x29f   :  { %8306 = vst [vmem:[#allocation141_spill] sm:$0xff] %v7213_v21  ;;  %3746 = vrsqrt.f32 %v2068_v51  ;;  %1671 = vadd.xlane.f32.xlu1 %v6825_v28  ;;  %v7217_v38 = vsel %vm396_vm0, %v1384_v37, 0.0  ;;  %v7220_v58 = vsel %vm396_vm0, %v1369_v60, 0.0  ;;  %v4273_v18 = vld [vmem:[%s7984_s1 + $0x350] sm:$0xff]  ;;  %1713 = vadd.xlane.f32.xlu0 %v6837_v49  ;;  %v1450_v52 = vpop.xlane.xlu1 %1449  ;;  %v7227_v50 = vsel %vm396_vm0, %v1414_v29, 0.0  ;;  %v4274_v28 = vld [vmem:[%s7984_s1 + $0x2e0] sm:$0xff] }
 0x2a0   :  { %8307 = vst [vmem:[#allocation258_spill] sm:$0xff] %v7217_v38  ;;  %8308 = vst [vmem:[#allocation259_spill] sm:$0xff] %v7220_v58  ;;  %v1399_v0 = vmul.f32 %v4273_v18, %v4273_v18  ;;  %v3723_v27 = vpop.eup %3722  ;;  %3748 = vrsqrt.f32 %v2067_v47  ;;  %v1385_v37 = vmul.f32 %v4274_v28, %v4274_v28  ;;  %v4275_v60 = vld [vmem:[%s7984_s1 + $0x268] sm:$0xff]  ;;  %v8310_v18 = vld [vmem:[#allocation160_spill] sm:$0xff]  ;;  %v2070_v21 = vmax.f32 %v1450_v52, 1e-16  ;;  %v1447_v49 = vpop.xlane.xlu0 %1446 }
 0x2a1   :  { %8309 = vst [vmem:[#allocation260_spill] sm:$0xff] %v7227_v50  ;;  %v1370_v51 = vmul.f32 %v4275_v60, %v4275_v60  ;;  %v3725_v17 = vpop.eup %3724  ;;  %3750 = vrsqrt.f32 %v1909_v20  ;;  %v2318_v47 = vmul.f32 %v3723_v27, %v8310_v18  ;;  %v4276_v29 = vld [vmem:[%s7984_s1 + $0x3d0] sm:$0xff]  ;;  %v2069_v13 = vmax.f32 %v1447_v49, 1e-16  ;;  %v8315_v20 = vld [vmem:[#allocation8_spill] sm:$0xff] }
 0x2a2   :  { %v1415_v61 = vmul.f32 %v4276_v29, %v4276_v29  ;;  %v7239_v8 = vpop.eup %3726  ;;  %3752 = vrsqrt.f32 %v1912_v23  ;;  %v8312_v28 = vld [vmem:[#allocation142_spill] sm:$0xff]  ;;  %v2317_v45 = vmul.f32 %v3725_v17, %v8313_v24  ;;  %v7248_v27 = vsel %vm396_vm0, %v1399_v0, 0.0  ;;  %v4277_v23 = vld [vmem:[%s7984_s1 + $0x358] sm:$0xff]  ;;  %v8318_v17 = vld [vmem:[#allocation212_spill] sm:$0xff] }
 0x2a3   :  { %8311 = vst [vmem:[#allocation160_spill] sm:$0xff] %v7239_v8  ;;  %v1911_v36 = vmax.f32 %v8312_v28, 1e-16  ;;  %v7243_v60 = vpop.eup %3728  ;;  %v2446_v19 = vmul.f32 %v2318_v47, %v8315_v20  ;;  %3754 = vrsqrt.f32 %v2070_v21  ;;  %1758 = vadd.xlane.f32.xlu1 %v6840_v46  ;;  %8316 = vst [vmem:[#allocation161_spill] sm:$0xff] %v7248_v27  ;;  %v1400_v52 = vmul.f32 %v4277_v23, %v4277_v23  ;;  %v8317_v29 = vld [vmem:[#allocation6_spill] sm:$0xff]  ;;  %v1456_v47 = vpop.xlane.xlu1 %1455  ;;  %v8327_v27 = vld [vmem:[#allocation7_spill] sm:$0xff] }
 0x2a4   :  { %8314 = vst [vmem:[#allocation142_spill] sm:$0xff] %v7243_v60  ;;  %v3731_v18 = vpop.eup %3730  ;;  %v2445_v24 = vmul.f32 %v2317_v45, %v8317_v29  ;;  %3756 = vrsqrt.f32 %v2069_v13  ;;  %1716 = vadd.xlane.f32.xlu0 %v8318_v17  ;;  %v7256_v21 = vsel %vm396_vm0, %v1385_v37, 0.0  ;;  %v7259_v46 = vsel %vm396_vm0, %v1370_v51, 0.0  ;;  %v8321_v28 = vld [vmem:[#allocation162_spill] sm:$0xff]  ;;  %v1453_v23 = vpop.xlane.xlu0 %1452  ;;  %v8324_v29 = vld [vmem:[#allocation163_spill] sm:$0xff] }
 0x2a5   :  { %8319 = vst [vmem:[#allocation8_spill] sm:$0xff] %v7256_v21  ;;  %8320 = vst [vmem:[#allocation6_spill] sm:$0xff] %v7259_v46  ;;  %v3733_v0 = vpop.eup %3732  ;;  %v2574_v49 = vsub.f32 1.0, %v2446_v19  ;;  %v2320_v20 = vmul.f32 %v3731_v18, %v8321_v28  ;;  %v2072_v60 = vmax.f32 %v1456_v47, 1e-16  ;;  %v7263_v8 = vsel %vm396_vm0, %v1415_v61, 0.0 }
 0x2a6   :  { %8322 = vst [vmem:[#allocation212_spill] sm:$0xff] %v7263_v8  ;;  %v7265_v45 = vpop.eup %3734  ;;  %3758 = vrsqrt.f32 %v1911_v36  ;;  %v2573_v13 = vsub.f32 1.0, %v2445_v24  ;;  %v2319_v17 = vmul.f32 %v3733_v0, %v8324_v29  ;;  %v2071_v37 = vmax.f32 %v1453_v23, 1e-16  ;;  %v8326_v51 = vld [vmem:[#allocation151_spill] sm:$0xff]  ;;  %v8329_v47 = vld [vmem:[#allocation144_spill] sm:$0xff] }
 0x2a7   :  { %8323 = vst [vmem:[#allocation162_spill] sm:$0xff] %v7265_v45  ;;  %v7268_v21 = vpop.eup %3736  ;;  %v2839_v46 = vrot.slane %v2574_v49, %v8326_v51  ;;  %v2448_v19 = vmul.f32 %v2320_v20, %v8327_v27  ;;  %3760 = vrsqrt.f32 %v2072_v60  ;;  %1674 = vadd.xlane.f32.xlu1 %v6867_v35  ;;  %v7274_v61 = vsel %vm396_vm0, %v1400_v52, 0.0  ;;  %v8330_v24 = vld [vmem:[#allocation157_spill] sm:$0xff]  ;;  %v8332_v29 = vld [vmem:[#allocation215_spill] sm:$0xff]  ;;  %v1462_v49 = vpop.xlane.xlu1 %1461  ;;  %v8333_v60 = vld [vmem:[#allocation164_spill] sm:$0xff] }
 0x2a8   :  { %8325 = vst [vmem:[#allocation163_spill] sm:$0xff] %v7268_v21  ;;  %8328 = vst [vmem:[#allocation151_spill] sm:$0xff] %v7274_v61  ;;  %v3739_v18 = vpop.eup %3738  ;;  %v1914_v36 = vmax.f32 %v8329_v47, 1e-16  ;;  %v2834_v28 = vrot.slane %v2573_v13, %v8330_v24  ;;  %v8331_v0 = vld [vmem:[#allocation5_spill] sm:$0xff]  ;;  %3762 = vrsqrt.f32 %v2071_v37  ;;  %1761 = vadd.xlane.f32.xlu0 %v8332_v29  ;;  %v1459_v45 = vpop.xlane.xlu0 %1458 }
 0x2a9   :  { %v2447_v23 = vmul.f32 %v2319_v17, %v8331_v0  ;;  %v3741_v27 = vpop.eup %3740  ;;  %v2576_v20 = vsub.f32 1.0, %v2448_v19  ;;  %v2322_v21 = vmul.f32 %v3739_v18, %v8333_v60  ;;  %v2074_v35 = vmax.f32 %v1462_v49, 1e-16  ;;  %v4278_v52 = vld [vmem:[%s7984_s1 + $0x2e8] sm:$0xff]  ;;  %v8337_v19 = vld [vmem:[#allocation218_spill] sm:$0xff] }
 0x2aa   :  { %v1386_v47 = vmul.f32 %v4278_v52, %v4278_v52  ;;  %v7284_v61 = vpop.eup %3742  ;;  %v2841_v13 = vsel %vm2840_vm1, %v2839_v46, %v2834_v28  ;;  %v8335_v37 = vld [vmem:[#allocation165_spill] sm:$0xff]  ;;  %v2073_v29 = vmax.f32 %v1459_v45, 1e-16  ;;  %v4279_v60 = vld [vmem:[%s7984_s1 + $0x270] sm:$0xff] }
 0x2ab   :  { %8334 = vst [vmem:[#allocation7_spill] sm:$0xff] %v7284_v61  ;;  %v2575_v17 = vsub.f32 1.0, %v2447_v23  ;;  %v2321_v0 = vmul.f32 %v3741_v27, %v8335_v37  ;;  %v7288_v8 = vpop.eup %3744  ;;  %v2853_v50 = vrot.slane %v2576_v20, %v8337_v19  ;;  %v8338_v18 = vld [vmem:[#allocation9_spill] sm:$0xff]  ;;  %3764 = vrsqrt.f32 %v2074_v35  ;;  %1764 = vadd.xlane.f32.xlu1 %v6903_v62  ;;  %v8340_v27 = vld [vmem:[#allocation10_spill] sm:$0xff] }
 0x2ac   :  { %8336 = vst [vmem:[#allocation144_spill] sm:$0xff] %v7288_v8  ;;  %v2450_v49 = vmul.f32 %v2322_v21, %v8338_v18  ;;  %v1371_v52 = vmul.f32 %v4279_v60, %v4279_v60  ;;  %v3747_v46 = vpop.eup %3746  ;;  %v8339_v28 = vld [vmem:[#allocation145_spill] sm:$0xff]  ;;  %3766 = vrsqrt.f32 %v2073_v29  ;;  %1719 = vadd.xlane.f32.xlu0 %v6912_v12  ;;  %v1468_v21 = vpop.xlane.xlu1 %1467  ;;  %v8341_v35 = vld [vmem:[#allocation166_spill] sm:$0xff] }
 0x2ad   :  { %v1913_v23 = vmax.f32 %v8339_v28, 1e-16  ;;  %v2846_v45 = vrot.slane %v2575_v17, %v6900_v56  ;;  %v2449_v37 = vmul.f32 %v2321_v0, %v8340_v27  ;;  %v3749_v20 = vpop.eup %3748  ;;  %3768 = vrsqrt.f32 %v1914_v36  ;;  %v1465_v61 = vpop.xlane.xlu0 %1464  ;;  %v8342_v17 = vld [vmem:[#allocation167_spill] sm:$0xff] }
 0x2ae   :  { %v2578_v62 = vsub.f32 1.0, %v2450_v49  ;;  %v2324_v18 = vmul.f32 %v3747_v46, %v8341_v35  ;;  %v2076_v8 = vmax.f32 %v1468_v21, 1e-16  ;;  %v7301_v60 = vpop.eup %3750  ;;  %v2323_v38 = vmul.f32 %v3749_v20, %v8342_v17  ;;  %v8343_v36 = vld [vmem:[#allocation11_spill] sm:$0xff] }
 0x2af   :  { %v2848_v28 = vsel %vm2847_vm2, %v2846_v45, %v2841_v13  ;;  %v2577_v58 = vsub.f32 1.0, %v2449_v37  ;;  %v2075_v0 = vmax.f32 %v1465_v61, 1e-16  ;;  %v7305_v27 = vpop.eup %3752  ;;  %1722 = vadd.xlane.f32.xlu1 %v6928_v4  ;;  %v8344_v13 = vld [vmem:[#allocation12_spill] sm:$0xff]  ;;  %v7315_v37 = vsel %vm396_vm0, %v1386_v47, 0.0 }
 0x2b0   :  { %v2867_v12 = vrot.slane %v2578_v62, %v6918_v32  ;;  %v2855_v29 = vsel %vm2854_vm3, %v2853_v50, %v2848_v28  ;;  %v2452_v49 = vmul.f32 %v2324_v18, %v8343_v36  ;;  %3770 = vrsqrt.f32 %v2076_v8  ;;  %v3755_v46 = vpop.eup %3754  ;;  %1677 = vadd.xlane.f32.xlu0 %v6931_v42  ;;  %v1474_v61 = vpop.xlane.xlu1 %1473  ;;  %v8345_v62 = vld [vmem:[#allocation168_spill] sm:$0xff]  ;;  %v8346_v28 = vld [vmem:[#allocation169_spill] sm:$0xff] }
 0x2b1   :  { %v2860_v21 = vrot.slane %v2577_v58, %v6921_v43  ;;  %v2451_v45 = vmul.f32 %v2323_v38, %v8344_v13  ;;  %3772 = vrsqrt.f32 %v2075_v0  ;;  %v3757_v50 = vpop.eup %3756  ;;  %v2326_v8 = vmul.f32 %v3755_v46, %v8345_v62  ;;  %v1471_v4 = vpop.xlane.xlu0 %1470  ;;  %v8347_v36 = vld [vmem:[#allocation13_spill] sm:$0xff]  ;;  %v8350_v62 = vld [vmem:[#allocation170_spill] sm:$0xff] }
 0x2b2   :  { %3774 = vrsqrt.f32 %v1913_v23  ;;  %v2580_v20 = vsub.f32 1.0, %v2452_v49  ;;  %v2078_v35 = vmax.f32 %v1474_v61, 1e-16  ;;  %v2325_v38 = vmul.f32 %v3757_v50, %v8346_v28  ;;  %v8349_v61 = vld [vmem:[#allocation148_spill] sm:$0xff] }
 0x2b3   :  { %v2862_v18 = vsel %vm2861_vm4, %v2860_v21, %v2855_v29  ;;  %v2579_v58 = vsub.f32 1.0, %v2451_v45  ;;  %v2077_v17 = vmax.f32 %v1471_v4, 1e-16  ;;  %v7320_v0 = vpop.eup %3758  ;;  %v2454_v13 = vmul.f32 %v2326_v8, %v8347_v36  ;;  %1680 = vadd.xlane.f32.xlu1 %v6979_v10  ;;  %v8348_v29 = vld [vmem:[#allocation14_spill] sm:$0xff] }
 0x2b4   :  { %v2881_v42 = vrot.slane %v2580_v20, %v6949_v48  ;;  %v2869_v47 = vsel %vm2868_vm5, %v2867_v12, %v2862_v18  ;;  %3776 = vrsqrt.f32 %v2078_v35  ;;  %v3761_v23 = vpop.eup %3760  ;;  %v2453_v46 = vmul.f32 %v2325_v38, %v8348_v29  ;;  %1767 = vadd.xlane.f32.xlu0 %v6988_v9  ;;  %v1480_v21 = vpop.xlane.xlu1 %1479  ;;  %v8353_v29 = vld [vmem:[#allocation16_spill] sm:$0xff] }
 0x2b5   :  { %v2874_v49 = vrot.slane %v2579_v58, %v6976_v1  ;;  %3778 = vrsqrt.f32 %v2077_v17  ;;  %v7330_v45 = vsel %vm396_vm0, %v1371_v52, 0.0  ;;  %v3763_v12 = vpop.eup %3762  ;;  %v1916_v50 = vmax.f32 %v8349_v61, 1e-16  ;;  %v1477_v35 = vpop.xlane.xlu0 %1476  ;;  %v8351_v58 = vld [vmem:[#allocation171_spill] sm:$0xff]  ;;  %v8354_v61 = vld [vmem:[#allocation172_spill] sm:$0xff] }
 0x2b6   :  { %v2582_v20 = vsub.f32 1.0, %v2454_v13  ;;  %v2328_v8 = vmul.f32 %v3761_v23, %v8350_v62  ;;  %v2080_v10 = vmax.f32 %v1480_v21, 1e-16  ;;  %v2581_v18 = vsub.f32 1.0, %v2453_v46  ;;  %v8352_v17 = vld [vmem:[#allocation15_spill] sm:$0xff] }
 0x2b7   :  { %v2876_v4 = vsel %vm2875_vm6, %v2874_v49, %v2869_v47  ;;  %v2327_v28 = vmul.f32 %v3763_v12, %v8351_v58  ;;  %v2079_v38 = vmax.f32 %v1477_v35, 1e-16  ;;  %1770 = vadd.xlane.f32.xlu1 %v7002_v16  ;;  %v4280_v49 = vld [vmem:[%s7984_s1 + $0x3d8] sm:$0xff] }
 0x2b8   :  { %v2895_v9 = vrot.slane %v2582_v20, %v6992_v55  ;;  %v2883_v52 = vsel %vm2882_vm7, %v2881_v42, %v2876_v4  ;;  %v2456_v36 = vmul.f32 %v2328_v8, %v8352_v17  ;;  %3780 = vrsqrt.f32 %v2080_v10  ;;  %v3765_v13 = vpop.eup %3764  ;;  %1725 = vadd.xlane.f32.xlu0 %v7005_v34  ;;  %v1486_v47 = vpop.xlane.xlu1 %1485  ;;  %v4281_v8 = vld [vmem:[%s7984_s1 + $0x360] sm:$0xff] }
 0x2b9   :  { %v2888_v23 = vrot.slane %v2581_v18, %v6995_v14  ;;  %v2455_v21 = vmul.f32 %v2327_v28, %v8353_v29  ;;  %3782 = vrsqrt.f32 %v2079_v38  ;;  %v1416_v42 = vmul.f32 %v4280_v49, %v4280_v49  ;;  %v3767_v46 = vpop.eup %3766  ;;  %v1483_v62 = vpop.xlane.xlu0 %1482  ;;  %v8355_v18 = vld [vmem:[#allocation173_spill] sm:$0xff] }
 0x2ba   :  { %v2584_v12 = vsub.f32 1.0, %v2456_v36  ;;  %v2330_v16 = vmul.f32 %v3765_v13, %v8354_v61  ;;  %v2082_v20 = vmax.f32 %v1486_v47, 1e-16  ;;  %v7350_v10 = vmul.f32 %v4281_v8, %v4281_v8  ;;  %v7352_v34 = vpop.eup %3768  ;;  %v8356_v36 = vld [vmem:[#allocation17_spill] sm:$0xff] }
 0x2bb   :  { %v2890_v35 = vsel %vm2889_vm8, %v2888_v23, %v2883_v52  ;;  %v2583_v4 = vsub.f32 1.0, %v2455_v21  ;;  %v2329_v58 = vmul.f32 %v3767_v46, %v8355_v18  ;;  %v2081_v28 = vmax.f32 %v1483_v62, 1e-16  ;;  %1683 = vadd.xlane.f32.xlu1 %v7057_v6  ;;  %v8357_v47 = vld [vmem:[#allocation149_spill] sm:$0xff]  ;;  %v8358_v52 = vld [vmem:[#allocation18_spill] sm:$0xff] }
 0x2bc   :  { %v2909_v38 = vrot.slane %v2584_v12, %v7021_v15  ;;  %v2897_v17 = vsel %vm7989_vm9, %v2895_v9, %v2890_v35  ;;  %v2458_v13 = vmul.f32 %v2330_v16, %v8356_v36  ;;  %3784 = vrsqrt.f32 %v2082_v20  ;;  %1638 = vadd.xlane.f32.xlu0 %v7060_v59  ;;  %v1492_v21 = vpop.xlane.xlu1 %1491  ;;  %v8359_v12 = vld [vmem:[#allocation174_spill] sm:$0xff]  ;;  %v8361_v59 = vld [vmem:[#allocation19_spill] sm:$0xff] }
 0x2bd   :  { %v3771_v29 = vpop.eup %3770  ;;  %v1915_v49 = vmax.f32 %v8357_v47, 1e-16  ;;  %v2902_v61 = vrot.slane %v2583_v4, %v7048_v44  ;;  %v2457_v23 = vmul.f32 %v2329_v58, %v8358_v52  ;;  %3786 = vrsqrt.f32 %v2081_v28  ;;  %v1489_v6 = vpop.xlane.xlu0 %1488  ;;  %v8360_v4 = vld [vmem:[#allocation175_spill] sm:$0xff]  ;;  %v8362_v47 = vld [vmem:[#allocation20_spill] sm:$0xff] }
 0x2be   :  { %v3773_v46 = vpop.eup %3772  ;;  %3788 = vrsqrt.f32 %v1916_v50  ;;  %v2586_v9 = vsub.f32 1.0, %v2458_v13  ;;  %v2332_v16 = vmul.f32 %v3771_v29, %v8359_v12  ;;  %v2084_v20 = vmax.f32 %v1492_v21, 1e-16 }
 0x2bf   :  { %v7365_v62 = vpop.eup %3774  ;;  %v2904_v8 = vsel %vm2903_vm10, %v2902_v61, %v2897_v17  ;;  %v2585_v35 = vsub.f32 1.0, %v2457_v23  ;;  %v2331_v18 = vmul.f32 %v3773_v46, %v8360_v4  ;;  %v2083_v58 = vmax.f32 %v1489_v6, 1e-16  ;;  %1773 = vadd.xlane.f32.xlu1 %v7076_v39  ;;  %v8363_v46 = vld [vmem:[#allocation176_spill] sm:$0xff] }
 0x2c0   :  { %v2923_v28 = vrot.slane %v2586_v9, %v7066_v26  ;;  %v2460_v36 = vmul.f32 %v2332_v16, %v8361_v59  ;;  %3790 = vrsqrt.f32 %v2084_v20  ;;  %v2911_v50 = vsel %vm2910_vm11, %v2909_v38, %v2904_v8  ;;  %1728 = vadd.xlane.f32.xlu0 %v7079_v54  ;;  %v1498_v17 = vpop.xlane.xlu1 %1497  ;;  %v8364_v16 = vld [vmem:[#allocation177_spill] sm:$0xff] }
 0x2c1   :  { %v3777_v13 = vpop.eup %3776  ;;  %v2916_v29 = vrot.slane %v2585_v35, %v7069_v53  ;;  %v2459_v52 = vmul.f32 %v2331_v18, %v8362_v47  ;;  %3792 = vrsqrt.f32 %v2083_v58  ;;  %v7377_v61 = vsel %vm396_vm0, %v1416_v42, 0.0  ;;  %v1495_v12 = vpop.xlane.xlu0 %1494  ;;  %v8365_v54 = vld [vmem:[#allocation21_spill] sm:$0xff]  ;;  %v8366_v58 = vld [vmem:[#allocation22_spill] sm:$0xff] }
 0x2c2   :  { %v3779_v23 = vpop.eup %3778  ;;  %3794 = vrsqrt.f32 %v1915_v49  ;;  %v2588_v21 = vsub.f32 1.0, %v2460_v36  ;;  %v2334_v9 = vmul.f32 %v3777_v13, %v8363_v46  ;;  %v2086_v39 = vmax.f32 %v1498_v17, 1e-16  ;;  %v8369_v46 = vld [vmem:[#allocation179_spill] sm:$0xff] }
 0x2c3   :  { %v2587_v38 = vsub.f32 1.0, %v2459_v52  ;;  %v2333_v20 = vmul.f32 %v3779_v23, %v8364_v16  ;;  %v2085_v6 = vmax.f32 %v1495_v12, 1e-16  ;;  %v2918_v8 = vsel %vm2917_vm12, %v2916_v29, %v2911_v50  ;;  %1686 = vadd.xlane.f32.xlu1 %v7121_v3  ;;  %v8367_v29 = vld [vmem:[#allocation152_spill] sm:$0xff]  ;;  %v8368_v3 = vld [vmem:[#allocation178_spill] sm:$0xff] }
 0x2c4   :  { %v2937_v35 = vrot.slane %v2588_v21, %v7085_v5  ;;  %v2462_v4 = vmul.f32 %v2334_v9, %v8365_v54  ;;  %3796 = vrsqrt.f32 %v2086_v39  ;;  %v2925_v42 = vsel %vm2924_vm13, %v2923_v28, %v2918_v8  ;;  %1641 = vadd.xlane.f32.xlu0 %v7124_v41  ;;  %v1504_v36 = vpop.xlane.xlu1 %1503  ;;  %v8371_v8 = vld [vmem:[#allocation24_spill] sm:$0xff] }
 0x2c5   :  { %v3781_v49 = vpop.eup %3780  ;;  %v2930_v18 = vrot.slane %v2587_v38, %v7109_v7  ;;  %v2461_v59 = vmul.f32 %v2333_v20, %v8366_v58  ;;  %3798 = vrsqrt.f32 %v2085_v6  ;;  %v7391_v50 = vsel %vm396_vm0, %v7350_v10, 0.0  ;;  %v1501_v23 = vpop.xlane.xlu0 %1500  ;;  %v8370_v38 = vld [vmem:[#allocation23_spill] sm:$0xff]  ;;  %v8372_v58 = vld [vmem:[#allocation180_spill] sm:$0xff] }
 0x2c6   :  { %v3783_v13 = vpop.eup %3782  ;;  %v1918_v47 = vmax.f32 %v8367_v29, 1e-16  ;;  %v2590_v52 = vsub.f32 1.0, %v2462_v4  ;;  %v2336_v17 = vmul.f32 %v3781_v49, %v8368_v3  ;;  %v2088_v28 = vmax.f32 %v1504_v36, 1e-16  ;;  %v8373_v3 = vld [vmem:[#allocation181_spill] sm:$0xff] }
 0x2c7   :  { %v2589_v21 = vsub.f32 1.0, %v2461_v59  ;;  %v2335_v9 = vmul.f32 %v3783_v13, %v8369_v46  ;;  %v2087_v39 = vmax.f32 %v1501_v23, 1e-16  ;;  %v2932_v12 = vsel %vm2931_vm14, %v2930_v18, %v2925_v42  ;;  %1776 = vadd.xlane.f32.xlu1 %v7133_v11  ;;  %v4282_v42 = vld [vmem:[%s7984_s1 + $0x2f0] sm:$0xff]  ;;  %v8374_v23 = vld [vmem:[#allocation25_spill] sm:$0xff] }
 0x2c8   :  { %v2947_v41 = vrot.slane %v2590_v52, %v8326_v51  ;;  %v2464_v16 = vmul.f32 %v2336_v17, %v8370_v38  ;;  %3800 = vrsqrt.f32 %v2088_v28  ;;  %v7401_v10 = vsel %vm2938_vm15, %v2937_v35, %v2932_v12  ;;  %1731 = vadd.xlane.f32.xlu0 %v7139_v2  ;;  %v1510_v4 = vpop.xlane.xlu1 %1509  ;;  %v8376_v38 = vld [vmem:[#allocation26_spill] sm:$0xff] }
 0x2c9   :  { %v3785_v20 = vpop.eup %3784  ;;  %v2943_v6 = vrot.slane %v2589_v21, %v8330_v24  ;;  %v2463_v54 = vmul.f32 %v2335_v9, %v8371_v8  ;;  %3802 = vrsqrt.f32 %v2087_v39  ;;  %v1387_v49 = vmul.f32 %v4282_v42, %v4282_v42  ;;  %v1507_v36 = vpop.xlane.xlu0 %1506  ;;  %v8375_v39 = vld [vmem:[#allocation153_spill] sm:$0xff] }
 0x2ca   :  { %v3787_v18 = vpop.eup %3786  ;;  %3804 = vrsqrt.f32 %v1918_v47  ;;  %v2592_v11 = vsub.f32 1.0, %v2464_v16  ;;  %v2338_v35 = vmul.f32 %v3785_v20, %v8372_v58  ;;  %v2090_v59 = vmax.f32 %v1510_v4, 1e-16  ;;  %v4283_v47 = vld [vmem:[%s7984_s1 + $0x278] sm:$0xff] }
 0x2cb   :  { %v7410_v13 = vpop.eup %3788  ;;  %v2948_v29 = vsel %vm2840_vm1, %v2947_v41, %v2943_v6  ;;  %v2591_v52 = vsub.f32 1.0, %v2463_v54  ;;  %v2337_v2 = vmul.f32 %v3787_v18, %v8373_v3  ;;  %v2089_v17 = vmax.f32 %v1507_v36, 1e-16  ;;  %1689 = vadd.xlane.f32.xlu1 %v7145_v22  ;;  %v8377_v54 = vld [vmem:[#allocation182_spill] sm:$0xff] }
 0x2cc   :  { %v2957_v28 = vrot.slane %v2592_v11, %v8337_v19  ;;  %v2466_v21 = vmul.f32 %v2338_v35, %v8374_v23  ;;  %3806 = vrsqrt.f32 %v2090_v59  ;;  %v1372_v46 = vmul.f32 %v4283_v47, %v4283_v47  ;;  %1644 = vadd.xlane.f32.xlu0 %v7148_v31  ;;  %v1516_v20 = vpop.xlane.xlu1 %1515  ;;  %v8378_v59 = vld [vmem:[#allocation183_spill] sm:$0xff] }
 0x2cd   :  { %v3791_v9 = vpop.eup %3790  ;;  %v1917_v12 = vmax.f32 %v8375_v39, 1e-16  ;;  %v2952_v41 = vrot.slane %v2591_v52, %v6900_v56  ;;  %v2465_v16 = vmul.f32 %v2337_v2, %v8376_v38  ;;  %3808 = vrsqrt.f32 %v2089_v17  ;;  %v1513_v42 = vpop.xlane.xlu0 %1512  ;;  %v8379_v2 = vld [vmem:[#allocation27_spill] sm:$0xff] }
 0x2ce   :  { %v3793_v6 = vpop.eup %3792  ;;  %v2594_v8 = vsub.f32 1.0, %v2466_v21  ;;  %v2340_v22 = vmul.f32 %v3791_v9, %v8377_v54  ;;  %v2092_v4 = vmax.f32 %v1516_v20, 1e-16  ;;  %v7426_v18 = vsel %vm396_vm0, %v1387_v49, 0.0  ;;  %v8380_v21 = vld [vmem:[#allocation28_spill] sm:$0xff] }
 0x2cf   :  { %v7428_v11 = vpop.eup %3794  ;;  %v2953_v58 = vsel %vm2847_vm2, %v2952_v41, %v2948_v29  ;;  %v2593_v35 = vsub.f32 1.0, %v2465_v16  ;;  %v2339_v36 = vmul.f32 %v3793_v6, %v8378_v59  ;;  %v2091_v52 = vmax.f32 %v1513_v42, 1e-16  ;;  %1779 = vadd.xlane.f32.xlu1 %v7157_v25  ;;  %v8381_v41 = vld [vmem:[#allocation184_spill] sm:$0xff]  ;;  %v8383_v42 = vld [vmem:[#allocation29_spill] sm:$0xff] }
 0x2d0   :  { %v2967_v31 = vrot.slane %v2594_v8, %v6918_v32  ;;  %v2958_v3 = vsel %vm2854_vm3, %v2957_v28, %v2953_v58  ;;  %v2468_v17 = vmul.f32 %v2340_v22, %v8379_v2  ;;  %3810 = vrsqrt.f32 %v2092_v4  ;;  %1734 = vadd.xlane.f32.xlu0 %v7181_v63  ;;  %v1522_v29 = vpop.xlane.xlu1 %1521  ;;  %v8382_v8 = vld [vmem:[#allocation185_spill] sm:$0xff]  ;;  %v8384_v58 = vld [vmem:[#allocation156_spill] sm:$0xff] }
 0x2d1   :  { %v3797_v23 = vpop.eup %3796  ;;  %v2962_v49 = vrot.slane %v2593_v35, %v6921_v43  ;;  %v2467_v47 = vmul.f32 %v2339_v36, %v8380_v21  ;;  %3812 = vrsqrt.f32 %v2091_v52  ;;  %v7440_v9 = vsel %vm396_vm0, %v1372_v46, 0.0  ;;  %v1519_v20 = vpop.xlane.xlu0 %1518  ;;  %v8385_v36 = vld [vmem:[#allocation30_spill] sm:$0xff] }
 0x2d2   :  { %v3799_v39 = vpop.eup %3798  ;;  %3814 = vrsqrt.f32 %v1917_v12  ;;  %v2596_v28 = vsub.f32 1.0, %v2468_v17  ;;  %v2342_v38 = vmul.f32 %v3797_v23, %v8381_v41  ;;  %v2094_v16 = vmax.f32 %v1522_v29, 1e-16  ;;  %v8386_v23 = vld [vmem:[#allocation186_spill] sm:$0xff]  ;;  %v8387_v41 = vld [vmem:[#allocation187_spill] sm:$0xff] }
 0x2d3   :  { %v2963_v25 = vsel %vm2861_vm4, %v2962_v49, %v2958_v3  ;;  %v2595_v6 = vsub.f32 1.0, %v2467_v47  ;;  %v2341_v54 = vmul.f32 %v3799_v39, %v8382_v8  ;;  %v2093_v22 = vmax.f32 %v1519_v20, 1e-16  ;;  %1692 = vadd.xlane.f32.xlu1 %v7193_v33  ;;  %v4284_v33 = vld [vmem:[%s7984_s1 + $0x3e0] sm:$0xff] }
 0x2d4   :  { %v2977_v4 = vrot.slane %v2596_v28, %v6949_v48  ;;  %v2968_v63 = vsel %vm2868_vm5, %v2967_v31, %v2963_v25  ;;  %v2470_v46 = vmul.f32 %v2342_v38, %v8383_v42  ;;  %3816 = vrsqrt.f32 %v2094_v16  ;;  %1647 = vadd.xlane.f32.xlu0 %v7196_v40  ;;  %v1528_v3 = vpop.xlane.xlu1 %1527  ;;  %v8388_v25 = vld [vmem:[#allocation31_spill] sm:$0xff] }
 0x2d5   :  { %v3801_v12 = vpop.eup %3800  ;;  %v1920_v35 = vmax.f32 %v8384_v58, 1e-16  ;;  %v2972_v59 = vrot.slane %v2595_v6, %v6976_v1  ;;  %v2469_v52 = vmul.f32 %v2341_v54, %v8385_v36  ;;  %3818 = vrsqrt.f32 %v2093_v22  ;;  %v1525_v21 = vpop.xlane.xlu0 %1524  ;;  %v8389_v22 = vld [vmem:[#allocation32_spill] sm:$0xff] }
 0x2d6   :  { %v3803_v2 = vpop.eup %3802  ;;  %v2598_v17 = vsub.f32 1.0, %v2470_v46  ;;  %v2344_v31 = vmul.f32 %v3801_v12, %v8386_v23  ;;  %v2096_v49 = vmax.f32 %v1528_v3, 1e-16  ;;  %v1417_v47 = vmul.f32 %v4284_v33, %v4284_v33  ;;  %v4285_v46 = vld [vmem:[%s7984_s1 + $0x368] sm:$0xff] }
 0x2d7   :  { %v7457_v29 = vpop.eup %3804  ;;  %v2973_v39 = vsel %vm2875_vm6, %v2972_v59, %v2968_v63  ;;  %v2597_v28 = vsub.f32 1.0, %v2469_v52  ;;  %v2343_v38 = vmul.f32 %v3803_v2, %v8387_v41  ;;  %v2095_v40 = vmax.f32 %v1525_v21, 1e-16  ;;  %1782 = vadd.xlane.f32.xlu1 %v7205_v57  ;;  %v8390_v59 = vld [vmem:[#allocation188_spill] sm:$0xff]  ;;  %v8392_v21 = vld [vmem:[#allocation33_spill] sm:$0xff] }
 0x2d8   :  { %v2987_v16 = vrot.slane %v2598_v17, %v6992_v55  ;;  %v2978_v20 = vsel %vm2882_vm7, %v2977_v4, %v2973_v39  ;;  %v2472_v6 = vmul.f32 %v2344_v31, %v8388_v25  ;;  %3820 = vrsqrt.f32 %v2096_v49  ;;  %1737 = vadd.xlane.f32.xlu0 %v7211_v30  ;;  %v1534_v63 = vpop.xlane.xlu1 %1533  ;;  %v8391_v17 = vld [vmem:[#allocation189_spill] sm:$0xff]  ;;  %v8393_v39 = vld [vmem:[#allocation258_spill] sm:$0xff]  ;;  %v8396_v25 = vld [vmem:[#allocation259_spill] sm:$0xff] }
 0x2d9   :  { %v3807_v8 = vpop.eup %3806  ;;  %v2982_v54 = vrot.slane %v2597_v28, %v6995_v14  ;;  %v2471_v42 = vmul.f32 %v2343_v38, %v8389_v22  ;;  %3822 = vrsqrt.f32 %v2095_v40  ;;  %v1402_v12 = vmul.f32 %v4285_v46, %v4285_v46  ;;  %v1531_v52 = vpop.xlane.xlu0 %1530  ;;  %v8394_v28 = vld [vmem:[#allocation210_spill] sm:$0xff] }
 0x2da   :  { %v3809_v4 = vpop.eup %3808  ;;  %3824 = vrsqrt.f32 %v1920_v35  ;;  %v2600_v58 = vsub.f32 1.0, %v2472_v6  ;;  %v2346_v36 = vmul.f32 %v3807_v8, %v8390_v59  ;;  %v2098_v57 = vmax.f32 %v1534_v63, 1e-16  ;;  %v8395_v40 = vld [vmem:[#allocation34_spill] sm:$0xff] }
 0x2db   :  { %v2983_v3 = vsel %vm2889_vm8, %v2982_v54, %v2978_v20  ;;  %v2599_v2 = vsub.f32 1.0, %v2471_v42  ;;  %v2345_v23 = vmul.f32 %v3809_v4, %v8391_v17  ;;  %v2097_v31 = vmax.f32 %v1531_v52, 1e-16  ;;  %1695 = vadd.xlane.f32.xlu1 %v8393_v39  ;;  %v8397_v22 = vld [vmem:[#allocation190_spill] sm:$0xff] }
 0x2dc   :  { %v2997_v30 = vrot.slane %v2600_v58, %v7021_v15  ;;  %v2988_v49 = vsel %vm7989_vm9, %v2987_v16, %v2983_v3  ;;  %v2474_v33 = vmul.f32 %v2346_v36, %v8392_v21  ;;  %3826 = vrsqrt.f32 %v2098_v57  ;;  %1650 = vadd.xlane.f32.xlu0 %v8396_v25  ;;  %v1540_v6 = vpop.xlane.xlu1 %1539  ;;  %v8398_v36 = vld [vmem:[#allocation191_spill] sm:$0xff] }
 0x2dd   :  { %v3811_v35 = vpop.eup %3810  ;;  %v1919_v41 = vmax.f32 %v8394_v28, 1e-16  ;;  %v2992_v38 = vrot.slane %v2599_v2, %v7048_v44  ;;  %v2473_v20 = vmul.f32 %v2345_v23, %v8395_v40  ;;  %3828 = vrsqrt.f32 %v2097_v31  ;;  %v1537_v63 = vpop.xlane.xlu0 %1536  ;;  %v8399_v2 = vld [vmem:[#allocation35_spill] sm:$0xff]  ;;  %v8400_v23 = vld [vmem:[#allocation260_spill] sm:$0xff] }
 0x2de   :  { %v3813_v8 = vpop.eup %3812  ;;  %v2602_v54 = vsub.f32 1.0, %v2474_v33  ;;  %v2348_v16 = vmul.f32 %v3811_v35, %v8397_v22  ;;  %v2100_v42 = vmax.f32 %v1540_v6, 1e-16  ;;  %v7484_v46 = vsel %vm396_vm0, %v1417_v47, 0.0  ;;  %v8401_v33 = vld [vmem:[#allocation36_spill] sm:$0xff] }
 0x2df   :  { %vm3493_vm9 = vcmask 1041409   ;;  %v7486_v4 = vpop.eup %3814  ;;  %v2993_v58 = vsel %vm2903_vm10, %v2992_v38, %v2988_v49  ;;  %v2601_v59 = vsub.f32 1.0, %v2473_v20  ;;  %v2347_v57 = vmul.f32 %v3813_v8, %v8398_v36  ;;  %1785 = vadd.xlane.f32.xlu1 %v8400_v23  ;;  %v8402_v49 = vld [vmem:[#allocation161_spill] sm:$0xff]  ;;  %v8403_v20 = vld [vmem:[#allocation192_spill] sm:$0xff] }
 0x2e0   :  { %v2099_v52 = vmax.f32 %v1537_v63, 1e-16  ;;  %v3007_v3 = vrot.slane %v2602_v54, %v7066_v26  ;;  %v2476_v17 = vmul.f32 %v2348_v16, %v8399_v2  ;;  %3830 = vrsqrt.f32 %v2100_v42  ;;  %1740 = vadd.xlane.f32.xlu0 %v8402_v49  ;;  %v1546_v35 = vpop.xlane.xlu1 %1545  ;;  %v8404_v54 = vld [vmem:[#allocation193_spill] sm:$0xff] }
 0x2e1   :  { %v2998_v31 = vsel %vm2910_vm11, %v2997_v30, %v2993_v58  ;;  %v3817_v47 = vpop.eup %3816  ;;  %v3002_v21 = vrot.slane %v2601_v59, %v7069_v53  ;;  %v2475_v39 = vmul.f32 %v2347_v57, %v8401_v33  ;;  %v7498_v28 = vsel %vm396_vm0, %v1402_v12, 0.0  ;;  %v1543_v8 = vpop.xlane.xlu0 %1542  ;;  %v8405_v58 = vld [vmem:[#allocation37_spill] sm:$0xff]  ;;  %v8406_v12 = vld [vmem:[#allocation8_spill] sm:$0xff]  ;;  %v8407_v57 = vld [vmem:[#allocation158_spill] sm:$0xff] }
 0x2e2   :  { %3832 = vrsqrt.f32 %v2099_v52  ;;  %v3819_v38 = vpop.eup %3818  ;;  %v2604_v40 = vsub.f32 1.0, %v2476_v17  ;;  %v2350_v25 = vmul.f32 %v3817_v47, %v8403_v20  ;;  %v2102_v6 = vmax.f32 %v1546_v35, 1e-16  ;;  %v8408_v17 = vld [vmem:[#allocation38_spill] sm:$0xff] }
 0x2e3   :  { %3834 = vrsqrt.f32 %v1919_v41  ;;  %v2603_v30 = vsub.f32 1.0, %v2475_v39  ;;  %v2349_v22 = vmul.f32 %v3819_v38, %v8404_v54  ;;  %v2101_v16 = vmax.f32 %v1543_v8, 1e-16  ;;  %1698 = vadd.xlane.f32.xlu1 %v8406_v12  ;;  %v8409_v47 = vld [vmem:[#allocation6_spill] sm:$0xff] }
 0x2e4   :  { %v3003_v42 = vsel %vm2917_vm12, %v3002_v21, %v2998_v31  ;;  %v3017_v63 = vrot.slane %v2604_v40, %v7085_v5  ;;  %v2478_v59 = vmul.f32 %v2350_v25, %v8405_v58  ;;  %3836 = vrsqrt.f32 %v2102_v6  ;;  %1653 = vadd.xlane.f32.xlu0 %v8409_v47  ;;  %v1552_v31 = vpop.xlane.xlu1 %1551  ;;  %v8410_v39 = vld [vmem:[#allocation194_spill] sm:$0xff]  ;;  %v8411_v6 = vld [vmem:[#allocation133_spill] sm:$0xff]  ;;  %v8413_v58 = vld [vmem:[#allocation212_spill] sm:$0xff] }
 0x2e5   :  { %v3008_v41 = vsel %vm2924_vm13, %v3007_v3, %v3003_v42  ;;  %v3821_v36 = vpop.eup %3820  ;;  %v1922_v52 = vmax.f32 %v8407_v57, 1e-16  ;;  %v3012_v2 = vrot.slane %v2603_v30, %v7109_v7  ;;  %v2477_v23 = vmul.f32 %v2349_v22, %v8408_v17  ;;  %v1549_v38 = vpop.xlane.xlu0 %1548  ;;  %v4286_v3 = vld [vmem:[%s7984_s1 + $0x370] sm:$0xff]  ;;  %v8414_v57 = vld [vmem:[#allocation40_spill] sm:$0xff] }
 0x2e6   :  { %3838 = vrsqrt.f32 %v2101_v16  ;;  %v3823_v21 = vpop.eup %3822  ;;  %v2606_v33 = vsub.f32 1.0, %v2478_v59  ;;  %v2352_v49 = vmul.f32 %v3821_v36, %v8410_v39  ;;  %v2104_v35 = vmax.f32 %v1552_v31, 1e-16  ;;  %v8412_v16 = vld [vmem:[#allocation39_spill] sm:$0xff] }
 0x2e7   :  { %v1403_v40 = vmul.f32 %v4286_v3, %v4286_v3  ;;  %v7515_v20 = vpop.eup %3824  ;;  %v2605_v25 = vsub.f32 1.0, %v2477_v23  ;;  %v2351_v8 = vmul.f32 %v3823_v21, %v8411_v6  ;;  %v2103_v30 = vmax.f32 %v1549_v38, 1e-16  ;;  %1788 = vadd.xlane.f32.xlu1 %v8413_v58  ;;  %v8415_v23 = vld [vmem:[#allocation151_spill] sm:$0xff]  ;;  %v8420_v58 = vld [vmem:[#allocation42_spill] sm:$0xff] }
 0x2e8   :  { %v3013_v54 = vsel %vm2931_vm14, %v3012_v2, %v3008_v41  ;;  %v3026_v22 = vrot.slane %v2606_v33, %v8326_v51  ;;  %v2480_v42 = vmul.f32 %v2352_v49, %v8412_v16  ;;  %3840 = vrsqrt.f32 %v2104_v35  ;;  %1743 = vadd.xlane.f32.xlu0 %v8415_v23  ;;  %v1558_v47 = vpop.xlane.xlu1 %1557  ;;  %v8416_v21 = vld [vmem:[#allocation195_spill] sm:$0xff] }
 0x2e9   :  { %v3018_v59 = vsel %vm2938_vm15, %v3017_v63, %v3013_v54  ;;  %v3827_v12 = vpop.eup %3826  ;;  %v3022_v36 = vrot.slane %v2605_v25, %v8330_v24  ;;  %v2479_v17 = vmul.f32 %v2351_v8, %v8414_v57  ;;  %3842 = vrsqrt.f32 %v2103_v30  ;;  %v1555_v63 = vpop.xlane.xlu0 %1554  ;;  %v8417_v38 = vld [vmem:[#allocation135_spill] sm:$0xff]  ;;  %v8418_v8 = vld [vmem:[#allocation41_spill] sm:$0xff] }
 0x2ea   :  { %v7528_v41 = vsel %vm3493_vm9, %v3018_v59, %v7401_v10  ;;  %v3829_v2 = vpop.eup %3828  ;;  %3844 = vrsqrt.f32 %v1922_v52  ;;  %v2608_v31 = vsub.f32 1.0, %v2480_v42  ;;  %v2354_v33 = vmul.f32 %v3827_v12, %v8416_v21  ;;  %v4287_v10 = vld [vmem:[%s7984_s1 + $0x2f8] sm:$0xff] }
 0x2eb   :  { %v2106_v39 = vmax.f32 %v1558_v47, 1e-16  ;;  %v3027_v49 = vsel %vm2840_vm1, %v3026_v22, %v3022_v36  ;;  %v2607_v35 = vsub.f32 1.0, %v2479_v17  ;;  %v2353_v3 = vmul.f32 %v3829_v2, %v8417_v38  ;;  %1701 = vadd.xlane.f32.xlu1 %v7315_v37  ;;  %v8419_v16 = vld [vmem:[#allocation159_spill] sm:$0xff]  ;;  %v8421_v17 = vld [vmem:[#allocation136_spill] sm:$0xff] }
 0x2ec   :  { %v2105_v25 = vmax.f32 %v1555_v63, 1e-16  ;;  %v3036_v6 = vrot.slane %v2608_v31, %v8337_v19  ;;  %v2482_v30 = vmul.f32 %v2354_v33, %v8418_v8  ;;  %v1388_v52 = vmul.f32 %v4287_v10, %v4287_v10  ;;  %1656 = vadd.xlane.f32.xlu0 %v7330_v45  ;;  %v1564_v12 = vpop.xlane.xlu1 %1563 }
 0x2ed   :  { %3846 = vrsqrt.f32 %v2106_v39  ;;  %v3831_v54 = vpop.eup %3830  ;;  %v1921_v42 = vmax.f32 %v8419_v16, 1e-16  ;;  %v3031_v22 = vrot.slane %v2607_v35, %v6900_v56  ;;  %v2481_v59 = vmul.f32 %v2353_v3, %v8420_v58  ;;  %v1561_v47 = vpop.xlane.xlu0 %1560  ;;  %v8422_v39 = vld [vmem:[#allocation196_spill] sm:$0xff]  ;;  %v8423_v3 = vld [vmem:[#allocation43_spill] sm:$0xff] }
 0x2ee   :  { %3848 = vrsqrt.f32 %v2105_v25  ;;  %v2610_v57 = vsub.f32 1.0, %v2482_v30  ;;  %v2356_v37 = vmul.f32 %v3831_v54, %v8421_v17  ;;  %v2108_v23 = vmax.f32 %v1564_v12, 1e-16  ;;  %v8424_v30 = vld [vmem:[#allocation44_spill] sm:$0xff] }
 0x2ef   :  { %v3833_v36 = vpop.eup %3832  ;;  %v7545_v2 = vsel %vm396_vm0, %v1403_v40, 0.0  ;;  %v3032_v21 = vsel %vm2847_vm2, %v3031_v22, %v3027_v49  ;;  %v2609_v33 = vsub.f32 1.0, %v2481_v59  ;;  %v2107_v35 = vmax.f32 %v1561_v47, 1e-16  ;;  %1791 = vadd.xlane.f32.xlu1 %v7377_v61  ;;  %v8425_v22 = vld [vmem:[#allocation197_spill] sm:$0xff] }
 0x2f0   :  { %v7547_v31 = vpop.eup %3834  ;;  %v2355_v63 = vmul.f32 %v3833_v36, %v8422_v39  ;;  %v3046_v45 = vrot.slane %v2610_v57, %v6918_v32  ;;  %v3037_v38 = vsel %vm2854_vm3, %v3036_v6, %v3032_v21  ;;  %v2484_v25 = vmul.f32 %v2356_v37, %v8423_v3  ;;  %1746 = vadd.xlane.f32.xlu0 %v7391_v50  ;;  %v1570_v49 = vpop.xlane.xlu1 %1569  ;;  %v8426_v57 = vld [vmem:[#allocation139_spill] sm:$0xff]  ;;  %v8427_v47 = vld [vmem:[#allocation45_spill] sm:$0xff] }
 0x2f1   :  { %3850 = vrsqrt.f32 %v2108_v23  ;;  %v3837_v8 = vpop.eup %3836  ;;  %v3041_v40 = vrot.slane %v2609_v33, %v6921_v43  ;;  %v7559_v54 = vsel %vm396_vm0, %v1388_v52, 0.0  ;;  %v2110_v59 = vmax.f32 %v1570_v49, 1e-16  ;;  %v1567_v12 = vpop.xlane.xlu0 %1566  ;;  %v8428_v33 = vld [vmem:[#allocation46_spill] sm:$0xff] }
 0x2f2   :  { %v2483_v10 = vmul.f32 %v2355_v63, %v8424_v30  ;;  %3852 = vrsqrt.f32 %v2107_v35  ;;  %v2612_v6 = vsub.f32 1.0, %v2484_v25  ;;  %v2358_v58 = vmul.f32 %v3837_v8, %v8425_v22  ;;  %v4288_v35 = vld [vmem:[%s7984_s1 + $0x378] sm:$0xff]  ;;  %v8429_v25 = vld [vmem:[#allocation140_spill] sm:$0xff]  ;;  %v4289_v30 = vld [vmem:[%s7984_s1 + $0x3e8] sm:$0xff] }
 0x2f3   :  { %v3839_v16 = vpop.eup %3838  ;;  %3854 = vrsqrt.f32 %v1921_v42  ;;  %v3042_v61 = vsel %vm2861_vm4, %v3041_v40, %v3037_v38  ;;  %v2109_v37 = vmax.f32 %v1567_v12, 1e-16  ;;  %1704 = vadd.xlane.f32.xlu1 %v7426_v18  ;;  %v1404_v38 = vmul.f32 %v4288_v35, %v4288_v35 }
 0x2f4   :  { %v2611_v36 = vsub.f32 1.0, %v2483_v10  ;;  %v2357_v17 = vmul.f32 %v3839_v16, %v8426_v57  ;;  %v3056_v23 = vrot.slane %v2612_v6, %v6949_v48  ;;  %v3047_v50 = vsel %vm2868_vm5, %v3046_v45, %v3042_v61  ;;  %1659 = vadd.xlane.f32.xlu0 %v7440_v9  ;;  %v1576_v63 = vpop.xlane.xlu1 %1575  ;;  %v8430_v6 = vld [vmem:[#allocation198_spill] sm:$0xff]  ;;  %v8431_v61 = vld [vmem:[#allocation47_spill] sm:$0xff] }
 0x2f5   :  { %v2486_v52 = vmul.f32 %v2358_v58, %v8427_v47  ;;  %3856 = vrsqrt.f32 %v2110_v59  ;;  %v3841_v42 = vpop.eup %3840  ;;  %v2112_v40 = vmax.f32 %v1576_v63, 1e-16  ;;  %v1573_v18 = vpop.xlane.xlu0 %1572  ;;  %v1418_v10 = vmul.f32 %v4289_v30, %v4289_v30 }
 0x2f6   :  { %v3051_v21 = vrot.slane %v2611_v36, %v6976_v1  ;;  %v2485_v39 = vmul.f32 %v2357_v17, %v8428_v33  ;;  %3858 = vrsqrt.f32 %v2109_v37  ;;  %v3843_v45 = vpop.eup %3842  ;;  %v2360_v8 = vmul.f32 %v3841_v42, %v8429_v25  ;;  %v8432_v37 = vld [vmem:[#allocation48_spill] sm:$0xff]  ;;  %v8433_v33 = vld [vmem:[#allocation199_spill] sm:$0xff] }
 0x2f7   :  { %v2614_v3 = vsub.f32 1.0, %v2486_v52  ;;  %v7578_v49 = vpop.eup %3844  ;;  %v2359_v22 = vmul.f32 %v3843_v45, %v8430_v6  ;;  %v2111_v58 = vmax.f32 %v1573_v18, 1e-16  ;;  %3860 = vrsqrt.f32 %v2112_v40  ;;  %1794 = vadd.xlane.f32.xlu1 %v7484_v46  ;;  %v8436_v18 = vld [vmem:[#allocation49_spill] sm:$0xff] }
 0x2f8   :  { %v3052_v9 = vsel %vm2875_vm6, %v3051_v21, %v3047_v50  ;;  %v2613_v16 = vsub.f32 1.0, %v2485_v39  ;;  %v2488_v36 = vmul.f32 %v2360_v8, %v8431_v61  ;;  %1749 = vadd.xlane.f32.xlu0 %v7498_v28  ;;  %v1582_v50 = vpop.xlane.xlu1 %1581  ;;  %v1754_v52 = vsel %vm396_vm0, %v1404_v38, 0.0  ;;  %v8438_v61 = vld [vmem:[#allocation143_spill] sm:$0xff] }
 0x2f9   :  { %v3066_v59 = vrot.slane %v2614_v3, %v6992_v55  ;;  %v3057_v12 = vsel %vm2882_vm7, %v3056_v23, %v3052_v9  ;;  %v2487_v47 = vmul.f32 %v2359_v22, %v8432_v37  ;;  %3862 = vrsqrt.f32 %v2111_v58  ;;  %v1579_v63 = vpop.xlane.xlu0 %1578  ;;  %v8434_v3 = vld [vmem:[#allocation200_spill] sm:$0xff]  ;;  %v4290_v22 = vld [vmem:[%s7984_s1 + $0x3f8] sm:$0xff] }
 0x2fa   :  { %v3847_v57 = vpop.eup %3846  ;;  %v3061_v17 = vrot.slane %v2613_v16, %v6995_v14  ;;  %v2616_v21 = vsub.f32 1.0, %v2488_v36  ;;  %v2114_v39 = vmax.f32 %v1582_v50, 1e-16  ;;  %v1796_v35 = vsel %vm396_vm0, %v1418_v10, 0.0  ;;  %v8437_v16 = vld [vmem:[#allocation50_spill] sm:$0xff] }
 0x2fb   :  { %v3849_v42 = vpop.eup %3848  ;;  %v2362_v23 = vmul.f32 %v3847_v57, %v8433_v33  ;;  %v2615_v45 = vsub.f32 1.0, %v2487_v47  ;;  %v2113_v8 = vmax.f32 %v1579_v63, 1e-16  ;;  %vm8435_vm9 = vcmask 654912   ;;  %1752 = vadd.xlane.f32.xlu1 %v7545_v2 }
 0x2fc   :  { %v3062_v46 = vsel %vm2889_vm8, %v3061_v17, %v3057_v12  ;;  %v2361_v25 = vmul.f32 %v3849_v42, %v8434_v3  ;;  %v3076_v40 = vrot.slane %v2616_v21, %v7021_v15  ;;  %3864 = vrsqrt.f32 %v2114_v39  ;;  %1707 = vadd.xlane.f32.xlu0 %v7559_v54  ;;  %v1588_v6 = vpop.xlane.xlu1 %1587  ;;  %v4291_v17 = vld [vmem:[%s7984_s1 + $0x3f0] sm:$0xff]  ;;  %v8439_v42 = vld [vmem:[#allocation201_spill] sm:$0xff]  ;;  %v8440_v39 = vld [vmem:[#allocation51_spill] sm:$0xff]  ;;  %s4314_s1 = smov [#allocation2]  }
 0x2fd   :  { %v3067_v28 = vsel %vm8435_vm9, %v3066_v59, %v3062_v46  ;;  %v2490_v38 = vmul.f32 %v2362_v23, %v8436_v18  ;;  %v3071_v9 = vrot.slane %v2615_v45, %v7048_v44  ;;  %3866 = vrsqrt.f32 %v2113_v8  ;;  %v1585_v2 = vpop.xlane.xlu0 %1584  ;;  %s3515_s16 = sshll.u32 %s4314_s1, 4  ;;  %s3516_s16 = int_to_ptr.vmem [resolvable:$true] %s3515_s16 }
 0x2fe   :  { %v3851_v30 = vpop.eup %3850  ;;  %v2489_v10 = vmul.f32 %v2361_v25, %v8437_v16  ;;  %v1420_v58 = vmul.f32 %v4290_v22, %v4290_v22  ;;  %v2116_v57 = vmax.f32 %v1588_v6, 1e-16  ;;  %v1419_v37 = vmul.f32 %v4291_v17, %v4291_v17  ;;  %v8441_v25 = vld [vmem:[#allocation52_spill] sm:$0xff]  ;;  %s4292_s17 = scalar_lea.vmem %s3516_s16, 128  ;;  %p4297_p1 = scmp.lt.s32.totalorder %s3516_s16, %s3516_s16 }
 0x2ff   :  { %v3853_v59 = vpop.eup %3852  ;;  %v2618_v12 = vsub.f32 1.0, %v2490_v38  ;;  %v2364_v36 = vmul.f32 %v3851_v30, %v8438_v61  ;;  %v3072_v54 = vsel %vm2903_vm10, %v3071_v9, %v3067_v28  ;;  %v2115_v33 = vmax.f32 %v1585_v2, 1e-16  ;;  %1755 = vadd.xlane.f32.xlu1 %v1754_v52  ;;  %v8442_v9 = vld [vmem:[#allocation202_spill] sm:$0xff]  ;;  %p4293_p0 = scmp.ne.s32.totalorder %s3516_s16, %s4292_s17  ;;  %p4298_p2 = scmp.lt.s32.totalorder %s4292_s17, %s4292_s17 }
 0x300   :  { %v7608_v47 = vpop.eup %3854  ;;  %v2617_v50 = vsub.f32 1.0, %v2489_v10  ;;  %v2363_v21 = vmul.f32 %v3853_v59, %v8439_v42  ;;  %3868 = vrsqrt.f32 %v2116_v57  ;;  %v3077_v46 = vsel %vm2910_vm11, %v3076_v40, %v3072_v54  ;;  %1797 = vadd.xlane.f32.xlu0 %v1796_v35  ;;  %v1594_v28 = vpop.xlane.xlu1 %1593  ;;  %v8443_v40 = vld [vmem:[#allocation146_spill] sm:$0xff]  ;;  %v8444_v35 = vld [vmem:[#allocation53_spill] sm:$0xff] }
 0x301   :  { %v3086_v23 = vrot.slane %v2618_v12, %v7066_v26  ;;  %v2492_v63 = vmul.f32 %v2364_v36, %v8440_v39  ;;  %3870 = vrsqrt.f32 %v2115_v33  ;;  %v1802_v18 = vsel %vm396_vm0, %v1420_v58, 0.0  ;;  %v1591_v6 = vpop.xlane.xlu0 %1590  ;;  %v8445_v54 = vld [vmem:[#allocation54_spill] sm:$0xff]  ;;  %v8446_v33 = vld [vmem:[#allocation147_spill] sm:$0xff]  ;;  %p4299_p3 = por %p4298_p2, %p4297_p1 }
 0x302   :  { %v3857_v45 = vpop.eup %3856  ;;  %v3081_v3 = vrot.slane %v2617_v50, %v7069_v53  ;;  %v2491_v8 = vmul.f32 %v2363_v21, %v8441_v25  ;;  %v2118_v10 = vmax.f32 %v1594_v28, 1e-16  ;;  %v1799_v52 = vsel %vm396_vm0, %v1419_v37, 0.0 }
 0x303   :  { %v3859_v38 = vpop.eup %3858  ;;  %v2620_v30 = vsub.f32 1.0, %v2492_v63  ;;  %v2366_v16 = vmul.f32 %v3857_v45, %v8442_v9  ;;  %v2117_v12 = vmax.f32 %v1591_v6, 1e-16  ;;  %1803 = vadd.xlane.f32.xlu1 %v1802_v18  ;;  %vm3495_vm0 = vcmask 1042434   ;;  %v8448_v18 = vld [vmem:[#allocation55_spill] sm:$0xff]  ;;  %p4300_p4 = pnand %p4299_p3, %p4293_p0 }
 0x304   :  { %v2619_v22 = vsub.f32 1.0, %v2491_v8  ;;  %v2365_v59 = vmul.f32 %v3859_v38, %v8443_v40  ;;  %v3082_v61 = vsel %vm2917_vm12, %v3081_v3, %v3077_v46  ;;  %3872 = vrsqrt.f32 %v2118_v10  ;;  %v3861_v2 = vpop.eup %3860  ;;  %1800 = vadd.xlane.f32.xlu0 %v1799_v52  ;;  %v1600_v37 = vpop.xlane.xlu1 %1599  ;;  %v8447_v3 = vld [vmem:[#allocation203_spill] sm:$0xff]  ;;  %v8449_v10 = vld [vmem:[#allocation56_spill] sm:$0xff] }
 0x305   :  { %v3096_v36 = vrot.slane %v2620_v30, %v7085_v5  ;;  %v2494_v57 = vmul.f32 %v2366_v16, %v8444_v35  ;;  %v3087_v58 = vsel %vm2924_vm13, %v3086_v23, %v3082_v61  ;;  %3874 = vrsqrt.f32 %v2117_v12  ;;  %v1597_v46 = vpop.xlane.xlu0 %1596  ;;  %v8451_v35 = vld [vmem:[#allocation204_spill] sm:$0xff] }
 0x306   :  { %v3091_v17 = vrot.slane %v2619_v22, %v7109_v7  ;;  %v2493_v50 = vmul.f32 %v2365_v59, %v8445_v54  ;;  %v3863_v42 = vpop.eup %3862  ;;  %v2368_v39 = vmul.f32 %v3861_v2, %v8446_v33  ;;  %v2120_v63 = vmax.f32 %v1600_v37, 1e-16  ;;  %v8450_v59 = vld [vmem:[#allocation220_spill] sm:$0xff]  ;;  %v8452_v54 = vld [vmem:[#allocation150_spill] sm:$0xff] }
 0x307   :  { %v2622_v21 = vsub.f32 1.0, %v2494_v57  ;;  %v2367_v25 = vmul.f32 %v3863_v42, %v8447_v3  ;;  %v2119_v8 = vmax.f32 %v1597_v46, 1e-16  ;;  %v1924_v12 = vmax.f32 %v8450_v59, 1e-16 }
 0x308   :  { %v2621_v45 = vsub.f32 1.0, %v2493_v50  ;;  %v3092_v23 = vsel %vm2931_vm14, %v3091_v17, %v3087_v58  ;;  %v2496_v38 = vmul.f32 %v2368_v39, %v8448_v18  ;;  %3876 = vrsqrt.f32 %v2120_v63  ;;  %v1606_v52 = vpop.xlane.xlu1 %1605  ;;  %v8454_v39 = vld [vmem:[#allocation222_spill] sm:$0xff] }
 0x309   :  { %v3105_v28 = vrot.slane %v2622_v21, %v8326_v51  ;;  %v3097_v30 = vsel %vm2938_vm15, %v3096_v36, %v3092_v23  ;;  %v3865_v9 = vpop.eup %3864  ;;  %v2495_v6 = vmul.f32 %v2367_v25, %v8449_v10  ;;  %3878 = vrsqrt.f32 %v2119_v8  ;;  %v1603_v2 = vpop.xlane.xlu0 %1602  ;;  %v8453_v21 = vld [vmem:[#allocation57_spill] sm:$0xff]  ;;  %v8457_v10 = vld [vmem:[#allocation206_spill] sm:$0xff] }
 0x30a   :  { %v3101_v16 = vrot.slane %v2621_v45, %v8330_v24  ;;  %v7636_v22 = vsel %vm3495_vm0, %v3097_v30, %v7528_v41  ;;  %v3867_v40 = vpop.eup %3866  ;;  %v2624_v61 = vsub.f32 1.0, %v2496_v38  ;;  %v2370_v57 = vmul.f32 %v3865_v9, %v8451_v35  ;;  %v8455_v45 = vld [vmem:[#allocation58_spill] sm:$0xff] }
 0x30b   :  { %v2122_v58 = vmax.f32 %v1606_v52, 1e-16  ;;  %v2623_v17 = vsub.f32 1.0, %v2495_v6  ;;  %v2369_v50 = vmul.f32 %v3867_v40, %v8452_v54  ;;  %v2121_v37 = vmax.f32 %v1603_v2, 1e-16 }
 0x30c   :  { %v3106_v36 = vsel %vm2840_vm1, %v3105_v28, %v3101_v16  ;;  %v3115_v42 = vrot.slane %v2624_v61, %v8337_v19  ;;  %v2498_v33 = vmul.f32 %v2370_v57, %v8453_v21  ;;  %v1923_v63 = vmax.f32 %v8454_v39, 1e-16  ;;  %v1612_v25 = vpop.xlane.xlu1 %1611  ;;  %v8456_v28 = vld [vmem:[#allocation205_spill] sm:$0xff]  ;;  %v8458_v61 = vld [vmem:[#allocation59_spill] sm:$0xff]  ;;  %v8461_v39 = vld [vmem:[#allocation154_spill] sm:$0xff] }
 0x30d   :  { %3880 = vrsqrt.f32 %v2122_v58  ;;  %v3869_v41 = vpop.eup %3868  ;;  %v3110_v46 = vrot.slane %v2623_v17, %v6900_v56  ;;  %v2497_v3 = vmul.f32 %v2369_v50, %v8455_v45  ;;  %v2124_v38 = vmax.f32 %v1612_v25, 1e-16  ;;  %v1609_v30 = vpop.xlane.xlu0 %1608  ;;  %v8459_v58 = vld [vmem:[#allocation60_spill] sm:$0xff] }
 0x30e   :  { %3882 = vrsqrt.f32 %v2121_v37  ;;  %v3871_v8 = vpop.eup %3870  ;;  %v2626_v23 = vsub.f32 1.0, %v2498_v33  ;;  %v2372_v18 = vmul.f32 %v3869_v41, %v8456_v28  ;;  %v2123_v52 = vmax.f32 %v1609_v30, 1e-16  ;;  %v8460_v50 = vld [vmem:[#allocation208_spill] sm:$0xff] }
 0x30f   :  { %3884 = vrsqrt.f32 %v1924_v12  ;;  %v3111_v9 = vsel %vm2847_vm2, %v3110_v46, %v3106_v36  ;;  %v2625_v16 = vsub.f32 1.0, %v2497_v3  ;;  %v2371_v6 = vmul.f32 %v3871_v8, %v8457_v10  ;;  %v8462_v8 = vld [vmem:[#allocation61_spill] sm:$0xff] }
 0x310   :  { %v3125_v40 = vrot.slane %v2626_v23, %v6918_v32  ;;  %v3116_v59 = vsel %vm2854_vm3, %v3115_v42, %v3111_v9  ;;  %v2500_v35 = vmul.f32 %v2372_v18, %v8458_v61  ;;  %3886 = vrsqrt.f32 %v2124_v38  ;;  %v1618_v17 = vpop.xlane.xlu1 %1617  ;;  %v8463_v18 = vld [vmem:[#allocation62_spill] sm:$0xff] }
 0x311   :  { %v3873_v57 = vpop.eup %3872  ;;  %v3120_v12 = vrot.slane %v2625_v16, %v6921_v43  ;;  %v2499_v2 = vmul.f32 %v2371_v6, %v8459_v58  ;;  %3888 = vrsqrt.f32 %v2123_v52  ;;  %v2126_v21 = vmax.f32 %v1618_v17, 1e-16  ;;  %v1615_v33 = vpop.xlane.xlu0 %1614  ;;  %v8464_v16 = vld [vmem:[#allocation226_spill] sm:$0xff]  ;;  %v8465_v52 = vld [vmem:[#allocation155_spill] sm:$0xff] }
 0x312   :  { %v3875_v54 = vpop.eup %3874  ;;  %3890 = vrsqrt.f32 %v1923_v63  ;;  %v2628_v36 = vsub.f32 1.0, %v2500_v35  ;;  %v2374_v37 = vmul.f32 %v3873_v57, %v8460_v50  ;;  %v2125_v45 = vmax.f32 %v1615_v33, 1e-16 }
 0x313   :  { %v3121_v41 = vsel %vm2861_vm4, %v3120_v12, %v3116_v59  ;;  %v2627_v42 = vsub.f32 1.0, %v2499_v2  ;;  %v2373_v46 = vmul.f32 %v3875_v54, %v8461_v39  ;;  %3892 = vrsqrt.f32 %v2126_v21  ;;  %v8466_v12 = vld [vmem:[#allocation209_spill] sm:$0xff]  ;;  %v8468_v21 = vld [vmem:[#allocation228_spill] sm:$0xff] }
 0x314   :  { %v3135_v3 = vrot.slane %v2628_v36, %v6949_v48  ;;  %v3126_v25 = vsel %vm2868_vm5, %v3125_v40, %v3121_v41  ;;  %v2502_v23 = vmul.f32 %v2374_v37, %v8462_v8  ;;  %3894 = vrsqrt.f32 %v2125_v45  ;;  %v1624_v30 = vpop.xlane.xlu1 %1623  ;;  %v8467_v36 = vld [vmem:[#allocation63_spill] sm:$0xff] }
 0x315   :  { %v3877_v28 = vpop.eup %3876  ;;  %v3130_v63 = vrot.slane %v2627_v42, %v6976_v1  ;;  %v2501_v38 = vmul.f32 %v2373_v46, %v8463_v18  ;;  %v1926_v10 = vmax.f32 %v8464_v16, 1e-16  ;;  %v2128_v61 = vmax.f32 %v1624_v30, 1e-16  ;;  %v1621_v35 = vpop.xlane.xlu0 %1620  ;;  %v8469_v42 = vld [vmem:[#allocation64_spill] sm:$0xff]  ;;  %v8470_v8 = vld [vmem:[#allocation211_spill] sm:$0xff] }
 0x316   :  { %v3879_v9 = vpop.eup %3878  ;;  %v2630_v6 = vsub.f32 1.0, %v2502_v23  ;;  %v2376_v59 = vmul.f32 %v3877_v28, %v8465_v52  ;;  %v2127_v2 = vmax.f32 %v1621_v35, 1e-16  ;;  %v1925_v33 = vmax.f32 %v8468_v21, 1e-16  ;;  %v8471_v30 = vld [vmem:[#allocation213_spill] sm:$0xff] }
 0x317   :  { %v3131_v40 = vsel %vm2875_vm6, %v3130_v63, %v3126_v25  ;;  %v2629_v57 = vsub.f32 1.0, %v2501_v38  ;;  %v2375_v58 = vmul.f32 %v3879_v9, %v8466_v12  ;;  %3896 = vrsqrt.f32 %v2128_v61 }
 0x318   :  { %v3145_v17 = vrot.slane %v2630_v6, %v6992_v55  ;;  %v3136_v54 = vsel %vm2882_vm7, %v3135_v3, %v3131_v40  ;;  %v2504_v50 = vmul.f32 %v2376_v59, %v8467_v36  ;;  %3898 = vrsqrt.f32 %v2127_v2  ;;  %v1630_v46 = vpop.xlane.xlu1 %1629  ;;  %v8472_v59 = vld [vmem:[#allocation65_spill] sm:$0xff]  ;;  %v8473_v40 = vld [vmem:[#allocation66_spill] sm:$0xff] }
 0x319   :  { %v3140_v41 = vrot.slane %v2629_v57, %v6995_v14  ;;  %v2503_v39 = vmul.f32 %v2375_v58, %v8469_v42  ;;  %3900 = vrsqrt.f32 %v1926_v10  ;;  %v2130_v28 = vmax.f32 %v1630_v46, 1e-16  ;;  %v1627_v63 = vpop.xlane.xlu0 %1626  ;;  %v8475_v42 = vld [vmem:[#allocation216_spill] sm:$0xff] }
 0x31a   :  { %v3881_v37 = vpop.eup %3880  ;;  %v2632_v25 = vsub.f32 1.0, %v2504_v50  ;;  %v2129_v16 = vmax.f32 %v1627_v63, 1e-16  ;;  %v8477_v63 = vld [vmem:[#allocation68_spill] sm:$0xff]  ;;  %vm3497_vm0 = vcmask 1043459  }
 0x31b   :  { %v3883_v45 = vpop.eup %3882  ;;  %v2378_v23 = vmul.f32 %v3881_v37, %v8470_v8  ;;  %v3141_v18 = vsel %vm2889_vm8, %v3140_v41, %v3136_v54  ;;  %v2631_v38 = vsub.f32 1.0, %v2503_v39  ;;  %3902 = vrsqrt.f32 %v2130_v28  ;;  %v8474_v54 = vld [vmem:[#allocation214_spill] sm:$0xff] }
 0x31c   :  { %v7674_v3 = vpop.eup %3884  ;;  %v2377_v9 = vmul.f32 %v3883_v45, %v8471_v30  ;;  %v3155_v6 = vrot.slane %v2632_v25, %v7021_v15  ;;  %v3146_v52 = vsel %vm8435_vm9, %v3145_v17, %v3141_v18  ;;  %3904 = vrsqrt.f32 %v2129_v16  ;;  %v1636_v12 = vpop.xlane.xlu1 %1635  ;;  %v8476_v25 = vld [vmem:[#allocation67_spill] sm:$0xff] }
 0x31d   :  { %v2506_v61 = vmul.f32 %v2378_v23, %v8472_v59  ;;  %v3887_v10 = vpop.eup %3886  ;;  %v3150_v35 = vrot.slane %v2631_v38, %v7048_v44  ;;  %3906 = vrsqrt.f32 %v1925_v33  ;;  %v2132_v50 = vmax.f32 %v1636_v12, 1e-16  ;;  %v1633_v37 = vpop.xlane.xlu0 %1632  ;;  %v8479_v59 = vld [vmem:[#allocation217_spill] sm:$0xff] }
 0x31e   :  { %v2505_v57 = vmul.f32 %v2377_v9, %v8473_v40  ;;  %v3889_v58 = vpop.eup %3888  ;;  %v2380_v36 = vmul.f32 %v3887_v10, %v8474_v54  ;;  %v2131_v46 = vmax.f32 %v1633_v37, 1e-16  ;;  %v8478_v9 = vld [vmem:[#allocation232_spill] sm:$0xff] }
 0x31f   :  { %v2634_v2 = vsub.f32 1.0, %v2506_v61  ;;  %v7684_v21 = vpop.eup %3890  ;;  %v3151_v17 = vsel %vm2903_vm10, %v3150_v35, %v3146_v52  ;;  %v2379_v39 = vmul.f32 %v3889_v58, %v8475_v42  ;;  %3908 = vrsqrt.f32 %v2132_v50 }
 0x320   :  { %v2633_v41 = vsub.f32 1.0, %v2505_v57  ;;  %v2508_v8 = vmul.f32 %v2380_v36, %v8476_v25  ;;  %v3156_v33 = vsel %vm2910_vm11, %v3155_v6, %v3151_v17  ;;  %v3893_v23 = vpop.eup %3892  ;;  %3910 = vrsqrt.f32 %v2131_v46  ;;  %v1666_v38 = vpop.xlane.xlu1 %1665  ;;  %v8480_v57 = vld [vmem:[#allocation219_spill] sm:$0xff]  ;;  %v8482_v17 = vld [vmem:[#allocation234_spill] sm:$0xff] }
 0x321   :  { %v3165_v45 = vrot.slane %v2634_v2, %v7066_v26  ;;  %v2507_v18 = vmul.f32 %v2379_v39, %v8477_v63  ;;  %v3895_v30 = vpop.eup %3894  ;;  %v1928_v16 = vmax.f32 %v8478_v9, 1e-16  ;;  %v2382_v61 = vmul.f32 %v3893_v23, %v8479_v59  ;;  %v1663_v35 = vpop.xlane.xlu0 %1662  ;;  %v8481_v2 = vld [vmem:[#allocation69_spill] sm:$0xff]  ;;  %v8483_v39 = vld [vmem:[#allocation70_spill] sm:$0xff] }
 0x322   :  { %v3160_v28 = vrot.slane %v2633_v41, %v7069_v53  ;;  %v2636_v52 = vsub.f32 1.0, %v2508_v8  ;;  %v2142_v10 = vmax.f32 %v1666_v38, 1e-16  ;;  %v2381_v12 = vmul.f32 %v3895_v30, %v8480_v57  ;;  %v8484_v63 = vld [vmem:[#allocation221_spill] sm:$0xff]  ;;  %v8485_v30 = vld [vmem:[#allocation223_spill] sm:$0xff] }
 0x323   :  { %v2635_v40 = vsub.f32 1.0, %v2507_v18  ;;  %v2141_v58 = vmax.f32 %v1663_v35, 1e-16  ;;  %v2510_v54 = vmul.f32 %v2382_v61, %v8481_v2  ;;  %v1927_v41 = vmax.f32 %v8482_v17, 1e-16  ;;  %v8488_v17 = vld [vmem:[#allocation224_spill] sm:$0xff] }
 0x324   :  { %v3161_v6 = vsel %vm2917_vm12, %v3160_v28, %v3156_v33  ;;  %3912 = vrsqrt.f32 %v2142_v10  ;;  %v3175_v50 = vrot.slane %v2636_v52, %v7085_v5  ;;  %v3897_v37 = vpop.eup %3896  ;;  %v2509_v46 = vmul.f32 %v2381_v12, %v8483_v39  ;;  %v1711_v25 = vpop.xlane.xlu1 %1710  ;;  %v8486_v10 = vld [vmem:[#allocation71_spill] sm:$0xff] }
 0x325   :  { %v3166_v36 = vsel %vm2924_vm13, %v3165_v45, %v3161_v6  ;;  %v3170_v42 = vrot.slane %v2635_v40, %v7109_v7  ;;  %3914 = vrsqrt.f32 %v2141_v58  ;;  %v3899_v8 = vpop.eup %3898  ;;  %v2638_v23 = vsub.f32 1.0, %v2510_v54  ;;  %v1669_v18 = vpop.xlane.xlu0 %1668  ;;  %v8487_v58 = vld [vmem:[#allocation72_spill] sm:$0xff] }
 0x326   :  { %v2384_v33 = vmul.f32 %v3897_v37, %v8484_v63  ;;  %v2157_v28 = vmax.f32 %v1711_v25, 1e-16  ;;  %v7704_v38 = vpop.eup %3900  ;;  %v2637_v45 = vsub.f32 1.0, %v2509_v46  ;;  %v2383_v9 = vmul.f32 %v3899_v8, %v8485_v30  ;;  %v8491_v30 = vld [vmem:[#allocation74_spill] sm:$0xff] }
 0x327   :  { %v2143_v52 = vmax.f32 %v1669_v18, 1e-16  ;;  %v3171_v59 = vsel %vm2931_vm14, %v3170_v42, %v3166_v36  ;;  %v3184_v61 = vrot.slane %v2638_v23, %v8326_v51  ;;  %v8489_v23 = vld [vmem:[#allocation225_spill] sm:$0xff] }
 0x328   :  { %v2512_v35 = vmul.f32 %v2384_v33, %v8486_v10  ;;  %3916 = vrsqrt.f32 %v2157_v28  ;;  %v3176_v40 = vsel %vm2938_vm15, %v3175_v50, %v3171_v59  ;;  %v3903_v57 = vpop.eup %3902  ;;  %v3180_v12 = vrot.slane %v2637_v45, %v8330_v24  ;;  %v1672_v2 = vpop.xlane.xlu1 %1671  ;;  %v8490_v18 = vld [vmem:[#allocation73_spill] sm:$0xff] }
 0x329   :  { %v2511_v6 = vmul.f32 %v2383_v9, %v8487_v58  ;;  %3918 = vrsqrt.f32 %v2143_v52  ;;  %v7714_v54 = vsel %vm3497_vm0, %v3176_v40, %v7636_v22  ;;  %v3905_v37 = vpop.eup %3904  ;;  %v2386_v42 = vmul.f32 %v3903_v57, %v8488_v17  ;;  %v1714_v46 = vpop.xlane.xlu0 %1713 }
 0x32a   :  { %3920 = vrsqrt.f32 %v1928_v16  ;;  %v2640_v36 = vsub.f32 1.0, %v2512_v35  ;;  %v2144_v39 = vmax.f32 %v1672_v2, 1e-16  ;;  %v7717_v25 = vpop.eup %3906  ;;  %v3185_v50 = vsel %vm2840_vm1, %v3184_v61, %v3180_v12  ;;  %v8492_v61 = vld [vmem:[#allocation227_spill] sm:$0xff] }
 0x32b   :  { %v2639_v8 = vsub.f32 1.0, %v2511_v6  ;;  %v2385_v63 = vmul.f32 %v3905_v37, %v8489_v23  ;;  %v2158_v33 = vmax.f32 %v1714_v46, 1e-16  ;;  %v2514_v22 = vmul.f32 %v2386_v42, %v8490_v18  ;;  %v8493_v6 = vld [vmem:[#allocation229_spill] sm:$0xff]  ;;  %v8494_v42 = vld [vmem:[#allocation75_spill] sm:$0xff] }
 0x32c   :  { %v3194_v28 = vrot.slane %v2640_v36, %v8337_v19  ;;  %3922 = vrsqrt.f32 %v2144_v39  ;;  %v3909_v45 = vpop.eup %3908  ;;  %v1759_v52 = vpop.xlane.xlu1 %1758 }
 0x32d   :  { %v3189_v16 = vrot.slane %v2639_v8, %v6900_v56  ;;  %v2513_v9 = vmul.f32 %v2385_v63, %v8491_v30  ;;  %3924 = vrsqrt.f32 %v2158_v33  ;;  %v3911_v59 = vpop.eup %3910  ;;  %v2642_v10 = vsub.f32 1.0, %v2514_v22  ;;  %v1717_v57 = vpop.xlane.xlu0 %1716  ;;  %v8495_v8 = vld [vmem:[#allocation76_spill] sm:$0xff] }
 0x32e   :  { %3926 = vrsqrt.f32 %v1927_v41  ;;  %v2388_v35 = vmul.f32 %v3909_v45, %v8492_v61  ;;  %v2173_v40 = vmax.f32 %v1759_v52, 1e-16  ;;  %v2387_v2 = vmul.f32 %v3911_v59, %v8493_v6  ;;  %v8497_v45 = vld [vmem:[#allocation243_spill] sm:$0xff]  ;;  %v8498_v59 = vld [vmem:[#allocation245_spill] sm:$0xff]  ;;  %v8500_v6 = vld [vmem:[#allocation238_spill] sm:$0xff] }
 0x32f   :  { %v3190_v12 = vsel %vm2847_vm2, %v3189_v16, %v3185_v50  ;;  %v2641_v58 = vsub.f32 1.0, %v2513_v9  ;;  %v2159_v37 = vmax.f32 %v1717_v57, 1e-16  ;;  %v3204_v36 = vrot.slane %v2642_v10, %v6918_v32  ;;  %v8496_v50 = vld [vmem:[#allocation236_spill] sm:$0xff]  ;;  %v8499_v57 = vld [vmem:[#allocation85_spill] sm:$0xff] }
 0x330   :  { %v3195_v17 = vsel %vm2854_vm3, %v3194_v28, %v3190_v12  ;;  %v2516_v39 = vmul.f32 %v2388_v35, %v8494_v42  ;;  %3928 = vrsqrt.f32 %v2173_v40  ;;  %v2515_v23 = vmul.f32 %v2387_v2, %v8495_v8  ;;  %v1675_v63 = vpop.xlane.xlu1 %1674  ;;  %v8501_v42 = vld [vmem:[#allocation86_spill] sm:$0xff] }
 0x331   :  { %v3913_v46 = vpop.eup %3912  ;;  %v3199_v41 = vrot.slane %v2641_v58, %v6921_v43  ;;  %3930 = vrsqrt.f32 %v2159_v37  ;;  %v1930_v18 = vmax.f32 %v8496_v50, 1e-16  ;;  %v2145_v30 = vmax.f32 %v1675_v63, 1e-16  ;;  %v1762_v9 = vpop.xlane.xlu0 %1761  ;;  %v8502_v8 = vld [vmem:[#allocation138_spill] sm:$0xff] }
 0x332   :  { %v3915_v33 = vpop.eup %3914  ;;  %v2644_v22 = vsub.f32 1.0, %v2516_v39  ;;  %v2398_v16 = vmul.f32 %v3913_v46, %v8497_v45  ;;  %v2643_v52 = vsub.f32 1.0, %v2515_v23  ;;  %v2174_v61 = vmax.f32 %v1762_v9, 1e-16  ;;  %v8503_v45 = vld [vmem:[#allocation247_spill] sm:$0xff] }
 0x333   :  { %v3200_v28 = vsel %vm2861_vm4, %v3199_v41, %v3195_v17  ;;  %v2397_v10 = vmul.f32 %v3915_v33, %v8498_v59  ;;  %3932 = vrsqrt.f32 %v2145_v30  ;;  %v1929_v2 = vmax.f32 %v8500_v6, 1e-16 }
 0x334   :  { %v3214_v35 = vrot.slane %v2644_v22, %v6949_v48  ;;  %v3205_v40 = vsel %vm2868_vm5, %v3204_v36, %v3200_v28  ;;  %v2526_v12 = vmul.f32 %v2398_v16, %v8499_v57  ;;  %v3209_v37 = vrot.slane %v2643_v52, %v6976_v1  ;;  %v1765_v17 = vpop.xlane.xlu1 %1764  ;;  %v8504_v28 = vld [vmem:[#allocation102_spill] sm:$0xff] }
 0x335   :  { %v3917_v58 = vpop.eup %3916  ;;  %v2525_v39 = vmul.f32 %v2397_v10, %v8501_v42  ;;  %3934 = vrsqrt.f32 %v2174_v61  ;;  %v2175_v63 = vmax.f32 %v1765_v17, 1e-16  ;;  %v1720_v33 = vpop.xlane.xlu0 %1719  ;;  %v8505_v61 = vld [vmem:[#allocation88_spill] sm:$0xff] }
 0x336   :  { %v3919_v46 = vpop.eup %3918  ;;  %3936 = vrsqrt.f32 %v1930_v18  ;;  %v2654_v41 = vsub.f32 1.0, %v2526_v12  ;;  %v2413_v23 = vmul.f32 %v3917_v58, %v8502_v8  ;;  %v3210_v50 = vsel %vm2875_vm6, %v3209_v37, %v3205_v40  ;;  %v8506_v58 = vld [vmem:[#allocation246_spill] sm:$0xff] }
 0x337   :  { %v7744_v36 = vpop.eup %3920  ;;  %v2653_v22 = vsub.f32 1.0, %v2525_v39  ;;  %v2399_v16 = vmul.f32 %v3919_v46, %v8503_v45  ;;  %v2160_v30 = vmax.f32 %v1720_v33, 1e-16  ;;  %3938 = vrsqrt.f32 %v2175_v63  ;;  %v8508_v63 = vld [vmem:[#allocation87_spill] sm:$0xff] }
 0x338   :  { %v3263_v9 = vrot.slane %v2654_v41, %v8326_v51  ;;  %v2541_v52 = vmul.f32 %v2413_v23, %v8504_v28  ;;  %v7751_v18 = vsel %vm2882_vm7, %v3214_v35, %v3210_v50  ;;  %v1723_v12 = vpop.xlane.xlu1 %1722  ;;  %v8507_v35 = vld [vmem:[#allocation257_spill] sm:$0xff]  ;;  %v8510_v28 = vld [vmem:[#allocation242_spill] sm:$0xff] }
 0x339   :  { %v3923_v59 = vpop.eup %3922  ;;  %v3259_v10 = vrot.slane %v2653_v22, %v8330_v24  ;;  %v2527_v57 = vmul.f32 %v2399_v16, %v8505_v61  ;;  %3940 = vrsqrt.f32 %v2160_v30  ;;  %v2161_v37 = vmax.f32 %v1723_v12, 1e-16  ;;  %v1678_v42 = vpop.xlane.xlu0 %1677 }
 0x33a   :  { %v3925_v40 = vpop.eup %3924  ;;  %3942 = vrsqrt.f32 %v1929_v2  ;;  %v2400_v6 = vmul.f32 %v3923_v59, %v8506_v58  ;;  %v2146_v8 = vmax.f32 %v1678_v42, 1e-16  ;;  %v2669_v23 = vsub.f32 1.0, %v2541_v52  ;;  %v8509_v2 = vld [vmem:[#allocation101_spill] sm:$0xff] }
 0x33b   :  { %v7756_v39 = vpop.eup %3926  ;;  %v3264_v17 = vsel %vm2840_vm1, %v3263_v9, %v3259_v10  ;;  %v2655_v46 = vsub.f32 1.0, %v2527_v57  ;;  %v2414_v41 = vmul.f32 %v3925_v40, %v8507_v35  ;;  %3944 = vrsqrt.f32 %v2161_v37  ;;  %v8511_v40 = vld [vmem:[#allocation160_spill] sm:$0xff] }
 0x33c   :  { %v2528_v33 = vmul.f32 %v2400_v6, %v8508_v63  ;;  %3946 = vrsqrt.f32 %v2146_v8  ;;  %v1681_v16 = vpop.xlane.xlu1 %1680  ;;  %v1932_v59 = vmax.f32 %v8510_v28, 1e-16  ;;  %v8512_v37 = vld [vmem:[#allocation244_spill] sm:$0xff]  ;;  %v8513_v63 = vld [vmem:[#allocation118_spill] sm:$0xff] }
 0x33d   :  { %v3929_v50 = vpop.eup %3928  ;;  %v3268_v22 = vrot.slane %v2655_v46, %v6900_v56  ;;  %v2542_v45 = vmul.f32 %v2414_v41, %v8509_v2  ;;  %v2147_v10 = vmax.f32 %v1681_v16, 1e-16  ;;  %v1768_v57 = vpop.xlane.xlu0 %1767  ;;  %v1931_v42 = vmax.f32 %v8512_v37, 1e-16 }
 0x33e   :  { %v3931_v30 = vpop.eup %3930  ;;  %v2656_v61 = vsub.f32 1.0, %v2528_v33  ;;  %v2429_v9 = vmul.f32 %v3929_v50, %v7486_v4  ;;  %v2176_v6 = vmax.f32 %v1768_v57, 1e-16  ;;  %v3338_v46 = vrot.slane %v2669_v23, %v8330_v24  ;;  %v8514_v33 = vld [vmem:[#allocation104_spill] sm:$0xff] }
 0x33f   :  { %v3269_v52 = vsel %vm2847_vm2, %v3268_v22, %v3264_v17  ;;  %v2670_v12 = vsub.f32 1.0, %v2542_v45  ;;  %v2415_v58 = vmul.f32 %v3931_v30, %v8511_v40  ;;  %3948 = vrsqrt.f32 %v2147_v10  ;;  %v8515_v45 = vld [vmem:[#allocation249_spill] sm:$0xff] }
 0x340   :  { %v3273_v35 = vrot.slane %v2656_v61, %v8337_v19  ;;  %v3933_v41 = vpop.eup %3932  ;;  %v2557_v4 = vmul.f32 %v2429_v9, %v8513_v63  ;;  %3950 = vrsqrt.f32 %v2176_v6  ;;  %v1771_v17 = vpop.xlane.xlu1 %1770 }
 0x341   :  { %v3342_v8 = vrot.slane %v2670_v12, %v8326_v51  ;;  %v2543_v50 = vmul.f32 %v2415_v58, %v8514_v33  ;;  %3952 = vrsqrt.f32 %v1932_v59  ;;  %v2401_v16 = vmul.f32 %v3933_v41, %v8515_v45  ;;  %v1726_v23 = vpop.xlane.xlu0 %1725  ;;  %v8516_v12 = vld [vmem:[#allocation90_spill] sm:$0xff] }
 0x342   :  { %v3935_v22 = vpop.eup %3934  ;;  %v3274_v2 = vsel %vm2854_vm3, %v3273_v35, %v3269_v52  ;;  %v2177_v30 = vmax.f32 %v1771_v17, 1e-16  ;;  %v2162_v9 = vmax.f32 %v1726_v23, 1e-16  ;;  %v2685_v6 = vsub.f32 1.0, %v2557_v4  ;;  %v8517_v52 = vld [vmem:[#allocation117_spill] sm:$0xff] }
 0x343   :  { %v7775_v28 = vpop.eup %3936  ;;  %v3343_v61 = vsel %vm2840_vm1, %v3342_v8, %v3338_v46  ;;  %v2671_v10 = vsub.f32 1.0, %v2543_v50  ;;  %v2430_v57 = vmul.f32 %v3935_v22, %v7457_v29  ;;  %v2529_v40 = vmul.f32 %v2401_v16, %v8516_v12  ;;  %v8518_v22 = vld [vmem:[#allocation141_spill] sm:$0xff] }
 0x344   :  { %3954 = vrsqrt.f32 %v2177_v30  ;;  %v3939_v58 = vpop.eup %3938  ;;  %v1684_v35 = vpop.xlane.xlu1 %1683  ;;  %v8519_v30 = vld [vmem:[#allocation120_spill] sm:$0xff] }
 0x345   :  { %v3347_v59 = vrot.slane %v2671_v10, %v6900_v56  ;;  %v2558_v37 = vmul.f32 %v2430_v57, %v8517_v52  ;;  %3956 = vrsqrt.f32 %v2162_v9  ;;  %v2657_v63 = vsub.f32 1.0, %v2529_v40  ;;  %v1639_v33 = vpop.xlane.xlu0 %1638  ;;  %v8520_v57 = vld [vmem:[#allocation103_spill] sm:$0xff] }
 0x346   :  { %v3941_v41 = vpop.eup %3940  ;;  %3958 = vrsqrt.f32 %v1931_v42  ;;  %v2431_v46 = vmul.f32 %v3939_v58, %v7547_v31  ;;  %v2148_v8 = vmax.f32 %v1684_v35, 1e-16  ;;  %v2133_v45 = vmax.f32 %v1639_v33, 1e-16 }
 0x347   :  { %v7783_v29 = vpop.eup %3942  ;;  %v3348_v50 = vsel %vm2847_vm2, %v3347_v59, %v3343_v61  ;;  %v2686_v17 = vsub.f32 1.0, %v2558_v37  ;;  %v2416_v4 = vmul.f32 %v3941_v41, %v8518_v22  ;;  %v3278_v16 = vrot.slane %v2657_v63, %v6921_v43  ;;  %v8521_v59 = vld [vmem:[#allocation162_spill] sm:$0xff] }
 0x348   :  { %v2559_v23 = vmul.f32 %v2431_v46, %v8519_v30  ;;  %3960 = vrsqrt.f32 %v2148_v8  ;;  %v3945_v10 = vpop.eup %3944  ;;  %v3417_v42 = vrot.slane %v2685_v6, %v8330_v24  ;;  %v1774_v12 = vpop.xlane.xlu1 %1773  ;;  %v8522_v46 = vld [vmem:[#allocation248_spill] sm:$0xff]  ;;  %v8523_v6 = vld [vmem:[#allocation106_spill] sm:$0xff] }
 0x349   :  { %v3421_v31 = vrot.slane %v2686_v17, %v8326_v51  ;;  %v2544_v9 = vmul.f32 %v2416_v4, %v8520_v57  ;;  %3962 = vrsqrt.f32 %v2133_v45  ;;  %v3947_v40 = vpop.eup %3946  ;;  %v3279_v61 = vsel %vm2861_vm4, %v3278_v16, %v3274_v2  ;;  %v1729_v35 = vpop.xlane.xlu0 %1728  ;;  %v8524_v2 = vld [vmem:[#allocation89_spill] sm:$0xff] }
 0x34a   :  { %v2687_v58 = vsub.f32 1.0, %v2559_v23  ;;  %v2417_v52 = vmul.f32 %v3945_v10, %v8521_v59  ;;  %v2178_v37 = vmax.f32 %v1774_v12, 1e-16  ;;  %v2402_v8 = vmul.f32 %v3947_v40, %v8522_v46  ;;  %v8525_v10 = vld [vmem:[#allocation251_spill] sm:$0xff] }
 0x34b   :  { %v3422_v41 = vsel %vm2840_vm1, %v3421_v31, %v3417_v42  ;;  %v2672_v63 = vsub.f32 1.0, %v2544_v9  ;;  %v2163_v24 = vmax.f32 %v1729_v35, 1e-16  ;;  %vm8546_vm1 = vmmov %vm8435_vm9 }
 0x34c   :  { %v3426_v51 = vrot.slane %v2687_v58, %v6900_v56  ;;  %v2545_v33 = vmul.f32 %v2417_v52, %v8523_v6  ;;  %3964 = vrsqrt.f32 %v2178_v37  ;;  %v3949_v17 = vpop.eup %3948  ;;  %v2530_v4 = vmul.f32 %v2402_v8, %v8524_v2  ;;  %v1687_v45 = vpop.xlane.xlu1 %1686  ;;  %v8526_v52 = vld [vmem:[#allocation92_spill] sm:$0xff] }
 0x34d   :  { %v3352_v22 = vrot.slane %v2672_v63, %v8337_v19  ;;  %3966 = vrsqrt.f32 %v2163_v24  ;;  %v3951_v16 = vpop.eup %3950  ;;  %v2403_v42 = vmul.f32 %v3949_v17, %v8525_v10  ;;  %v2149_v31 = vmax.f32 %v1687_v45, 1e-16  ;;  %v1642_v57 = vpop.xlane.xlu0 %1641  ;;  %v8527_v63 = vld [vmem:[#allocation119_spill] sm:$0xff]  ;;  %v8529_v10 = vld [vmem:[#allocation122_spill] sm:$0xff] }
 0x34e   :  { %v3427_v30 = vsel %vm2847_vm2, %v3426_v51, %v3422_v41  ;;  %v2673_v23 = vsub.f32 1.0, %v2545_v33  ;;  %v7802_v9 = vpop.eup %3952  ;;  %v2658_v12 = vsub.f32 1.0, %v2530_v4  ;;  %v2432_v40 = vmul.f32 %v3951_v16, %v7515_v20  ;;  %v8528_v4 = vld [vmem:[#allocation142_spill] sm:$0xff]  ;;  %vm8553_vm2 = vmmov %vm8546_vm1 }
 0x34f   :  { %v3353_v56 = vsel %vm2854_vm3, %v3352_v22, %v3348_v50  ;;  %v2134_v58 = vmax.f32 %v1642_v57, 1e-16  ;;  %v2531_v37 = vmul.f32 %v2403_v42, %v8526_v52  ;;  %3968 = vrsqrt.f32 %v2149_v31 }
 0x350   :  { %v3357_v59 = vrot.slane %v2673_v23, %v6921_v43  ;;  %v3283_v41 = vrot.slane %v2658_v12, %v6918_v32  ;;  %v2560_v46 = vmul.f32 %v2432_v40, %v8527_v63  ;;  %v1777_v8 = vpop.xlane.xlu1 %1776 }
 0x351   :  { %v3955_v35 = vpop.eup %3954  ;;  %3970 = vrsqrt.f32 %v2134_v58  ;;  %v2659_v50 = vsub.f32 1.0, %v2531_v37  ;;  %v2179_v20 = vmax.f32 %v1777_v8, 1e-16  ;;  %v1732_v33 = vpop.xlane.xlu0 %1731 }
 0x352   :  { %v3957_v24 = vpop.eup %3956  ;;  %v3358_v51 = vsel %vm2861_vm4, %v3357_v59, %v3353_v56  ;;  %v2433_v6 = vmul.f32 %v3955_v35, %v7608_v47  ;;  %v3284_v22 = vsel %vm2868_vm5, %v3283_v41, %v3279_v61  ;;  %v2688_v2 = vsub.f32 1.0, %v2560_v46  ;;  %v8530_v56 = vld [vmem:[#allocation105_spill] sm:$0xff]  ;;  %v8531_v59 = vld [vmem:[#allocation250_spill] sm:$0xff]  ;;  %v8532_v46 = vld [vmem:[#allocation231_spill] sm:$0xff] }
 0x353   :  { %v7812_v17 = vpop.eup %3958  ;;  %v2418_v45 = vmul.f32 %v3957_v24, %v8528_v4  ;;  %v2164_v16 = vmax.f32 %v1732_v33, 1e-16  ;;  %v3288_v23 = vrot.slane %v2659_v50, %v6976_v1  ;;  %3972 = vrsqrt.f32 %v2179_v20  ;;  %v8533_v50 = vld [vmem:[#allocation91_spill] sm:$0xff] }
 0x354   :  { %v2561_v42 = vmul.f32 %v2433_v6, %v8529_v10  ;;  %v3431_v57 = vrot.slane %v2688_v2, %v8337_v19  ;;  %v1690_v12 = vpop.xlane.xlu1 %1689 }
 0x355   :  { %v3961_v31 = vpop.eup %3960  ;;  %v2546_v47 = vmul.f32 %v2418_v45, %v8530_v56  ;;  %3974 = vrsqrt.f32 %v2164_v16  ;;  %v3289_v58 = vsel %vm2875_vm6, %v3288_v23, %v3284_v22  ;;  %v2150_v37 = vmax.f32 %v1690_v12, 1e-16  ;;  %v1645_v35 = vpop.xlane.xlu0 %1644  ;;  %v8534_v22 = vld [vmem:[#allocation78_spill] sm:$0xff] }
 0x356   :  { %v3963_v40 = vpop.eup %3962  ;;  %v2689_v61 = vsub.f32 1.0, %v2561_v42  ;;  %v2404_v52 = vmul.f32 %v3961_v31, %v8531_v59  ;;  %v3432_v41 = vsel %vm2854_vm3, %v3431_v57, %v3427_v30  ;;  %v2135_v24 = vmax.f32 %v1645_v35, 1e-16  ;;  %v8535_v57 = vld [vmem:[#allocation7_spill] sm:$0xff]  ;;  %vm8564_vm3 = vmmov %vm8546_vm1 }
 0x357   :  { %v2674_v63 = vsub.f32 1.0, %v2546_v47  ;;  %v2389_v8 = vmul.f32 %v3963_v40, %v8532_v46  ;;  %3976 = vrsqrt.f32 %v2150_v37  ;;  %v8536_v40 = vld [vmem:[#allocation121_spill] sm:$0xff]  ;;  %v8537_v37 = vld [vmem:[#allocation108_spill] sm:$0xff] }
 0x358   :  { %v3436_v19 = vrot.slane %v2689_v61, %v6921_v43  ;;  %v2532_v6 = vmul.f32 %v2404_v52, %v8533_v50  ;;  %3978 = vrsqrt.f32 %v2135_v24  ;;  %v1780_v4 = vpop.xlane.xlu1 %1779  ;;  %v8538_v46 = vld [vmem:[#allocation253_spill] sm:$0xff] }
 0x359   :  { %v3965_v20 = vpop.eup %3964  ;;  %v3362_v33 = vrot.slane %v2674_v63, %v6918_v32  ;;  %v2517_v2 = vmul.f32 %v2389_v8, %v8534_v22  ;;  %v2180_v10 = vmax.f32 %v1780_v4, 1e-16  ;;  %v1735_v42 = vpop.xlane.xlu0 %1734  ;;  %v8540_v4 = vld [vmem:[#allocation94_spill] sm:$0xff] }
 0x35a   :  { %v3967_v45 = vpop.eup %3966  ;;  %v3437_v16 = vsel %vm2861_vm4, %v3436_v19, %v3432_v41  ;;  %v2660_v30 = vsub.f32 1.0, %v2532_v6  ;;  %v2434_v23 = vmul.f32 %v3965_v20, %v7578_v49  ;;  %v2165_v47 = vmax.f32 %v1735_v42, 1e-16  ;;  %v8539_v20 = vld [vmem:[#allocation230_spill] sm:$0xff]  ;;  %vm8571_vm4 = vmmov %vm8546_vm1 }
 0x35b   :  { %v3363_v43 = vsel %vm2868_vm5, %v3362_v33, %v3358_v51  ;;  %v2645_v31 = vsub.f32 1.0, %v2517_v2  ;;  %v2419_v56 = vmul.f32 %v3967_v45, %v8535_v57  ;;  %3980 = vrsqrt.f32 %v2180_v10 }
 0x35c   :  { %v3293_v12 = vrot.slane %v2660_v30, %v6949_v48  ;;  %v2562_v61 = vmul.f32 %v2434_v23, %v8536_v40  ;;  %v3969_v59 = vpop.eup %3968  ;;  %3982 = vrsqrt.f32 %v2165_v47  ;;  %v1693_v49 = vpop.xlane.xlu1 %1692  ;;  %v8541_v23 = vld [vmem:[#allocation77_spill] sm:$0xff] }
 0x35d   :  { %v3219_v52 = vrot.slane %v2645_v31, %v6995_v14  ;;  %v2547_v35 = vmul.f32 %v2419_v56, %v8537_v37  ;;  %v2405_v8 = vmul.f32 %v3969_v59, %v8538_v46  ;;  %v2151_v24 = vmax.f32 %v1693_v49, 1e-16  ;;  %v1648_v19 = vpop.xlane.xlu0 %1647 }
 0x35e   :  { %v3971_v41 = vpop.eup %3970  ;;  %v3294_v63 = vsel %vm2882_vm7, %v3293_v12, %v3289_v58  ;;  %v2690_v51 = vsub.f32 1.0, %v2562_v61  ;;  %v2136_v22 = vmax.f32 %v1648_v19, 1e-16  ;;  %v8542_v61 = vld [vmem:[#allocation163_spill] sm:$0xff]  ;;  %v8545_v19 = vld [vmem:[#allocation252_spill] sm:$0xff] }
 0x35f   :  { %v3220_v50 = vsel %vm2889_vm8, %v3219_v52, %v7751_v18  ;;  %v2675_v6 = vsub.f32 1.0, %v2547_v35  ;;  %v2390_v33 = vmul.f32 %v3971_v41, %v8539_v20  ;;  %v2533_v45 = vmul.f32 %v2405_v8, %v8540_v4  ;;  %v8543_v35 = vld [vmem:[#allocation124_spill] sm:$0xff]  ;;  %v8547_v4 = vld [vmem:[#allocation235_spill] sm:$0xff] }
 0x360   :  { %v3441_v2 = vrot.slane %v2690_v51, %v6918_v32  ;;  %3984 = vrsqrt.f32 %v2151_v24  ;;  %v3973_v30 = vpop.eup %3972  ;;  %v1783_v42 = vpop.xlane.xlu1 %1782 }
 0x361   :  { %v3367_v58 = vrot.slane %v2675_v6, %v6976_v1  ;;  %v2518_v10 = vmul.f32 %v2390_v33, %v8541_v23  ;;  %3986 = vrsqrt.f32 %v2136_v22  ;;  %v2661_v18 = vsub.f32 1.0, %v2533_v45  ;;  %v1738_v12 = vpop.xlane.xlu0 %1737  ;;  %v8548_v23 = vld [vmem:[#allocation93_spill] sm:$0xff] }
 0x362   :  { %v3975_v31 = vpop.eup %3974  ;;  %v3442_v57 = vsel %vm2868_vm5, %v3441_v2, %v3437_v16  ;;  %v2435_v56 = vmul.f32 %v3973_v30, %v7684_v21  ;;  %v2181_v47 = vmax.f32 %v1783_v42, 1e-16  ;;  %v2166_v52 = vmax.f32 %v1738_v12, 1e-16  ;;  %v8544_v16 = vld [vmem:[#allocation107_spill] sm:$0xff] }
 0x363   :  { %v3368_v32 = vsel %vm2875_vm6, %v3367_v58, %v3363_v43  ;;  %v2646_v40 = vsub.f32 1.0, %v2518_v10  ;;  %v2420_v59 = vmul.f32 %v3975_v31, %v8542_v61  ;;  %v3298_v37 = vrot.slane %v2661_v18, %v6995_v14 }
 0x364   :  { %v2563_v49 = vmul.f32 %v2435_v56, %v8543_v35  ;;  %3988 = vrsqrt.f32 %v2181_v47  ;;  %v3977_v41 = vpop.eup %3976  ;;  %v1696_v21 = vpop.xlane.xlu1 %1695  ;;  %vm3499_vm5 = vcmask 1044484  }
 0x365   :  { %v3224_v51 = vrot.slane %v2646_v40, %v6992_v55  ;;  %v2548_v46 = vmul.f32 %v2420_v59, %v8544_v16  ;;  %3990 = vrsqrt.f32 %v2166_v52  ;;  %v3979_v8 = vpop.eup %3978  ;;  %v3299_v24 = vsel %vm2889_vm8, %v3298_v37, %v3294_v63  ;;  %v1651_v33 = vpop.xlane.xlu0 %1650  ;;  %v8549_v63 = vld [vmem:[#allocation80_spill] sm:$0xff] }
 0x366   :  { %v2691_v43 = vsub.f32 1.0, %v2563_v49  ;;  %v2406_v6 = vmul.f32 %v3977_v41, %v8545_v19  ;;  %v2152_v20 = vmax.f32 %v1696_v21, 1e-16  ;;  %v2391_v45 = vmul.f32 %v3979_v8, %v8547_v4  ;;  %v8550_v41 = vld [vmem:[#allocation123_spill] sm:$0xff] }
 0x367   :  { %v3225_v22 = vsel %vm8546_vm1, %v3224_v51, %v3220_v50  ;;  %v2676_v2 = vsub.f32 1.0, %v2548_v46  ;;  %v2137_v30 = vmax.f32 %v1651_v33, 1e-16  ;;  %v8552_v19 = vld [vmem:[#allocation207_spill] sm:$0xff] }
 0x368   :  { %v3446_v58 = vrot.slane %v2691_v43, %v6976_v1  ;;  %v2534_v10 = vmul.f32 %v2406_v6, %v8548_v23  ;;  %3992 = vrsqrt.f32 %v2152_v20  ;;  %v3981_v42 = vpop.eup %3980  ;;  %v2519_v18 = vmul.f32 %v2391_v45, %v8549_v63  ;;  %v1786_v56 = vpop.xlane.xlu1 %1785  ;;  %v8555_v23 = vld [vmem:[#allocation96_spill] sm:$0xff]  ;;  %v8556_v63 = vld [vmem:[#allocation79_spill] sm:$0xff] }
 0x369   :  { %v3372_v31 = vrot.slane %v2676_v2, %v6949_v48  ;;  %3994 = vrsqrt.f32 %v2137_v30  ;;  %v3983_v47 = vpop.eup %3982  ;;  %v2436_v40 = vmul.f32 %v3981_v42, %v7674_v3  ;;  %v2182_v61 = vmax.f32 %v1786_v56, 1e-16  ;;  %v1741_v59 = vpop.xlane.xlu0 %1740  ;;  %v8554_v2 = vld [vmem:[#allocation233_spill] sm:$0xff] }
 0x36a   :  { %v3447_v12 = vsel %vm2875_vm6, %v3446_v58, %v3442_v57  ;;  %v2662_v50 = vsub.f32 1.0, %v2534_v10  ;;  %v2647_v52 = vsub.f32 1.0, %v2519_v18  ;;  %v2421_v37 = vmul.f32 %v3983_v47, %v7301_v60  ;;  %v8551_v57 = vld [vmem:[#allocation110_spill] sm:$0xff] }
 0x36b   :  { %v3373_v1 = vsel %vm2882_vm7, %v3372_v31, %v3368_v32  ;;  %v2167_v35 = vmax.f32 %v1741_v59, 1e-16  ;;  %v2564_v51 = vmul.f32 %v2436_v40, %v8550_v41  ;;  %3996 = vrsqrt.f32 %v2182_v61  ;;  %v8558_v41 = vld [vmem:[#allocation126_spill] sm:$0xff] }
 0x36c   :  { %v3303_v49 = vrot.slane %v2662_v50, %v6992_v55  ;;  %v3229_v46 = vrot.slane %v2647_v52, %v7048_v44  ;;  %v2549_v21 = vmul.f32 %v2421_v37, %v8551_v57  ;;  %v1699_v3 = vpop.xlane.xlu1 %1698  ;;  %v8559_v57 = vld [vmem:[#allocation109_spill] sm:$0xff]  ;;  %vm3501_vm6 = vcmask 1045509  }
 0x36d   :  { %v3985_v16 = vpop.eup %3984  ;;  %3998 = vrsqrt.f32 %v2167_v35  ;;  %v2692_v43 = vsub.f32 1.0, %v2564_v51  ;;  %v2153_v6 = vmax.f32 %v1699_v3, 1e-16  ;;  %v1654_v20 = vpop.xlane.xlu0 %1653 }
 0x36e   :  { %v3987_v8 = vpop.eup %3986  ;;  %v2407_v32 = vmul.f32 %v3985_v16, %v8552_v19  ;;  %v3304_v60 = vsel %vm8553_vm2, %v3303_v49, %v3299_v24  ;;  %v2677_v33 = vsub.f32 1.0, %v2549_v21  ;;  %v2138_v45 = vmax.f32 %v1654_v20, 1e-16  ;;  %v8561_v20 = vld [vmem:[#allocation239_spill] sm:$0xff] }
 0x36f   :  { %v2392_v4 = vmul.f32 %v3987_v8, %v8554_v2  ;;  %v3230_v30 = vsel %vm2903_vm10, %v3229_v46, %v3225_v22  ;;  %v3451_v58 = vrot.slane %v2692_v43, %v6949_v48  ;;  %4000 = vrsqrt.f32 %v2153_v6  ;;  %v8557_v48 = vld [vmem:[#allocation144_spill] sm:$0xff]  ;;  %v8560_v8 = vld [vmem:[#allocation254_spill] sm:$0xff] }
 0x370   :  { %v2535_v10 = vmul.f32 %v2407_v32, %v8555_v23  ;;  %v3377_v31 = vrot.slane %v2677_v33, %v6995_v14  ;;  %4002 = vrsqrt.f32 %v2138_v45  ;;  %v1789_v56 = vpop.xlane.xlu1 %1788 }
 0x371   :  { %v3989_v42 = vpop.eup %3988  ;;  %v2520_v18 = vmul.f32 %v2392_v4, %v8556_v63  ;;  %v2183_v40 = vmax.f32 %v1789_v56, 1e-16  ;;  %v1744_v61 = vpop.xlane.xlu0 %1743  ;;  %v3452_v22 = vsel %vm2882_vm7, %v3451_v58, %v3447_v12  ;;  %v8562_v58 = vld [vmem:[#allocation95_spill] sm:$0xff]  ;;  %vm3503_vm7 = vcmask 1046534  }
 0x372   :  { %v3991_v47 = vpop.eup %3990  ;;  %v2663_v24 = vsub.f32 1.0, %v2535_v10  ;;  %v2437_v50 = vmul.f32 %v3989_v42, %v7717_v25  ;;  %v2168_v37 = vmax.f32 %v1744_v61, 1e-16  ;;  %v3378_v35 = vsel %vm2889_vm8, %v3377_v31, %v3373_v1  ;;  %v8563_v31 = vld [vmem:[#allocation82_spill] sm:$0xff] }
 0x373   :  { %v2648_v59 = vsub.f32 1.0, %v2520_v18  ;;  %v2422_v52 = vmul.f32 %v3991_v47, %v8557_v48  ;;  %4004 = vrsqrt.f32 %v2183_v40 }
 0x374   :  { %v3308_v49 = vrot.slane %v2663_v24, %v7048_v44  ;;  %v2565_v51 = vmul.f32 %v2437_v50, %v8558_v41  ;;  %4006 = vrsqrt.f32 %v2168_v37  ;;  %v1702_v21 = vpop.xlane.xlu1 %1701 }
 0x375   :  { %v3993_v16 = vpop.eup %3992  ;;  %v3234_v46 = vrot.slane %v2648_v59, %v7021_v15  ;;  %v2550_v25 = vmul.f32 %v2422_v52, %v8559_v57  ;;  %v2154_v19 = vmax.f32 %v1702_v21, 1e-16  ;;  %v1657_v32 = vpop.xlane.xlu0 %1656  ;;  %v8565_v52 = vld [vmem:[#allocation125_spill] sm:$0xff]  ;;  %v8567_v57 = vld [vmem:[#allocation134_spill] sm:$0xff] }
 0x376   :  { %v3995_v3 = vpop.eup %3994  ;;  %v2693_v12 = vsub.f32 1.0, %v2565_v51  ;;  %v2408_v43 = vmul.f32 %v3993_v16, %v8560_v8  ;;  %v3309_v1 = vsel %vm2903_vm10, %v3308_v49, %v3304_v60  ;;  %v2139_v2 = vmax.f32 %v1657_v32, 1e-16  ;;  %v8566_v51 = vld [vmem:[#allocation112_spill] sm:$0xff] }
 0x377   :  { %v2678_v6 = vsub.f32 1.0, %v2550_v25  ;;  %v2393_v33 = vmul.f32 %v3995_v3, %v8561_v20  ;;  %v3235_v4 = vsel %vm2910_vm11, %v3234_v46, %v3230_v30  ;;  %4008 = vrsqrt.f32 %v2154_v19 }
 0x378   :  { %v3456_v45 = vrot.slane %v2693_v12, %v6995_v14  ;;  %v2536_v23 = vmul.f32 %v2408_v43, %v8562_v58  ;;  %v3997_v10 = vpop.eup %3996  ;;  %4010 = vrsqrt.f32 %v2139_v2  ;;  %v1792_v18 = vpop.xlane.xlu1 %1791  ;;  %v8568_v12 = vld [vmem:[#allocation237_spill] sm:$0xff] }
 0x379   :  { %v3382_v42 = vrot.slane %v2678_v6, %v6992_v55  ;;  %v2521_v63 = vmul.f32 %v2393_v33, %v8563_v31  ;;  %v2438_v47 = vmul.f32 %v3997_v10, %v7704_v38  ;;  %v2184_v24 = vmax.f32 %v1792_v18, 1e-16  ;;  %v1747_v50 = vpop.xlane.xlu0 %1746  ;;  %v8569_v6 = vld [vmem:[#allocation98_spill] sm:$0xff] }
 0x37a   :  { %v3999_v56 = vpop.eup %3998  ;;  %v2664_v60 = vsub.f32 1.0, %v2536_v23  ;;  %v3457_v30 = vsel %vm2889_vm8, %v3456_v45, %v3452_v22  ;;  %v2169_v61 = vmax.f32 %v1747_v50, 1e-16  ;;  %v8570_v45 = vld [vmem:[#allocation81_spill] sm:$0xff]  ;;  %vm3505_vm8 = vcmask 1047559  }
 0x37b   :  { %v2649_v40 = vsub.f32 1.0, %v2521_v63  ;;  %v2423_v14 = vmul.f32 %v3999_v56, %v7320_v0  ;;  %v3383_v59 = vsel %vm8564_vm3, %v3382_v42, %v3378_v35  ;;  %v2566_v37 = vmul.f32 %v2438_v47, %v8565_v52 }
 0x37c   :  { %v3313_v48 = vrot.slane %v2664_v60, %v7021_v15  ;;  %4012 = vrsqrt.f32 %v2184_v24  ;;  %v4001_v49 = vpop.eup %4000  ;;  %v1705_v16 = vpop.xlane.xlu1 %1704  ;;  %v8572_v24 = vld [vmem:[#allocation128_spill] sm:$0xff] }
 0x37d   :  { %v3239_v41 = vrot.slane %v2649_v40, %v7069_v53  ;;  %v2551_v38 = vmul.f32 %v2423_v14, %v8566_v51  ;;  %4014 = vrsqrt.f32 %v2169_v61  ;;  %v4003_v46 = vpop.eup %4002  ;;  %v2694_v22 = vsub.f32 1.0, %v2566_v37  ;;  %v1660_v21 = vpop.xlane.xlu0 %1659  ;;  %v8573_v61 = vld [vmem:[#allocation111_spill] sm:$0xff] }
 0x37e   :  { %v2409_v25 = vmul.f32 %v4001_v49, %v8567_v57  ;;  %v2155_v0 = vmax.f32 %v1705_v16, 1e-16  ;;  %v3314_v35 = vsel %vm2910_vm11, %v3313_v48, %v3309_v1  ;;  %v2394_v8 = vmul.f32 %v4003_v46, %v8568_v12  ;;  %v8574_v37 = vld [vmem:[#allocation255_spill] sm:$0xff]  ;;  %v8577_v12 = vld [vmem:[#allocation84_spill] sm:$0xff] }
 0x37f   :  { %v2679_v3 = vsub.f32 1.0, %v2551_v38  ;;  %v2140_v43 = vmax.f32 %v1660_v21, 1e-16  ;;  %v3240_v19 = vsel %vm2917_vm12, %v3239_v41, %v3235_v4  ;;  %v3461_v32 = vrot.slane %v2694_v22, %v6992_v55  ;;  %v8575_v38 = vld [vmem:[#allocation241_spill] sm:$0xff] }
 0x380   :  { %v2537_v20 = vmul.f32 %v2409_v25, %v8569_v6  ;;  %4016 = vrsqrt.f32 %v2155_v0  ;;  %v4005_v33 = vpop.eup %4004  ;;  %v2522_v58 = vmul.f32 %v2394_v8, %v8570_v45  ;;  %v1795_v23 = vpop.xlane.xlu1 %1794  ;;  %v8576_v25 = vld [vmem:[#allocation97_spill] sm:$0xff] }
 0x381   :  { %v3387_v2 = vrot.slane %v2679_v3, %v7048_v44  ;;  %4018 = vrsqrt.f32 %v2140_v43  ;;  %v4007_v10 = vpop.eup %4006  ;;  %v2439_v42 = vmul.f32 %v4005_v33, %v7756_v39  ;;  %v2185_v31 = vmax.f32 %v1795_v23, 1e-16  ;;  %v1750_v63 = vpop.xlane.xlu0 %1749  ;;  %v8578_v23 = vld [vmem:[#allocation127_spill] sm:$0xff] }
 0x382   :  { %v2665_v1 = vsub.f32 1.0, %v2537_v20  ;;  %v3462_v4 = vsel %vm8571_vm4, %v3461_v32, %v3457_v30  ;;  %v2650_v18 = vsub.f32 1.0, %v2522_v58  ;;  %v2424_v55 = vmul.f32 %v4007_v10, %v7305_v27 }
 0x383   :  { %v2170_v56 = vmax.f32 %v1750_v63, 1e-16  ;;  %v3388_v60 = vsel %vm2903_vm10, %v3387_v2, %v3383_v59  ;;  %v2567_v50 = vmul.f32 %v2439_v42, %v8572_v24  ;;  %4020 = vrsqrt.f32 %v2185_v31  ;;  %v8579_v31 = vld [vmem:[#allocation114_spill] sm:$0xff] }
 0x384   :  { %v3318_v47 = vrot.slane %v2665_v1, %v7069_v53  ;;  %v4009_v40 = vpop.eup %4008  ;;  %v3244_v14 = vrot.slane %v2650_v18, %v7066_v26  ;;  %v2552_v39 = vmul.f32 %v2424_v55, %v8573_v61  ;;  %v1753_v48 = vpop.xlane.xlu1 %1752 }
 0x385   :  { %4022 = vrsqrt.f32 %v2170_v56  ;;  %v4011_v52 = vpop.eup %4010  ;;  %v2695_v30 = vsub.f32 1.0, %v2567_v50  ;;  %v2410_v49 = vmul.f32 %v4009_v40, %v8574_v37  ;;  %v2171_v27 = vmax.f32 %v1753_v48, 1e-16  ;;  %v1708_v41 = vpop.xlane.xlu0 %1707  ;;  %v8580_v56 = vld [vmem:[#allocation256_spill] sm:$0xff] }
 0x386   :  { %v3319_v59 = vsel %vm2917_vm12, %v3318_v47, %v3314_v35  ;;  %v2680_v51 = vsub.f32 1.0, %v2552_v39  ;;  %v2395_v16 = vmul.f32 %v4011_v52, %v8575_v38  ;;  %v2156_v46 = vmax.f32 %v1708_v41, 1e-16  ;;  %v8581_v40 = vld [vmem:[#allocation240_spill] sm:$0xff] }
 0x387   :  { %v3245_v22 = vsel %vm2924_vm13, %v3244_v14, %v3240_v19  ;;  %v3466_v57 = vrot.slane %v2695_v30, %v7048_v44  ;;  %v2538_v0 = vmul.f32 %v2410_v49, %v8576_v25  ;;  %4024 = vrsqrt.f32 %v2171_v27  ;;  %v8582_v48 = vld [vmem:[#allocation100_spill] sm:$0xff]  ;;  %v8583_v49 = vld [vmem:[#allocation83_spill] sm:$0xff]  ;;  %v8584_v25 = vld [vmem:[#allocation130_spill] sm:$0xff] }
 0x388   :  { %v3392_v3 = vrot.slane %v2680_v51, %v7021_v15  ;;  %v2523_v8 = vmul.f32 %v2395_v16, %v8577_v12  ;;  %4026 = vrsqrt.f32 %v2156_v46  ;;  %v1756_v43 = vpop.xlane.xlu1 %1755 }
 0x389   :  { %v4013_v21 = vpop.eup %4012  ;;  %v2666_v35 = vsub.f32 1.0, %v2538_v0  ;;  %v2172_v20 = vmax.f32 %v1756_v43, 1e-16  ;;  %v1798_v33 = vpop.xlane.xlu0 %1797  ;;  %v3467_v19 = vsel %vm2903_vm10, %v3466_v57, %v3462_v4 }
 0x38a   :  { %v4015_v32 = vpop.eup %4014  ;;  %v2440_v6 = vmul.f32 %v4013_v21, %v7744_v36  ;;  %v2651_v2 = vsub.f32 1.0, %v2523_v8  ;;  %v2186_v45 = vmax.f32 %v1798_v33, 1e-16  ;;  %v3393_v58 = vsel %vm2910_vm11, %v3392_v3, %v3388_v60  ;;  %v8585_v3 = vld [vmem:[#allocation113_spill] sm:$0xff] }
 0x38b   :  { %v2425_v44 = vmul.f32 %v4015_v32, %v7365_v62  ;;  %4028 = vrsqrt.f32 %v2172_v20  ;;  %v3323_v1 = vrot.slane %v2666_v35, %v7066_v26 }
 0x38c   :  { %v2568_v10 = vmul.f32 %v2440_v6, %v8578_v23  ;;  %4030 = vrsqrt.f32 %v2186_v45  ;;  %v1804_v36 = vpop.xlane.xlu1 %1803  ;;  %v3249_v18 = vrot.slane %v2651_v2, %v7109_v7  ;;  %v8588_v23 = vld [vmem:[#allocation99_spill] sm:$0xff] }
 0x38d   :  { %v4017_v42 = vpop.eup %4016  ;;  %v2553_v63 = vmul.f32 %v2425_v44, %v8579_v31  ;;  %v2188_v62 = vmax.f32 %v1804_v36, 1e-16  ;;  %v1801_v24 = vpop.xlane.xlu0 %1800  ;;  %v3324_v60 = vsel %vm2924_vm13, %v3323_v1, %v3319_v59 }
 0x38e   :  { %v4019_v55 = vpop.eup %4018  ;;  %v2696_v4 = vsub.f32 1.0, %v2568_v10  ;;  %v2411_v47 = vmul.f32 %v4017_v42, %v8580_v56  ;;  %v2187_v61 = vmax.f32 %v1801_v24, 1e-16  ;;  %v3250_v39 = vsel %vm2931_vm14, %v3249_v18, %v3245_v22 }
 0x38f   :  { %v2681_v50 = vsub.f32 1.0, %v2553_v63  ;;  %v2396_v14 = vmul.f32 %v4019_v55, %v8581_v40  ;;  %4032 = vrsqrt.f32 %v2188_v62 }
 0x390   :  { %v2539_v52 = vmul.f32 %v2411_v47, %v8582_v48  ;;  %v3471_v30 = vrot.slane %v2696_v4, %v7021_v15  ;;  %v4021_v37 = vpop.eup %4020  ;;  %4034 = vrsqrt.f32 %v2187_v61  ;;  %v8589_v4 = vld [vmem:[#allocation115_spill] sm:$0xff]  ;;  %v8590_v47 = vld [vmem:[#allocation129_spill] sm:$0xff] }
 0x391   :  { %v2524_v27 = vmul.f32 %v2396_v14, %v8583_v49  ;;  %v3397_v41 = vrot.slane %v2681_v50, %v7069_v53  ;;  %v2441_v59 = vmul.f32 %v4021_v37, %v7783_v29  ;;  %v8592_v37 = vld [vmem:[#allocation132_spill] sm:$0xff] }
 0x392   :  { %v4023_v51 = vpop.eup %4022  ;;  %v2667_v38 = vsub.f32 1.0, %v2539_v52  ;;  %v3472_v16 = vsel %vm2910_vm11, %v3471_v30, %v3467_v19  ;;  %v8587_v19 = vld [vmem:[#allocation116_spill] sm:$0xff] }
 0x393   :  { %v2426_v46 = vmul.f32 %v4023_v51, %v7352_v34  ;;  %v2652_v22 = vsub.f32 1.0, %v2524_v27  ;;  %v3398_v57 = vsel %vm2917_vm12, %v3397_v41, %v3393_v58  ;;  %v2569_v0 = vmul.f32 %v2441_v59, %v8584_v25  ;;  %v8586_v34 = vld [vmem:[#allocation137_spill] sm:$0xff] }
 0x394   :  { %v3328_v15 = vrot.slane %v2667_v38, %v7109_v7  ;;  %v4025_v21 = vpop.eup %4024 }
 0x395   :  { %v2554_v12 = vmul.f32 %v2426_v46, %v8585_v3  ;;  %v3254_v8 = vrot.slane %v2652_v22, %v7085_v5  ;;  %v4027_v43 = vpop.eup %4026  ;;  %v2427_v29 = vmul.f32 %v4025_v21, %v7428_v11  ;;  %v2697_v32 = vsub.f32 1.0, %v2569_v0 }
 0x396   :  { %v3329_v35 = vsel %vm2931_vm14, %v3328_v15, %v3324_v60  ;;  %v2412_v6 = vmul.f32 %v4027_v43, %v8586_v34 }
 0x397   :  { %v2682_v20 = vsub.f32 1.0, %v2554_v12  ;;  %v3255_v33 = vsel %vm2938_vm15, %v3254_v8, %v3250_v39  ;;  %v2555_v2 = vmul.f32 %v2427_v29, %v8587_v19  ;;  %v3476_v44 = vrot.slane %v2697_v32, %v7069_v53  ;;  %v8591_v39 = vld [vmem:[#allocation131_spill] sm:$0xff] }
 0x398   :  { %v3500_v45 = vsel %vm3499_vm5, %v3255_v33, %v7714_v54  ;;  %v4029_v58 = vpop.eup %4028  ;;  %v2540_v10 = vmul.f32 %v2412_v6, %v8588_v23 }
 0x399   :  { %v3402_v1 = vrot.slane %v2682_v20, %v7066_v26  ;;  %v4031_v11 = vpop.eup %4030  ;;  %v2428_v42 = vmul.f32 %v4029_v58, %v7410_v13  ;;  %v2683_v31 = vsub.f32 1.0, %v2555_v2  ;;  %v3477_v63 = vsel %vm2917_vm12, %v3476_v44, %v3472_v16 }
 0x39a   :  { %v2442_v36 = vmul.f32 %v4031_v11, %v7775_v28  ;;  %v2668_v18 = vsub.f32 1.0, %v2540_v10 }
 0x39b   :  { %v3403_v55 = vsel %vm2924_vm13, %v3402_v1, %v3398_v57  ;;  %v2556_v53 = vmul.f32 %v2428_v42, %v8589_v4  ;;  %v3407_v54 = vrot.slane %v2683_v31, %v7109_v7 }
 0x39c   :  { %v4033_v56 = vpop.eup %4032  ;;  %v2570_v62 = vmul.f32 %v2442_v36, %v8590_v47  ;;  %v3333_v24 = vrot.slane %v2668_v18, %v7085_v5 }
 0x39d   :  { %v4035_v60 = vpop.eup %4034  ;;  %v2444_v13 = vmul.f32 %v4033_v56, %v7802_v9  ;;  %v2684_v50 = vsub.f32 1.0, %v2556_v53  ;;  %v3408_v40 = vsel %vm2931_vm14, %v3407_v54, %v3403_v55 }
 0x39e   :  { %v2443_v28 = vmul.f32 %v4035_v60, %v7812_v17  ;;  %v2698_v14 = vsub.f32 1.0, %v2570_v62  ;;  %v3334_v61 = vsel %vm2938_vm15, %v3333_v24, %v3329_v35 }
 0x39f   :  { %v2572_v48 = vmul.f32 %v2444_v13, %v8591_v39  ;;  %v3412_v52 = vrot.slane %v2684_v50, %v7085_v5  ;;  %v3502_v30 = vsel %vm3501_vm6, %v3334_v61, %v3500_v45 }
 0x3a0   :  { %v2571_v49 = vmul.f32 %v2443_v28, %v8592_v37  ;;  %v3481_v27 = vrot.slane %v2698_v14, %v7066_v26 }
 0x3a1   :  { %v2700_v41 = vsub.f32 1.0, %v2572_v48  ;;  %v3413_v9 = vsel %vm2938_vm15, %v3412_v52, %v3408_v40 }
 0x3a2   :  { %v2699_v51 = vsub.f32 1.0, %v2571_v49  ;;  %v3482_v59 = vsel %vm2924_vm13, %v3481_v27, %v3477_v63  ;;  %v3504_v17 = vsel %vm3503_vm7, %v3413_v9, %v3502_v30 }
 0x3a3   :  { %v3491_v38 = vrot.slane %v2700_v41, %v7085_v5 }
 0x3a4   :  { %v3486_v16 = vrot.slane %v2699_v51, %v7109_v7 }
 0x3a6   :  { %v3487_v46 = vsel %vm2931_vm14, %v3486_v16, %v3482_v59 }
 0x3a7   :  { %v3492_v22 = vsel %vm2938_vm15, %v3491_v38, %v3487_v46 }
 0x3a8   :  { %v3506_v26 = vsel %vm3505_vm8, %v3492_v22, %v3504_v17 }
 0x3a9   :  { %3508 = vst [vmem:[#allocation2] sm:$0xff] %v3506_v26 }
 0x3aa   :  { %4303 = shalt.err (!%p4300_p4)
}
 0x3ab   :  { %3518 = dma.vmem_to_hbm [thread:$0]  %s3516_s16, 128, %s7985_s2, [#allocation3]  }
 0x3ac   :  { %4312 = dma.done.wait [#allocation3], 128  }
 0x3ad   :  { %4313 = vsyncadd [#allocation3], 4294967168 }
 0x3ae   :  { %3522 = vsyncpa [#allocation3], 1 }

</bundles_post_ra>
